<compile_context>
chip_gen: v5e
topology: v5e:2x2
jax: 0.10.0
libtpu: 0.0.40
codegen_flags: <defaults>
</compile_context>

<pallas_src>
import functools

import jax
import jax.numpy as jnp
from jax.experimental import pallas as pl
from jax.experimental.pallas import tpu as pltpu


# ----------------------------------------------------------------------------- kernel
def _neural_field_kernel(x_ref, fcol_ref, ocol_ref, w1s_ref, b1_ref,
                         w2_ref, b2_ref, w3_ref, b3_ref, o_ref):
    x = x_ref[...]              # (d_in, TM) f32, points on the 128-lane axis
    fcol = fcol_ref[...]        # (2K, 1)  [f0..fK-1, f0..fK-1]
    ocol = ocol_ref[...]        # (2K, 1)  [0..0, pi/2..pi/2]  (cos(z) = sin(z + pi/2))
    d_in = x.shape[0]

    # Positional encoding per input dim (no dense, 50%-zero frequency table):
    #   phase_d = f * x_d (+ pi/2 on cos rows)  ->  one sin() per block (f32).
    # First layer applied per dim block with a pre-split W1, summing f32
    # partials — keeps everything feature-major with no sublane concat.
    h1 = None
    for d in range(d_in):
        phase_d = fcol * x[d:d + 1, :] + ocol                     # (2K, TM) f32
        enc_d = jnp.sin(phase_d).astype(jnp.bfloat16)             # phase/sin stay f32
        part = jnp.dot(w1s_ref[d], enc_d, preferred_element_type=jnp.float32)
        h1 = part if h1 is None else h1 + part

    h = jnp.maximum(h1 + b1_ref[...], 0.0).astype(jnp.bfloat16)   # (hidden, TM)
    h = jnp.dot(w2_ref[...], h, preferred_element_type=jnp.float32) + b2_ref[...]
    h = jnp.maximum(h, 0.0).astype(jnp.bfloat16)
    out = jnp.dot(w3_ref[...], h, preferred_element_type=jnp.float32) + b3_ref[...]
    o_ref[...] = out.astype(o_ref.dtype)                          # (d_out, TM) lane-dense


# ----------------------------------------------------------------------------- params
def make_params(key, d_in, d_out, hidden_dim, n_layers, n_freqs):
    """Deterministic synthetic weights.  Stores kernel-ready arrays (pre-
    transposed, pre-cast to bf16, W1 pre-split per input dim) plus f32
    originals for the pure-JAX reference."""
    assert n_layers == 3, "kernel is specialized to the default n_layers=3"
    pos_dim = d_in * n_freqs * 2
    two_k = 2 * n_freqs
    ks = jax.random.split(key, 6)

    def lin(kw, kb, fan_in, fan_out):
        bound = 1.0 / jnp.sqrt(fan_in)
        w = jax.random.uniform(kw, (fan_in, fan_out), jnp.float32, -bound, bound)
        b = jax.random.uniform(kb, (fan_out,), jnp.float32, -bound, bound)
        return w, b

    w1, b1 = lin(ks[0], ks[1], pos_dim, hidden_dim)
    w2, b2 = lin(ks[2], ks[3], hidden_dim, hidden_dim)
    w3, b3 = lin(ks[4], ks[5], hidden_dim, d_out)

    freqs = 2.0 ** jnp.arange(n_freqs, dtype=jnp.float32)
    fcol = jnp.concatenate([freqs, freqs]).reshape(two_k, 1)
    ocol = jnp.concatenate([jnp.zeros((n_freqs,), jnp.float32),
                            jnp.full((n_freqs,), jnp.pi / 2.0, jnp.float32)]
                           ).reshape(two_k, 1)

    # W1 split per input dim: w1s[d] = W1[d*2K:(d+1)*2K, :].T  -> (d_in, H, 2K)
    w1s = jnp.stack([w1[d * two_k:(d + 1) * two_k, :].T for d in range(d_in)],
                    axis=0).astype(jnp.bfloat16)

    return dict(
        # kernel-ready
        fcol=fcol, ocol=ocol,
        w1s=w1s, b1c=b1.reshape(-1, 1),
        w2t=w2.T.astype(jnp.bfloat16), b2c=b2.reshape(-1, 1),
        w3t=w3.T.astype(jnp.bfloat16), b3c=b3.reshape(-1, 1),
        # f32 originals (reference only)
        w1=w1, b1=b1, w2=w2, b2=b2, w3=w3, b3=b3,
    )


# ----------------------------------------------------------------------------- tiling
@functools.lru_cache(maxsize=1)
def _num_tensorcores():
    """Best-effort TensorCore count per chip (v7x=2, v5e/v6e=1).  Safe fallback."""
    try:
        info = pltpu.get_tpu_info()
        for name in ("num_cores", "core_count", "num_tensor_cores",
                     "tensorcore_count", "cores_per_chip"):
            v = getattr(info, name, None)
            if isinstance(v, int) and v > 0:
                return max(1, min(int(v), 8))
    except Exception:
        pass
    try:
        dev = jax.devices()[0]
        for name in ("num_cores", "core_count"):
            v = getattr(dev, name, None)
            if isinstance(v, int) and v > 0:
                return max(1, min(int(v), 8))
    except Exception:
        pass
    return 1


def _round_up(v, m):
    return ((v + m - 1) // m) * m


def _pick_tile(n_points, tm_max, n_cores):
    """Point-tile selection.  Single TC: one big tile (splitting small N is pure
    step overhead).  Multi TC (v7x): ~4 steps per core for load balance under
    dimension_semantics=("parallel",).  Always a multiple of 128 (lane axis)."""
    tm_max = max(128, (int(tm_max) // 128) * 128)
    if n_cores > 1:
        tm = _round_up(max(1, pl.cdiv(n_points, 4 * n_cores)), 128)
    else:
        tm = _round_up(max(1, n_points), 128)
    return max(128, min(tm_max, tm))


def _x_spec(d_in, tm, n_steps):
    """x input spec; deepen pipelining only when tiles stay small (DMA issue
    latency exposed), which our tiling only produces on multi-TC small-N cases."""
    if tm <= 1024 and n_steps > 2:
        try:
            return pl.BlockSpec((d_in, tm), lambda i: (0, i),
                                pipeline_mode=pl.Buffered(3))
        except TypeError:
            pass
    return pl.BlockSpec((d_in, tm), lambda i: (0, i))


# ----------------------------------------------------------------------------- forward
@functools.partial(jax.jit, static_argnames=("tm",))
def _forward_impl(x, fcol, ocol, w1s, b1, w2t, b2, w3t, b3, *, tm):
    d_in = x.shape[-1]
    lead = x.shape[:-1]
    x_flat = x.reshape(-1, d_in).astype(jnp.float32)
    n = x_flat.shape[0]
    n_pad = _round_up(n, tm)
    n_steps = n_pad // tm

    # Feature-major (points on lanes).  Transpose + pad live inside this jit so
    # XLA fuses them into a single copy; producing coordinates feature-major
    # upstream would remove even that (see notes).
    x_fm = jnp.transpose(x_flat)                       # (d_in, N)
    if n_pad != n:
        x_fm = jnp.pad(x_fm, ((0, 0), (0, n_pad - n)))

    two_k = fcol.shape[0]
    pos_dim = d_in * two_k
    hidden = w1s.shape[1]
    d_out = w3t.shape[0]

    def const(a):
        zeros = (0,) * a.ndim
        return pl.BlockSpec(a.shape, lambda i: zeros)

    flops = 2 * n * (pos_dim * hidden + hidden * hidden + hidden * d_out)
    cost = pl.CostEstimate(flops=flops,
                           transcendentals=n * pos_dim,
                           bytes_accessed=4 * n * (d_in + d_out))

    # Rough per-point VMEM scratch (f32 phase, bf16 enc, f32+bf16 hiddens, I/O).
    per_point = 6 * pos_dim + 14 * hidden + 4 * (d_in + d_out)
    vmem_est = tm * per_point + (2 << 20)
    vmem_limit = None if vmem_est < (12 << 20) else min(vmem_est + (4 << 20), 48 << 20)

    out_fm = pl.pallas_call(
        _neural_field_kernel,
        out_shape=jax.ShapeDtypeStruct((d_out, n_pad), jnp.float32),
        grid_spec=pltpu.PrefetchScalarGridSpec(
            num_scalar_prefetch=0,
            grid=(n_steps,),
            in_specs=[
                _x_spec(d_in, tm, n_steps),            # x tile (points on lanes)
                const(fcol), const(ocol),              # per-dim freq / phase offset
                const(w1s), const(b1),                 # layer 1 (pre-split W1^T, b)
                const(w2t), const(b2),                 # layer 2
                const(w3t), const(b3),                 # layer 3
            ],
            out_specs=pl.BlockSpec((d_out, tm), lambda i: (0, i)),
        ),
        compiler_params=pltpu.CompilerParams(
            dimension_semantics=("parallel",),
            vmem_limit_bytes=vmem_limit),
        cost_estimate=cost,
    )(x_fm, fcol, ocol, w1s, b1, w2t, b2, w3t, b3)

    out = jnp.transpose(out_fm[:, :n])                 # (N, d_out); free when d_out==1
    return out.reshape(*lead, d_out)


def neural_field_forward(x, params, *, tm_max=8192):
    """x: (..., d_in) float32 -> (..., d_out) float32."""
    n = 1
    for s in x.shape[:-1]:
        n *= int(s)
    tm = _pick_tile(n, tm_max, _num_tensorcores())
    return _forward_impl(x, params["fcol"], params["ocol"],
                         params["w1s"], params["b1c"],
                         params["w2t"], params["b2c"],
                         params["w3t"], params["b3c"], tm=tm)


# ----------------------------------------------------------------------------- reference
def neural_field_reference(x, params):
    """Pure-JAX f32 reference mirroring the PyTorch module exactly."""
    d_in = x.shape[-1]
    lead = x.shape[:-1]
    flat = x.reshape(-1, d_in).astype(jnp.float32)
    n_freqs = params["w1"].shape[0] // (2 * d_in)
    freqs = 2.0 ** jnp.arange(n_freqs, dtype=jnp.float32)
    xf = flat[..., None] * freqs                                  # (N, d_in, K)
    enc = jnp.concatenate([jnp.sin(xf), jnp.cos(xf)], axis=-1)    # (N, d_in, 2K)
    enc = enc.reshape(flat.shape[0], -1)                          # flatten(-2)
    h = jnp.maximum(enc @ params["w1"] + params["b1"], 0.0)
    h = jnp.maximum(h @ params["w2"] + params["b2"], 0.0)
    o = h @ params["w3"] + params["b3"]
    return o.reshape(*lead, -1)


if __name__ == "__main__":
    d_in, d_out, hidden_dim, n_layers, n_freqs = 2, 1, 32, 3, 10

    key = jax.random.PRNGKey(0)
    k_param, k_x, k_x2 = jax.random.split(key, 3)
    params = make_params(k_param, d_in, d_out, hidden_dim, n_layers, n_freqs)

    # Batch of 2D coordinate grids: (2, 16, 16, 2) -> 512 points.
    x = jax.random.uniform(k_x, (2, 16, 16, d_in), jnp.float32, -1.0, 1.0)
    y = jax.block_until_ready(neural_field_forward(x, params))
    y_ref = neural_field_reference(x, params)
    assert y.shape == (2, 16, 16, d_out), y.shape
    assert jnp.allclose(y, y_ref, atol=3e-2, rtol=3e-2), float(jnp.abs(y - y_ref).max())

    # Ragged point count (3*7*5 = 105 points) -> exercises the padded cdiv grid.
    x2 = jax.random.uniform(k_x2, (3, 7, 5, d_in), jnp.float32, -1.0, 1.0)
    y2 = jax.block_until_ready(neural_field_forward(x2, params))
    y2_ref = neural_field_reference(x2, params)
    assert y2.shape == (3, 7, 5, d_out), y2.shape
    assert jnp.allclose(y2, y2_ref, atol=3e-2, rtol=3e-2), float(jnp.abs(y2 - y2_ref).max())

    print("KERNEL_OK")
</pallas_src>

<mosaic_0001>
module attributes {stable_mosaic.version = 11 : i64} {
  func.func @_neural_field_kernel(%arg0: i32, %arg1: memref<2x512xf32, #tpu.memory_space<vmem>>, %arg2: memref<20x1xf32, #tpu.memory_space<vmem>>, %arg3: memref<20x1xf32, #tpu.memory_space<vmem>>, %arg4: memref<2x32x20xbf16, #tpu.memory_space<vmem>>, %arg5: memref<32x1xf32, #tpu.memory_space<vmem>>, %arg6: memref<32x32xbf16, #tpu.memory_space<vmem>>, %arg7: memref<32x1xf32, #tpu.memory_space<vmem>>, %arg8: memref<1x32xbf16, #tpu.memory_space<vmem>>, %arg9: memref<1x1xf32, #tpu.memory_space<vmem>>, %arg10: memref<1x512xf32, #tpu.memory_space<vmem>>) attributes {dimension_semantics = [#tpu.dimension_semantics<parallel>], iteration_bounds = array<i64: 1>, scalar_prefetch = 0 : i64, scratch_operands = 0 : i64, tpu.core_type = #tpu.core_type<tc>, window_params = [{transform_indices = @transform_0, window_bounds = array<i64: 2, 512>}, {pipeline_mode = #tpu.pipeline_mode<synchronous>, transform_indices = @transform_1, window_bounds = array<i64: 20, 1>}, {pipeline_mode = #tpu.pipeline_mode<synchronous>, transform_indices = @transform_2, window_bounds = array<i64: 20, 1>}, {pipeline_mode = #tpu.pipeline_mode<synchronous>, transform_indices = @transform_3, window_bounds = array<i64: 2, 32, 20>}, {pipeline_mode = #tpu.pipeline_mode<synchronous>, transform_indices = @transform_4, window_bounds = array<i64: 32, 1>}, {pipeline_mode = #tpu.pipeline_mode<synchronous>, transform_indices = @transform_5, window_bounds = array<i64: 32, 32>}, {pipeline_mode = #tpu.pipeline_mode<synchronous>, transform_indices = @transform_6, window_bounds = array<i64: 32, 1>}, {pipeline_mode = #tpu.pipeline_mode<synchronous>, transform_indices = @transform_7, window_bounds = array<i64: 1, 32>}, {pipeline_mode = #tpu.pipeline_mode<synchronous>, transform_indices = @transform_8, window_bounds = array<i64: 1, 1>}, {transform_indices = @transform_9, window_bounds = array<i64: 1, 512>}]} {
    %c0 = arith.constant 0 : index
    %c0_0 = arith.constant 0 : index
    %0 = vector.load %arg1[%c0, %c0_0] : memref<2x512xf32, #tpu.memory_space<vmem>>, vector<2x512xf32>
    %c0_1 = arith.constant 0 : index
    %c0_2 = arith.constant 0 : index
    %1 = vector.load %arg2[%c0_1, %c0_2] : memref<20x1xf32, #tpu.memory_space<vmem>>, vector<20x1xf32>
    %c0_3 = arith.constant 0 : index
    %c0_4 = arith.constant 0 : index
    %2 = vector.load %arg3[%c0_3, %c0_4] : memref<20x1xf32, #tpu.memory_space<vmem>>, vector<20x1xf32>
    %3 = vector.extract_strided_slice %0 {offsets = [0, 0], sizes = [1, 512], strides = [1, 1]} : vector<2x512xf32> to vector<1x512xf32>
    %4 = vector.broadcast %1 : vector<20x1xf32> to vector<20x512xf32>
    %5 = vector.broadcast %3 : vector<1x512xf32> to vector<20x512xf32>
    %6 = arith.mulf %4, %5 : vector<20x512xf32>
    %7 = vector.broadcast %2 : vector<20x1xf32> to vector<20x512xf32>
    %8 = arith.addf %6, %7 : vector<20x512xf32>
    %9 = math.sin %8 : vector<20x512xf32>
    %10 = arith.truncf %9 : vector<20x512xf32> to vector<20x512xbf16>
    %c0_5 = arith.constant 0 : index
    %c0_6 = arith.constant 0 : index
    %c0_7 = arith.constant 0 : index
    %11 = vector.load %arg4[%c0_5, %c0_6, %c0_7] : memref<2x32x20xbf16, #tpu.memory_space<vmem>>, vector<1x32x20xbf16>
    %12 = vector.shape_cast %11 : vector<1x32x20xbf16> to vector<32x20xbf16>
    %cst = arith.constant dense<0.000000e+00> : vector<32x512xf32>
    %13 = tpu.matmul %12, %10, %cst {dimension_numbers = #tpu.dot_dimension_numbers<[1], [0], [0], [1], [0, 0, 1, 1], [], []>} : vector<32x20xbf16>, vector<20x512xbf16>, vector<32x512xf32> -> vector<32x512xf32>
    %14 = vector.extract_strided_slice %0 {offsets = [1, 0], sizes = [1, 512], strides = [1, 1]} : vector<2x512xf32> to vector<1x512xf32>
    %15 = vector.broadcast %1 : vector<20x1xf32> to vector<20x512xf32>
    %16 = vector.broadcast %14 : vector<1x512xf32> to vector<20x512xf32>
    %17 = arith.mulf %15, %16 : vector<20x512xf32>
    %18 = vector.broadcast %2 : vector<20x1xf32> to vector<20x512xf32>
    %19 = arith.addf %17, %18 : vector<20x512xf32>
    %20 = math.sin %19 : vector<20x512xf32>
    %21 = arith.truncf %20 : vector<20x512xf32> to vector<20x512xbf16>
    %c1 = arith.constant 1 : index
    %c0_8 = arith.constant 0 : index
    %c0_9 = arith.constant 0 : index
    %22 = vector.load %arg4[%c1, %c0_8, %c0_9] : memref<2x32x20xbf16, #tpu.memory_space<vmem>>, vector<1x32x20xbf16>
    %23 = vector.shape_cast %22 : vector<1x32x20xbf16> to vector<32x20xbf16>
    %cst_10 = arith.constant dense<0.000000e+00> : vector<32x512xf32>
    %24 = tpu.matmul %23, %21, %cst_10 {dimension_numbers = #tpu.dot_dimension_numbers<[1], [0], [0], [1], [0, 0, 1, 1], [], []>} : vector<32x20xbf16>, vector<20x512xbf16>, vector<32x512xf32> -> vector<32x512xf32>
    %25 = arith.addf %13, %24 : vector<32x512xf32>
    %c0_11 = arith.constant 0 : index
    %c0_12 = arith.constant 0 : index
    %26 = vector.load %arg5[%c0_11, %c0_12] : memref<32x1xf32, #tpu.memory_space<vmem>>, vector<32x1xf32>
    %27 = vector.broadcast %26 : vector<32x1xf32> to vector<32x512xf32>
    %28 = arith.addf %25, %27 : vector<32x512xf32>
    %cst_13 = arith.constant 0.000000e+00 : f32
    %29 = vector.broadcast %cst_13 : f32 to vector<32x512xf32>
    %30 = arith.maximumf %28, %29 : vector<32x512xf32>
    %31 = arith.truncf %30 : vector<32x512xf32> to vector<32x512xbf16>
    %c0_14 = arith.constant 0 : index
    %c0_15 = arith.constant 0 : index
    %32 = vector.load %arg6[%c0_14, %c0_15] : memref<32x32xbf16, #tpu.memory_space<vmem>>, vector<32x32xbf16>
    %cst_16 = arith.constant dense<0.000000e+00> : vector<32x512xf32>
    %33 = tpu.matmul %32, %31, %cst_16 {dimension_numbers = #tpu.dot_dimension_numbers<[1], [0], [0], [1], [0, 0, 1, 1], [], []>} : vector<32x32xbf16>, vector<32x512xbf16>, vector<32x512xf32> -> vector<32x512xf32>
    %c0_17 = arith.constant 0 : index
    %c0_18 = arith.constant 0 : index
    %34 = vector.load %arg7[%c0_17, %c0_18] : memref<32x1xf32, #tpu.memory_space<vmem>>, vector<32x1xf32>
    %35 = vector.broadcast %34 : vector<32x1xf32> to vector<32x512xf32>
    %36 = arith.addf %33, %35 : vector<32x512xf32>
    %cst_19 = arith.constant 0.000000e+00 : f32
    %37 = vector.broadcast %cst_19 : f32 to vector<32x512xf32>
    %38 = arith.maximumf %36, %37 : vector<32x512xf32>
    %39 = arith.truncf %38 : vector<32x512xf32> to vector<32x512xbf16>
    %c0_20 = arith.constant 0 : index
    %c0_21 = arith.constant 0 : index
    %40 = vector.load %arg8[%c0_20, %c0_21] : memref<1x32xbf16, #tpu.memory_space<vmem>>, vector<1x32xbf16>
    %cst_22 = arith.constant dense<0.000000e+00> : vector<1x512xf32>
    %41 = tpu.matmul %40, %39, %cst_22 {dimension_numbers = #tpu.dot_dimension_numbers<[1], [0], [0], [1], [0, 0, 1, 1], [], []>} : vector<1x32xbf16>, vector<32x512xbf16>, vector<1x512xf32> -> vector<1x512xf32>
    %c0_23 = arith.constant 0 : index
    %c0_24 = arith.constant 0 : index
    %42 = vector.load %arg9[%c0_23, %c0_24] : memref<1x1xf32, #tpu.memory_space<vmem>>, vector<1x1xf32>
    %43 = vector.broadcast %42 : vector<1x1xf32> to vector<1x512xf32>
    %44 = arith.addf %41, %43 : vector<1x512xf32>
    %c0_25 = arith.constant 0 : index
    %c0_26 = arith.constant 0 : index
    %45 = vector.load %arg10[%c0_25, %c0_26] : memref<1x512xf32, #tpu.memory_space<vmem>>, vector<1x512xf32>
    tpu.vector_store %arg10[%c0_25, %c0_26], %44 {strides = array<i32>} : memref<1x512xf32, #tpu.memory_space<vmem>>, vector<1x512xf32>,
    return
  }
  func.func @transform_0(%arg0: i32) -> (i32, i32) {
    %c0_i32 = arith.constant 0 : i32
    %c0_i32_0 = arith.constant 0 : i32
    return %c0_i32, %arg0 : i32, i32
  }
  func.func @transform_1(%arg0: i32) -> (i32, i32) {
    %c0_i32 = arith.constant 0 : i32
    %c0_i32_0 = arith.constant 0 : i32
    %c0_i32_1 = arith.constant 0 : i32
    return %c0_i32, %c0_i32_0 : i32, i32
  }
  func.func @transform_2(%arg0: i32) -> (i32, i32) {
    %c0_i32 = arith.constant 0 : i32
    %c0_i32_0 = arith.constant 0 : i32
    %c0_i32_1 = arith.constant 0 : i32
    return %c0_i32, %c0_i32_0 : i32, i32
  }
  func.func @transform_3(%arg0: i32) -> (i32, i32, i32) {
    %c0_i32 = arith.constant 0 : i32
    %c0_i32_0 = arith.constant 0 : i32
    %c0_i32_1 = arith.constant 0 : i32
    %c0_i32_2 = arith.constant 0 : i32
    return %c0_i32, %c0_i32_0, %c0_i32_1 : i32, i32, i32
  }
  func.func @transform_4(%arg0: i32) -> (i32, i32) {
    %c0_i32 = arith.constant 0 : i32
    %c0_i32_0 = arith.constant 0 : i32
    %c0_i32_1 = arith.constant 0 : i32
    return %c0_i32, %c0_i32_0 : i32, i32
  }
  func.func @transform_5(%arg0: i32) -> (i32, i32) {
    %c0_i32 = arith.constant 0 : i32
    %c0_i32_0 = arith.constant 0 : i32
    %c0_i32_1 = arith.constant 0 : i32
    return %c0_i32, %c0_i32_0 : i32, i32
  }
  func.func @transform_6(%arg0: i32) -> (i32, i32) {
    %c0_i32 = arith.constant 0 : i32
    %c0_i32_0 = arith.constant 0 : i32
    %c0_i32_1 = arith.constant 0 : i32
    return %c0_i32, %c0_i32_0 : i32, i32
  }
  func.func @transform_7(%arg0: i32) -> (i32, i32) {
    %c0_i32 = arith.constant 0 : i32
    %c0_i32_0 = arith.constant 0 : i32
    %c0_i32_1 = arith.constant 0 : i32
    return %c0_i32, %c0_i32_0 : i32, i32
  }
  func.func @transform_8(%arg0: i32) -> (i32, i32) {
    %c0_i32 = arith.constant 0 : i32
    %c0_i32_0 = arith.constant 0 : i32
    %c0_i32_1 = arith.constant 0 : i32
    return %c0_i32, %c0_i32_0 : i32, i32
  }
  func.func @transform_9(%arg0: i32) -> (i32, i32) {
    %c0_i32 = arith.constant 0 : i32
    %c0_i32_0 = arith.constant 0 : i32
    return %c0_i32, %arg0 : i32, i32
  }
}

</mosaic_0001>

<bundles_post_ra>
// kernel: _forward_impl.1
= control target key start
LH: loop header
LB: loop body
LE: loop exit
PB: predicated region body
PF: predicated region fallthrough
CT: control target
= control target key end

     0   :  { %v4539_v0 = vmov 0   ;;  %v4540_v59 = vmov 683565275   ;;  %v4541_v61 = vmov 2475754826   ;;  %s7448_s2 = inlined_call_operand.vmem [shape: f32[20,1], index: 2, kind: input, shape index: {}]   ;;  %s7449_s1 = inlined_call_operand.vmem [shape: f32[20,1], index: 1, kind: input, shape index: {}]   ;;  %s7450_s8 = inlined_call_operand.<no memory space> [shape: f32[1,1], index: 8, kind: input, shape index: {}]   ;;  %s7451_s4 = inlined_call_operand.vmem [shape: f32[32,1], index: 4, kind: input, shape index: {}]   ;;  %s7452_s6 = inlined_call_operand.vmem [shape: f32[32,1], index: 6, kind: input, shape index: {}]   ;;  %s7453_s0 = inlined_call_operand.vmem [shape: f32[2,512], index: 0, kind: input, shape index: {}]   ;;  %s7454_s3 = inlined_call_operand.vmem [shape: bf16[2,32,20], index: 3, kind: input, shape index: {}]   ;;  %s7455_s5 = inlined_call_operand.vmem [shape: bf16[32,32], index: 5, kind: input, shape index: {}]   ;;  %s7456_s7 = inlined_call_operand.vmem [shape: bf16[1,32], index: 7, kind: input, shape index: {}]   ;;  %s7457_s9 = inlined_call_operand.vmem [shape: f32[1,512], index: 9, kind: output, shape index: {}]  }
   0x1   :  { %4537 = vset.pattern.permute.xlu2 %v4539_v0  ;;  %4536 = vset.pattern.permute.xlu1 %v4539_v0  ;;  %v39_v1 = vld [vmem:[%s7448_s2] sm:$0xff]  ;;  %v38_v2 = vld [vmem:[%s7449_s1 + $0x10] sm:$0xf]  ;;  %v14_v4 = vstv %s7450_s8  ;;  %v40_v5 = vld [vmem:[%s7448_s2 + $0x8] sm:$0xff] }
   0x2   :  { %v36_v3 = vld [vmem:[%s7449_s1] sm:$0xff]  ;;  %4535 = vset.pattern.permute.xlu0 %v4539_v0  ;;  %84 = vperm.xlu2 %4537, %v39_v1   ;;  %15 = vst [vmem:[#allocation2] sm:$0x1] %v14_v4  ;;  %v41_v6 = vld [vmem:[%s7448_s2 + $0x10] sm:$0xf]  ;;  %v37_v7 = vld [vmem:[%s7449_s1 + $0x8] sm:$0xff] }
   0x3   :  { %54 = vperm.xlu0 %4535, %v38_v2   ;;  %44 = vperm.xlu1 %4536, %v36_v3   ;;  %v4100_v8 = vld [vmem:[%s7451_s4] sm:$0xff]  ;;  %v4102_v9 = vld [vmem:[%s7451_s4 + $0x10] sm:$0xff]  ;;  %v4103_v10 = vld [vmem:[%s7451_s4 + $0x18] sm:$0xff]  ;;  %v4542_v2 = vmov 2131351028  }
   0x4   :  { %v4171_v11 = vld [vmem:[%s7452_s6 + $0x18] sm:$0xff]  ;;  %v4101_v12 = vld [vmem:[%s7451_s4 + $0x8] sm:$0xff]  ;;  %v4170_v13 = vld [vmem:[%s7452_s6 + $0x10] sm:$0xff] }
   0x5   :  { %v4168_v15 = vld [vmem:[%s7452_s6] sm:$0xff]  ;;  %v4169_v16 = vld [vmem:[%s7452_s6 + $0x8] sm:$0xff] }
   0x6   :  { %v4647_v17 = vld [vmem:[%s7453_s0] sm:$0xff] }
   0x7   :  { %v1981_v18 = vperm.slane %v4647_v17, 1  ;;  %v1982_v19 = vperm.slane %v4647_v17, 3  ;;  %v1983_v21 = vperm.slane %v4647_v17, 5 }
   0x9   :  { %v4310_v14 = vld [vmem:[#allocation2] sm:$0x1]  ;;  %v4654_v22 = vperm.slane %v1981_v18, 1  ;;  %v4656_v23 = vperm.slane %v1982_v19, 1  ;;  %v4658_v24 = vperm.slane %v1983_v21, 1 }
   0xa   :  { %89 = vperm.xlu2 %4537, %v40_v5   ;;  %v4543_v5 = vmov 2102212464  }
   0xb   :  { %94 = vperm.xlu0 %4535, %v41_v6   ;;  %49 = vperm.xlu1 %4536, %v37_v7  }
  0x12   :  { %4106 = vperm.xlu2 %4537, %v4100_v8   ;;  %v4544_v8 = vmov 920167782  }
  0x13   :  { %4116 = vperm.xlu0 %4535, %v4102_v9   ;;  %4121 = vperm.xlu1 %4536, %v4103_v10  }
  0x1a   :  { %4189 = vperm.xlu2 %4537, %v4171_v11   ;;  %v4545_v11 = vmov 1326507024  }
  0x1b   :  { %4111 = vperm.xlu0 %4535, %v4101_v12   ;;  %4184 = vperm.xlu1 %4536, %v4170_v13  }
  0x22   :  { %4313 = vperm.xlu2 %4537, %v4310_v14  }
  0x23   :  { %4174 = vperm.xlu0 %4535, %v4168_v15   ;;  %4179 = vperm.xlu1 %4536, %v4169_v16  }
  0x75   :  { %v4651_v20 = vpop.permute.xlu0 %54 }
  0x76   :  { %v2001_v25 = vmul.f32 %v4654_v22, %v4651_v20  ;;  %v2002_v26 = vmul.f32 %v4656_v23, %v4651_v20  ;;  %v2003_v28 = vmul.f32 %v4658_v24, %v4651_v20 }
  0x7d   :  { %v4664_v27 = vpop.permute.xlu0 %94 }
  0x7e   :  { %v4669_v29 = vadd.f32 %v2001_v25, %v4664_v27  ;;  %v4672_v30 = vadd.f32 %v2002_v26, %v4664_v27  ;;  %v4675_v31 = vadd.f32 %v2003_v28, %v4664_v27 }
  0x80   :  { %v3257_v32 = vand.u32 2147483647, %v4669_v29  ;;  %v3260_v33 = vand.u32 2139095040, %v4669_v29  ;;  %v3412_v34 = vand.u32 2147483647, %v4672_v30  ;;  %v3415_v35 = vand.u32 2139095040, %v4672_v30 }
  0x81   :  { %v3570_v40 = vand.u32 2139095040, %v4675_v31 }
  0x82   :  { %v3261_v36 = vshrl.u32 %v3260_v33, 23  ;;  %v3264_v37 = vand.u32 8388607, %v3257_v32  ;;  %v3416_v38 = vshrl.u32 %v3415_v35, 23  ;;  %v3419_v39 = vand.u32 8388607, %v3412_v34 }
  0x83   :  { %v3571_v47 = vshrl.u32 %v3570_v40, 23 }
  0x84   :  { %v4454_v41 = vadd.s32 4294967169, %v3261_v36  ;;  %v3265_v42 = vor.u32 8388608, %v3264_v37  ;;  %v4457_v43 = vadd.s32 4294967169, %v3416_v38  ;;  %v3420_v44 = vor.u32 8388608, %v3419_v39 }
  0x85   :  { %v4690_v53 = vadd.s32 4294967169, %v3571_v47 }
  0x86   :  { %v3267_v45 = vadd.s32 1, %v4454_v41  ;;  %v3422_v46 = vadd.s32 1, %v4457_v43  ;;  %v4686_v48 = vshll.u32 %v3265_v42, 8  ;;  %v4688_v50 = vshll.u32 %v3420_v44, 8 }
  0x88   :  { %vm3268_vm0 = vcmp.gt.s32.totalorder %v3267_v45, 0  ;;  %vm3423_vm1 = vcmp.gt.s32.totalorder %v3422_v46, 0  ;;  %v4693_v55 = vand.u32 65535, %v4686_v48  ;;  %v4696_v56 = vshrl.u32 %v4686_v48, 16 }
  0x89   :  { %v3269_v49 = vsel %vm3268_vm0, %v3267_v45, 0  ;;  %v3424_v52 = vsel %vm3423_vm1, %v3422_v46, 0  ;;  %v4705_v63 = vand.u32 65535, %v4688_v50 }
  0x8a   :  { %v3271_v51 = vand.u32 31, %v3269_v49  ;;  %v4698_v57 = vand.u32 31, %v3424_v52  ;;  %v4700_v58 = vshrl.u32 %v3269_v49, 5 }
  0x8c   :  { %v3272_v54 = vsub.s32 32, %v3271_v51  ;;  %v3274_v60 = vshll.u32 %v4540_v59, %v3271_v51  ;;  %v3277_v62 = vshll.u32 %v4541_v61, %v3271_v51  ;;  %v3280_v4 = vshll.u32 %v4542_v2, %v3271_v51 }
  0x8d   :  { %v3283_v7 = vshll.u32 %v4543_v5, %v3271_v51  ;;  %v3286_v10 = vshll.u32 %v4544_v8, %v3271_v51  ;;  %v4716_v16 = vsub.s32 32, %v4698_v57  ;;  %vm3289_vm2 = vcmp.lt.s32.totalorder %v4700_v58, 1 }
  0x8e   :  { %v3275_v1 = vshrl.u32 %v4541_v61, %v3272_v54  ;;  %v3278_v3 = vshrl.u32 %v4542_v2, %v3272_v54  ;;  %v3281_v6 = vshrl.u32 %v4543_v5, %v3272_v54  ;;  %v3284_v9 = vshrl.u32 %v4544_v8, %v3272_v54 }
  0x8f   :  { %v3287_v12 = vshrl.u32 %v4545_v11, %v3272_v54  ;;  %vm3290_vm3 = vcmp.lt.s32.totalorder %v4700_v58, 2  ;;  %v3273_v21 = vshrl.u32 %v4540_v59, %v3272_v54  ;;  %vm3292_vm4 = vcmp.lt.s32.totalorder %v4700_v58, 4 }
  0x90   :  { %v3276_v13 = vor.u32 %v3275_v1, %v3274_v60  ;;  %v3279_v14 = vor.u32 %v3278_v3, %v3277_v62  ;;  %v3282_v15 = vor.u32 %v3281_v6, %v3280_v4  ;;  %v3285_v18 = vor.u32 %v3284_v9, %v3283_v7 }
  0x91   :  { %v3288_v19 = vor.u32 %v3287_v12, %v3286_v10  ;;  %vm3291_vm5 = vcmp.lt.s32.totalorder %v4700_v58, 3  ;;  %v3429_v35 = vshll.u32 %v4540_v59, %v4698_v57  ;;  %v3430_v39 = vshrl.u32 %v4541_v61, %v4716_v16 }
  0x92   :  { %v3297_v25 = vsel %vm3289_vm2, %v3276_v13, %v3279_v14  ;;  %v3301_v26 = vsel %vm3289_vm2, %v3279_v14, %v3282_v15  ;;  %v3298_v28 = vsel %vm3292_vm4, %v3285_v18, 920167782  ;;  %v3294_v36 = vsel %vm3292_vm4, %v3282_v15, 2102212464 }
  0x93   :  { %v3302_v33 = vsel %vm3292_vm4, %v3288_v19, 1326507024  ;;  %v3299_v37 = vsel %vm3291_vm5, %v3282_v15, %v3298_v28  ;;  %v3432_v42 = vshll.u32 %v4541_v61, %v4698_v57  ;;  %v3433_v43 = vshrl.u32 %v4542_v2, %v4716_v16 }
  0x94   :  { %v3303_v38 = vsel %vm3291_vm5, %v3285_v18, %v3302_v33  ;;  %v3300_v40 = vsel %vm3290_vm3, %v3297_v25, %v3299_v37  ;;  %v3293_v49 = vsel %vm3289_vm2, %v3273_v21, %v3276_v13  ;;  %v3295_v51 = vsel %vm3291_vm5, %v3279_v14, %v3294_v36 }
  0x95   :  { %v3304_v41 = vsel %vm3290_vm3, %v3301_v26, %v3303_v38  ;;  %v3330_v46 = vand.u32 65535, %v3300_v40  ;;  %v3331_v47 = vshrl.u32 %v3300_v40, 16  ;;  %v4747_v54 = vshrl.u32 %v3424_v52, 5 }
  0x96   :  { %v3308_v44 = vand.u32 65535, %v3304_v41  ;;  %v3309_v45 = vshrl.u32 %v3304_v41, 16  ;;  %v4749_v60 = vor.u32 %v3430_v39, %v3429_v35  ;;  %v4753_v3 = vor.u32 %v3433_v43, %v3432_v42 }
  0x97   :  { %v3436_v4 = vshrl.u32 %v4543_v5, %v4716_v16  ;;  %v3333_v7 = vmul.u32 %v3331_v47, %v4693_v55  ;;  %v3334_v9 = vmul.u32 %v3330_v46, %v4696_v56  ;;  %v3435_v52 = vshll.u32 %v4542_v2, %v4698_v57 }
  0x98   :  { %v3311_v62 = vmul.u32 %v3309_v45, %v4693_v55  ;;  %v3312_v1 = vmul.u32 %v3308_v44, %v4696_v56  ;;  %v3310_v6 = vmul.u32 %v3308_v44, %v4693_v55  ;;  %v3313_v10 = vmul.u32 %v3309_v45, %v4696_v56 }
  0x99   :  { %v3332_v13 = vmul.u32 %v3330_v46, %v4693_v55  ;;  %v3335_v14 = vmul.u32 %v3331_v47, %v4696_v56  ;;  %v3336_v21 = vshll.u32 %v3333_v7, 16  ;;  %v3338_v26 = vshll.u32 %v3334_v9, 16 }
  0x9a   :  { %v3314_v12 = vshll.u32 %v3311_v62, 16  ;;  %v3315_v15 = vshrl.u32 %v3311_v62, 16  ;;  %v3316_v18 = vshll.u32 %v3312_v1, 16  ;;  %v3317_v19 = vshrl.u32 %v3312_v1, 16 }
  0x9b   :  { %v3437_v28 = vor.u32 %v3436_v4, %v3435_v52  ;;  %vm3340_vm7 = vc.u32 %v3332_v13, %v3336_v21  ;;  %v3342_v35 = vadd.s32 %v3336_v21, %v3332_v13  ;;  %v3439_v36 = vshrl.u32 %v4544_v8, %v4716_v16 }
  0x9c   :  { %vm3318_vm6 = vc.u32 %v3310_v6, %v3314_v12  ;;  %v3320_v25 = vadd.s32 %v3314_v12, %v3310_v6  ;;  %v3341_v55 = vsel %vm3340_vm7, 1, %v4539_v0  ;;  %v3438_v56 = vshll.u32 %v4543_v5, %v4698_v57 }
  0x9d   :  { %v3319_v33 = vsel %vm3318_vm6, 1, %v4539_v0  ;;  %v3343_v39 = vadd.s32 %v3341_v55, %v3335_v14  ;;  %vm3344_vm9 = vc.u32 %v3342_v35, %v3338_v26  ;;  %v3441_v40 = vshll.u32 %v4544_v8, %v4698_v57 }
  0x9e   :  { %v3321_v37 = vadd.s32 %v3319_v33, %v3313_v10  ;;  %vm3322_vm8 = vc.u32 %v3320_v25, %v3316_v18  ;;  %v3345_v42 = vsel %vm3344_vm9, 1, %v4539_v0  ;;  %v3440_v43 = vor.u32 %v3439_v36, %v3438_v56 }
  0x9f   :  { %v3323_v38 = vsel %vm3322_vm8, 1, %v4539_v0  ;;  %v3442_v44 = vshrl.u32 %v4545_v11, %v4716_v16  ;;  %v3337_v45 = vshrl.u32 %v3333_v7, 16  ;;  %v3339_v46 = vshrl.u32 %v3334_v9, 16 }
  0xa0   :  { %v3325_v41 = vadd.s32 %v3323_v38, %v3321_v37  ;;  %v4777_v47 = vadd.s32 %v3342_v35, %v3338_v26  ;;  %v3347_v62 = vadd.s32 %v3345_v42, %v3343_v39  ;;  %vm3444_vm10 = vcmp.lt.s32.totalorder %v4747_v54, 1 }
  0xa1   :  { %v3443_v4 = vor.u32 %v3442_v44, %v3441_v40  ;;  %vm3447_vm11 = vcmp.lt.s32.totalorder %v4747_v54, 4  ;;  %vm3446_vm12 = vcmp.lt.s32.totalorder %v4747_v54, 3  ;;  %v3452_v57 = vsel %vm3444_vm10, %v4749_v60, %v4753_v3 }
  0xa2   :  { %v3326_v1 = vadd.s32 %v3325_v41, %v3315_v15  ;;  %v3348_v6 = vadd.s32 %v3347_v62, %v3337_v45  ;;  %v3453_v7 = vsel %vm3447_vm11, %v3440_v43, 920167782  ;;  %vm3445_vm13 = vcmp.lt.s32.totalorder %v4747_v54, 2 }
  0xa3   :  { %v3454_v52 = vsel %vm3446_vm12, %v3437_v28, %v3453_v7  ;;  %v3456_v10 = vsel %vm3444_vm10, %v4753_v3, %v3437_v28  ;;  %v3296_v12 = vsel %vm3290_vm3, %v3293_v49, %v3295_v51  ;;  %v3457_v15 = vsel %vm3447_vm11, %v3443_v4, 1326507024 }
  0xa4   :  { %v4788_v9 = vadd.s32 %v3326_v1, %v3317_v19  ;;  %v3349_v13 = vadd.s32 %v3348_v6, %v3339_v46  ;;  %v3455_v14 = vsel %vm3445_vm13, %v3452_v57, %v3454_v52  ;;  %v3458_v18 = vsel %vm3446_vm12, %v3440_v43, %v3457_v15 }
  0xa5   :  { %v3462_v19 = vshrl.u32 %v4688_v50, 16  ;;  %v3485_v21 = vand.u32 65535, %v3455_v14  ;;  %v3459_v58 = vsel %vm3445_vm13, %v3456_v10, %v3458_v18  ;;  %v3486_v49 = vshrl.u32 %v3455_v14, 16 }
  0xa6   :  { %vm3352_vm14 = vc.u32 %v4788_v9, %v4777_v47  ;;  %v3353_v25 = vadd.s32 1, %v3349_v13  ;;  %v3577_v51 = vadd.s32 1, %v4690_v53  ;;  %v3350_v26 = vmul.u32 %v4686_v48, %v3296_v12 }
  0xa7   :  { %v3463_v33 = vand.u32 65535, %v3459_v58  ;;  %v3464_v35 = vshrl.u32 %v3459_v58, 16  ;;  %v3567_v36 = vand.u32 2147483647, %v4675_v31  ;;  %v3428_v55 = vshrl.u32 %v4540_v59, %v4716_v16 }
  0xa8   :  { %v3354_v37 = vsel %vm3352_vm14, %v3353_v25, %v3349_v13  ;;  %v3488_v56 = vmul.u32 %v3486_v49, %v4705_v63  ;;  %v3489_v38 = vmul.u32 %v3485_v21, %v3462_v19  ;;  %v3449_v40 = vsel %vm3447_vm11, %v3437_v28, 2102212464 }
  0xa9   :  { %v3355_v39 = vadd.s32 %v3354_v37, %v3350_v26  ;;  %v3466_v41 = vmul.u32 %v3464_v35, %v4705_v63  ;;  %v3467_v53 = vmul.u32 %v3463_v33, %v3462_v19  ;;  %v3487_v48 = vmul.u32 %v3485_v21, %v4705_v63 }
  0xaa   :  { %v3490_v42 = vmul.u32 %v3486_v49, %v3462_v19  ;;  %v3491_v43 = vshll.u32 %v3488_v56, 16  ;;  %vm3578_vm15 = vcmp.gt.s32.totalorder %v3577_v51, 0  ;;  %v3465_v45 = vmul.u32 %v3463_v33, %v4705_v63 }
  0xab   :  { %v3356_v44 = vadd.s32 536870912, %v3355_v39  ;;  %v3468_v46 = vmul.u32 %v3464_v35, %v3462_v19  ;;  %v3469_v16 = vshll.u32 %v3466_v41, 16  ;;  %v3471_v62 = vshll.u32 %v3467_v53, 16 }
  0xac   :  { %v3493_v1 = vshll.u32 %v3489_v38, 16  ;;  %vm3495_vm0 = vc.u32 %v3487_v48, %v3491_v43  ;;  %v3497_v4 = vadd.s32 %v3491_v43, %v3487_v48  ;;  %v3448_v7 = vsel %vm3444_vm10, %v3428_v55, %v4749_v60 }
  0xad   :  { %v3357_v6 = vshrl.u32 %v3356_v44, 30  ;;  %vm3473_vm1 = vc.u32 %v3465_v45, %v3469_v16  ;;  %v3475_v28 = vadd.s32 %v3469_v16, %v3465_v45  ;;  %v3496_v57 = vsel %vm3495_vm0, 1, %v4539_v0 }
  0xae   :  { %v3474_v52 = vsel %vm3473_vm1, 1, %v4539_v0  ;;  %v3498_v10 = vadd.s32 %v3496_v57, %v3490_v42  ;;  %vm3499_vm2 = vc.u32 %v3497_v4, %v3493_v1  ;;  %v3450_v12 = vsel %vm3446_vm12, %v4753_v3, %v3449_v40 }
  0xaf   :  { %v3358_v63 = vshll.u32 %v3357_v6, 30  ;;  %v3476_v13 = vadd.s32 %v3474_v52, %v3468_v46  ;;  %vm3477_vm3 = vc.u32 %v3475_v28, %v3471_v62  ;;  %v3470_v14 = vshrl.u32 %v3466_v41, 16 }
  0xb0   :  { %v3478_v15 = vsel %vm3477_vm3, 1, %v4539_v0  ;;  %v3500_v18 = vsel %vm3499_vm2, 1, %v4539_v0  ;;  %v3579_v19 = vsel %vm3578_vm15, %v3577_v51, 0  ;;  %v3381_v60 = vsub.s32 4, %v3357_v6 }
  0xb1   :  { %v3359_v21 = vsub.s32 %v3355_v39, %v3358_v63  ;;  %v3480_v25 = vadd.s32 %v3478_v15, %v3476_v13  ;;  %v3502_v58 = vadd.s32 %v3500_v18, %v3498_v10  ;;  %v3492_v49 = vshrl.u32 %v3488_v56, 16 }
  0xb2   :  { %v3574_v26 = vand.u32 8388607, %v3567_v36  ;;  %v3581_v33 = vand.u32 31, %v3579_v19  ;;  %v3472_v35 = vshrl.u32 %v3467_v53, 16  ;;  %vm3259_vm5 = vcmp.lt.s32.totalorder %v4669_v29, 0 }
  0xb3   :  { %vm3360_vm4 = vcmp.lt.s32.totalorder %v3359_v21, 0  ;;  %v3361_v3 = vsub.s32 0, %v3359_v21  ;;  %v3481_v37 = vadd.s32 %v3480_v25, %v3470_v14  ;;  %v3451_v55 = vsel %vm3445_vm13, %v3448_v7, %v3450_v12 }
  0xb4   :  { %v3494_v40 = vshrl.u32 %v3489_v38, 16  ;;  %v3503_v51 = vadd.s32 %v3502_v58, %v3492_v49  ;;  %v3382_v41 = vsel %vm3259_vm5, %v3381_v60, %v3357_v6  ;;  %v4840_v48 = vsub.s32 32, %v3581_v33 }
  0xb5   :  { %v3362_v39 = vsel %vm3360_vm4, %v3361_v3, %v3359_v21  ;;  %v4838_v56 = vadd.s32 %v3481_v37, %v3472_v35  ;;  %v4842_v43 = vadd.s32 %v3497_v4, %v3493_v1  ;;  %vm4846_vm6 = vcmp.le.f32.partialorder %v3257_v32, 0.7853982 }
  0xb6   :  { %v3363_v42 = vclz %v3362_v39  ;;  %v3504_v53 = vadd.s32 %v3503_v51, %v3494_v40  ;;  %v3351_v54 = vadd.s32 %v4777_v47, %v4788_v9  ;;  %v3505_v38 = vmul.u32 %v4688_v50, %v3451_v55 }
  0xb7   :  { %v3575_v45 = vor.u32 8388608, %v3574_v26  ;;  %v3384_v16 = vsel %vm4846_vm6, 0, %v3382_v41  ;;  %vm3507_vm7 = vc.u32 %v4838_v56, %v4842_v43  ;;  %v4857_v1 = vshrl.u32 %v3579_v19, 5 }
  0xb8   :  { %v4455_v46 = vadd.s32 4294967294, %v3363_v42  ;;  %v3508_v62 = vadd.s32 1, %v3504_v53  ;;  %v3587_v32 = vshll.u32 %v4541_v61, %v3581_v33  ;;  %v3588_v4 = vshrl.u32 %v4542_v2, %v4840_v48 }
  0xb9   :  { %v3594_v47 = vshrl.u32 %v4544_v8, %v4840_v48  ;;  %v3591_v9 = vshrl.u32 %v4543_v5, %v4840_v48  ;;  %v3593_v6 = vshll.u32 %v4543_v5, %v3581_v33  ;;  %v3585_v7 = vshrl.u32 %v4541_v61, %v4840_v48 }
  0xba   :  { %vm4456_vm8 = vcmp.lt.s32.totalorder %v4455_v46, 0  ;;  %v3509_v50 = vsel %vm3507_vm7, %v3508_v62, %v3504_v53  ;;  %v3597_v52 = vshrl.u32 %v4545_v11, %v4840_v48  ;;  %v3590_v12 = vshll.u32 %v4542_v2, %v3581_v33 }
  0xbb   :  { %v3366_v28 = vsel %vm4456_vm8, 0, %v4455_v46  ;;  %v3510_v57 = vadd.s32 %v3509_v50, %v3505_v38  ;;  %v3595_v13 = vor.u32 %v3594_v47, %v3593_v6  ;;  %v3584_v15 = vshll.u32 %v4540_v59, %v3581_v33 }
  0xbc   :  { %v3367_v10 = vsub.s32 32, %v3366_v28  ;;  %v3371_v63 = vsub.s32 4294967266, %v3366_v28  ;;  %v3589_v18 = vor.u32 %v3588_v4, %v3587_v32  ;;  %v3596_v19 = vshll.u32 %v4544_v8, %v3581_v33 }
  0xbd   :  { %v3511_v14 = vadd.s32 536870912, %v3510_v57  ;;  %v3368_v60 = vshll.u32 %v3359_v21, %v3366_v28  ;;  %v3592_v49 = vor.u32 %v3591_v9, %v3590_v12  ;;  %v3586_v3 = vor.u32 %v3585_v7, %v3584_v15 }
  0xbe   :  { %v3369_v25 = vshrl.u32 %v3351_v54, %v3367_v10  ;;  %v3372_v58 = vadd.s32 127, %v3371_v63  ;;  %v3598_v35 = vor.u32 %v3597_v52, %v3596_v19  ;;  %vm3602_vm9 = vcmp.lt.s32.totalorder %v4857_v1, 4 }
  0xbf   :  { %v4874_v26 = vshrl.u32 %v3511_v14, 30  ;;  %v3608_v40 = vsel %vm3602_vm9, %v3595_v13, 920167782  ;;  %vm3599_vm10 = vcmp.lt.s32.totalorder %v4857_v1, 1  ;;  %v4881_v33 = vshll.u32 %v3575_v45, 8 }
  0xc0   :  { %v3370_v37 = vor.u32 %v3369_v25, %v3368_v60  ;;  %v3373_v55 = vshll.u32 %v3372_v58, 23  ;;  %v3401_v39 = vadd.s32 3, %v3384_v16  ;;  %vm3601_vm11 = vcmp.lt.s32.totalorder %v4857_v1, 3 }
  0xc1   :  { %v3513_v51 = vshll.u32 %v4874_v26, 30  ;;  %v3611_v41 = vsel %vm3599_vm10, %v3589_v18, %v3592_v49  ;;  %v3607_v53 = vsel %vm3599_vm10, %v3586_v3, %v3589_v18  ;;  %v3609_v54 = vsel %vm3601_vm11, %v3592_v49, %v3608_v40 }
  0xc2   :  { %v3374_v21 = vor.u32 4788187, %v3373_v55  ;;  %v3612_v38 = vsel %vm3602_vm9, %v3598_v35, 1326507024  ;;  %v3377_v46 = vcvt.s32.f32 %v3370_v37  ;;  %vm3600_vm12 = vcmp.lt.s32.totalorder %v4857_v1, 2 }
  0xc3   :  { %v4886_v42 = vsub.s32 %v3510_v57, %v3513_v51  ;;  %v3613_v16 = vsel %vm3601_vm11, %v3595_v13, %v3612_v38  ;;  %v3616_v4 = vand.u32 65535, %v4881_v33  ;;  %v3610_v50 = vsel %vm3600_vm12, %v3607_v53, %v3609_v54 }
  0xc4   :  { %v3375_v45 = vand.u32 2147483647, %v3374_v21  ;;  %v3614_v32 = vsel %vm3600_vm12, %v3611_v41, %v3613_v16  ;;  %v4904_v28 = vand.u32 3, %v3401_v39  ;;  %v3583_v7 = vshrl.u32 %v4540_v59, %v4840_v48 }
  0xc5   :  { %vm3515_vm13 = vcmp.lt.s32.totalorder %v4886_v42, 0  ;;  %v3516_v62 = vsub.s32 0, %v4886_v42  ;;  %v3618_v9 = vand.u32 65535, %v3614_v32  ;;  %v3619_v6 = vshrl.u32 %v3614_v32, 16 }
  0xc6   :  { %v3378_v47 = vmul.f32 %v3377_v46, %v3375_v45  ;;  %v3617_v52 = vshrl.u32 %v4881_v33, 16  ;;  %v3604_v12 = vsel %vm3602_vm9, %v3592_v49, 2102212464  ;;  %v3506_v14 = vadd.s32 %v4842_v43, %v4838_v56 }
  0xc7   :  { %v3517_v57 = vsel %vm3515_vm13, %v3516_v62, %v4886_v42  ;;  %v3621_v13 = vmul.u32 %v3619_v6, %v3616_v4  ;;  %v4916_v15 = vsel %vm3599_vm10, %v3583_v7, %v3586_v3  ;;  %v3641_v60 = vshrl.u32 %v3610_v50, 16 }
  0xc8   :  { %v3379_v10 = vxor.u32 2147483648, %v3378_v47  ;;  %v3518_v63 = vclz %v3517_v57  ;;  %v4918_v19 = vmul.u32 %v3618_v9, %v3617_v52  ;;  %vm3414_vm14 = vcmp.lt.s32.totalorder %v4672_v30, 0 }
  0xc9   :  { %v3620_v58 = vmul.u32 %v3618_v9, %v3616_v4  ;;  %v3624_v35 = vshll.u32 %v3621_v13, 16  ;;  %v4930_v56 = vsel %vm3601_vm11, %v3589_v18, %v3604_v12  ;;  %v3623_v43 = vmul.u32 %v3619_v6, %v3617_v52 }
  0xca   :  { %v3380_v48 = vsel %vm3259_vm5, %v3379_v10, %v3378_v47  ;;  %v4458_v25 = vadd.s32 4294967294, %v3518_v63  ;;  %v3640_v3 = vand.u32 65535, %v3610_v50  ;;  %v3626_v51 = vshll.u32 %v4918_v19, 16 }
  0xcb   :  { %v4926_v49 = vsel %vm4846_vm6, %v4669_v29, %v3380_v48  ;;  %vm3628_vm0 = vc.u32 %v3620_v58, %v3624_v35  ;;  %v3630_v55 = vadd.s32 %v3624_v35, %v3620_v58  ;;  %v4936_v44 = vmul.u32 %v3641_v60, %v3616_v4 }
  0xcc   :  { %v3385_v37 = vmul.f32 %v4926_v49, %v4926_v49  ;;  %vm4459_vm15 = vcmp.lt.s32.totalorder %v4458_v25, 0  ;;  %v3629_v21 = vsel %vm3628_vm0, 1, %v4539_v0  ;;  %v3536_v18 = vsub.s32 4, %v4874_v26 }
  0xcd   :  { %v3521_v40 = vsel %vm4459_vm15, 0, %v4458_v25  ;;  %v3631_v45 = vadd.s32 %v3629_v21, %v3623_v43  ;;  %vm3632_vm1 = vc.u32 %v3630_v55, %v3626_v51  ;;  %vm4943_vm2 = vcmp.le.f32.partialorder %v3412_v34, 0.7853982 }
  0xce   :  { %v3386_v39 = vmul.f32 -0.001358992, %v3385_v37  ;;  %v3393_v41 = vmul.f32 -0.00019511016, %v3385_v37  ;;  %v3522_v53 = vsub.s32 32, %v3521_v40  ;;  %v3523_v54 = vshll.u32 %v4886_v42, %v3521_v40 }
  0xcf   :  { %v3526_v38 = vsub.s32 4294967266, %v3521_v40  ;;  %v3633_v32 = vsel %vm3632_vm1, 1, %v4539_v0  ;;  %v3644_v6 = vmul.u32 %v3640_v3, %v3617_v52  ;;  %v3646_v57 = vshll.u32 %v4936_v44, 16 }
  0xd0   :  { %v3387_v46 = vadd.f32 0.041655596, %v3386_v39  ;;  %v3394_v16 = vadd.f32 0.008332121, %v3393_v41  ;;  %v3524_v62 = vshrl.u32 %v3506_v14, %v3522_v53  ;;  %v3635_v9 = vadd.s32 %v3633_v32, %v3631_v45 }
  0xd1   :  { %v3527_v50 = vadd.s32 127, %v3526_v38  ;;  %v3625_v10 = vshrl.u32 %v3621_v13, 16  ;;  %v3642_v63 = vmul.u32 %v3640_v3, %v3616_v4  ;;  %v3537_v14 = vsel %vm3414_vm14, %v3536_v18, %v4874_v26  ;;  %v4959_v18 = vpop.permute.xlu1 %44 }
  0xd2   :  { %v3388_v42 = vmul.f32 %v3387_v46, %v3385_v37  ;;  %v3395_v7 = vmul.f32 %v3394_v16, %v3385_v37  ;;  %v3525_v12 = vor.u32 %v3524_v62, %v3523_v54  ;;  %v3645_v25 = vmul.u32 %v3641_v60, %v3617_v52 }
  0xd3   :  { %v3528_v48 = vshll.u32 %v3527_v50, 23  ;;  %v3636_v35 = vadd.s32 %v3635_v9, %v3625_v10  ;;  %vm3650_vm3 = vc.u32 %v3642_v63, %v3646_v57  ;;  %vm3404_vm4 = vcmp.eq.s32.totalorder %v4904_v28, 0 }
  0xd4   :  { %v3389_v34 = vadd.f32 -0.4999988, %v3388_v42  ;;  %v3396_v58 = vadd.f32 -0.16666654, %v3395_v7  ;;  %vm3407_vm5 = vcmp.eq.s32.totalorder %v4904_v28, 2  ;;  %v3648_v55 = vshll.u32 %v3644_v6, 16 }
  0xd5   :  { %v3529_v43 = vor.u32 4788187, %v3528_v48  ;;  %v3651_v13 = vsel %vm3650_vm3, 1, %v4539_v0  ;;  %v3652_v4 = vadd.s32 %v3646_v57, %v3642_v63  ;;  %vm3403_vm6 = vcmp.lt.s32.totalorder %v4904_v28, 2 }
  0xd6   :  { %v3390_v3 = vmul.f32 %v3389_v34, %v3385_v37  ;;  %v3397_v40 = vmul.f32 %v3396_v58, %v3385_v37  ;;  %v3627_v26 = vshrl.u32 %v4918_v19, 16  ;;  %v3653_v52 = vadd.s32 %v3651_v13, %v3645_v25 }
  0xd7   :  { %vm3400_vm7 = vweird.f32 %v4669_v29  ;;  %v3530_v60 = vand.u32 2147483647, %v3529_v43  ;;  %v3532_v51 = vcvt.s32.f32 %v3525_v12  ;;  %vm3654_vm8 = vc.u32 %v3652_v4, %v3648_v55  ;;  %v4993_v12 = vpop.permute.xlu2 %84 }
  0xd8   :  { %v1984_v21 = vperm.slane %v4647_v17, 7  ;;  %v3391_v39 = vadd.f32 1.0, %v3390_v3  ;;  %v3398_v41 = vadd.f32 1.0, %v3397_v40  ;;  %vm3907_vm9 = vcmask 1041408  }
  0xd9   :  { %v3655_v53 = vsel %vm3654_vm8, 1, %v4539_v0  ;;  %v3533_v37 = vmul.f32 %v3532_v51, %v3530_v60  ;;  %v4961_v54 = vadd.s32 %v3636_v35, %v3627_v26  ;;  %v3647_v19 = vshrl.u32 %v4936_v44, 16 }
  0xda   :  { %v3657_v38 = vadd.s32 %v3655_v53, %v3653_v52  ;;  %v3399_v45 = vmul.f32 %v3398_v41, %v4926_v49  ;;  %v3408_v46 = vxor.u32 2147483648, %v3391_v39  ;;  %v3539_v16 = vsel %vm4943_vm2, 0, %v3537_v14 }
  0xdb   :  { %v4967_v17 = vperm.slane %v1984_v21, 1  ;;  %v3534_v62 = vxor.u32 2147483648, %v3533_v37  ;;  %v3649_v32 = vshrl.u32 %v3644_v6, 16  ;;  %v4969_v50 = vadd.s32 %v3652_v4, %v3648_v55 }
  0xdc   :  { %v3658_v9 = vadd.s32 %v3657_v38, %v3647_v19  ;;  %v3405_v57 = vxor.u32 2147483648, %v3399_v45  ;;  %v3606_v44 = vsel %vm3600_vm12, %v4916_v15, %v4930_v56  ;;  %v1993_v42 = vmul.f32 %v4654_v22, %v4959_v18 }
  0xdd   :  { %v2004_v49 = vmul.f32 %v4967_v17, %v4651_v20  ;;  %v3535_v7 = vsel %vm3414_vm14, %v3534_v62, %v3533_v37  ;;  %v3556_v10 = vadd.s32 3, %v3539_v16  ;;  %vm3662_vm10 = vc.u32 %v4961_v54, %v4969_v50 }
  0xde   :  { %v3659_v6 = vadd.s32 %v3658_v9, %v3649_v32  ;;  %v3406_v63 = vsel %vm3404_vm4, %v3391_v39, %v3405_v57  ;;  %v3409_v1 = vsel %vm3407_vm5, %v3408_v46, %v3399_v45  ;;  %v3538_v15 = vsel %vm4943_vm2, %v4672_v30, %v3535_v7 }
  0xdf   :  { %v4991_v56 = vadd.f32 %v2004_v49, %v4664_v27  ;;  %v3410_v48 = vsel %vm3403_vm6, %v3406_v63, %v3409_v1  ;;  %v3540_v14 = vmul.f32 %v3538_v15, %v3538_v15  ;;  %v3660_v25 = vmul.u32 %v4881_v33, %v3606_v44 }
  0xe0   :  { %v3663_v34 = vadd.s32 1, %v3659_v6  ;;  %v3411_v58 = vsel %vm3400_vm7, nan, %v3410_v48  ;;  %v5003_v43 = vadd.f32 %v1993_v42, %v4993_v12  ;;  %v3557_v53 = vand.u32 3, %v3556_v10 }
  0xe1   :  { %v3722_v35 = vand.u32 2147483647, %v4991_v56  ;;  %v3725_v47 = vand.u32 2139095040, %v4991_v56  ;;  %v3881_v55 = vpack.c.bf16 %v3411_v58, %v3411_v58  ;;  %v3541_v13 = vmul.f32 -0.001358992, %v3540_v14 }
  0xe2   :  { %v3548_v4 = vmul.f32 -0.00019511016, %v3540_v14  ;;  %v3664_v28 = vsel %vm3662_vm10, %v3663_v34, %v3659_v6  ;;  %v2020_v21 = vand.u32 2139095040, %v5003_v43  ;;  %vm3569_vm11 = vcmp.lt.s32.totalorder %v4675_v31, 0 }
  0xe3   :  { %v3665_v3 = vadd.s32 %v3664_v28, %v3660_v25  ;;  %v3726_v33 = vshrl.u32 %v3725_v47, 23  ;;  %v3729_v29 = vand.u32 8388607, %v3722_v35  ;;  %v3909_v40 = vsel %vm3907_vm9, %v3881_v55, 0 }
  0xe4   :  { %v3542_v26 = vadd.f32 0.041655596, %v3541_v13  ;;  %v3549_v52 = vadd.f32 0.008332121, %v3548_v4  ;;  %3926 = vmatpush.bf16.msra.mxu0 %v3909_v40  ;;  %vm5015_vm12 = vcmp.le.f32.partialorder %v3567_v36, 0.7853982  ;;  %vm3555_vm15 = vweird.f32 %v4672_v30 }
  0xe5   :  { %v3666_v60 = vadd.s32 536870912, %v3665_v3  ;;  %v4463_v51 = vadd.s32 4294967169, %v3726_v33  ;;  %v3730_v19 = vor.u32 8388608, %v3729_v29  ;;  %v2017_v32 = vand.u32 2147483647, %v5003_v43 }
  0xe6   :  { %v3543_v39 = vmul.f32 %v3542_v26, %v3540_v14  ;;  %v3550_v41 = vmul.f32 %v3549_v52, %v3540_v14  ;;  %v2021_v9 = vshrl.u32 %v2020_v21, 23  ;;  %vm3558_vm14 = vcmp.lt.s32.totalorder %v3557_v53, 2 }
  0xe7   :  { %v3667_v37 = vshrl.u32 %v3666_v60, 30  ;;  %v3732_v38 = vadd.s32 1, %v4463_v51  ;;  %vm3559_vm0 = vcmp.eq.s32.totalorder %v3557_v53, 0  ;;  %v5021_v6 = vshll.u32 %v3730_v19, 8 }
  0xe8   :  { %v3544_v45 = vadd.f32 -0.4999988, %v3543_v39  ;;  %v3551_v46 = vadd.f32 -0.16666654, %v3550_v41  ;;  %vm3562_vm1 = vcmp.eq.s32.totalorder %v3557_v53, 2  ;;  %v3661_v1 = vadd.s32 %v4969_v50, %v4961_v54 }
  0xe9   :  { %v3668_v62 = vshll.u32 %v3667_v37, 30  ;;  %vm3733_vm13 = vcmp.gt.s32.totalorder %v3732_v38, 0  ;;  %v3691_v49 = vsub.s32 4, %v3667_v37  ;;  %v4430_v55 = vadd.s32 4294967169, %v2021_v9 }
  0xea   :  { %v3545_v57 = vmul.f32 %v3544_v45, %v3540_v14  ;;  %v3552_v44 = vmul.f32 %v3551_v46, %v3540_v14  ;;  %v3734_v42 = vsel %vm3733_vm13, %v3732_v38, 0  ;;  %v5027_v14 = vand.u32 8388607, %v2017_v32 }
  0xeb   :  { %v3669_v7 = vsub.s32 %v3665_v3, %v3668_v62  ;;  %v3736_v10 = vand.u32 31, %v3734_v42  ;;  %v3692_v47 = vsel %vm3569_vm11, %v3691_v49, %v3667_v37  ;;  %v5034_v54 = vand.u32 65535, %v5021_v6 }
  0xec   :  { %v3546_v36 = vadd.f32 1.0, %v3545_v57  ;;  %v3553_v63 = vadd.f32 1.0, %v3552_v44  ;;  %v3694_v40 = vsel %vm5015_vm12, 0, %v3692_v47  ;;  %v3735_v26 = vshrl.u32 %v3734_v42, 5 }
  0xed   :  { %vm3670_vm2 = vcmp.lt.s32.totalorder %v3669_v7, 0  ;;  %v3671_v48 = vsub.s32 0, %v3669_v7  ;;  %v3737_v25 = vsub.s32 32, %v3736_v10  ;;  %v3739_v4 = vshll.u32 %v4540_v59, %v3736_v10 }
  0xee   :  { %v3554_v34 = vmul.f32 %v3553_v63, %v3538_v15  ;;  %v3563_v58 = vxor.u32 2147483648, %v3546_v36  ;;  %v3742_v33 = vshll.u32 %v4541_v61, %v3736_v10  ;;  %v3745_v39 = vshll.u32 %v4542_v2, %v3736_v10 }
  0xef   :  { %v3672_v13 = vsel %vm3670_vm2, %v3671_v48, %v3669_v7  ;;  %v3740_v28 = vshrl.u32 %v4541_v61, %v3737_v25  ;;  %v3743_v29 = vshrl.u32 %v4542_v2, %v3737_v25  ;;  %v3746_v37 = vshrl.u32 %v4543_v5, %v3737_v25 }
  0xf0   :  { %v3560_v50 = vxor.u32 2147483648, %v3554_v34  ;;  %v3673_v3 = vclz %v3672_v13  ;;  %v3564_v15 = vsel %vm3562_vm1, %v3563_v58, %v3554_v34  ;;  %v3748_v19 = vshll.u32 %v4543_v5, %v3736_v10 }
  0xf1   :  { %v3741_v52 = vor.u32 %v3740_v28, %v3739_v4  ;;  %v3744_v21 = vor.u32 %v3743_v29, %v3742_v33  ;;  %v3749_v38 = vshrl.u32 %v4544_v8, %v3737_v25  ;;  %v3751_v46 = vshll.u32 %v4544_v8, %v3736_v10 }
  0xf2   :  { %v3561_v60 = vsel %vm3559_vm0, %v3546_v36, %v3560_v50  ;;  %v4461_v51 = vadd.s32 4294967294, %v3673_v3  ;;  %v3752_v62 = vshrl.u32 %v4545_v11, %v3737_v25  ;;  %v3747_v44 = vor.u32 %v3746_v37, %v3745_v39 }
  0xf3   :  { %v3565_v41 = vsel %vm3558_vm14, %v3561_v60, %v3564_v15  ;;  %v3750_v49 = vor.u32 %v3749_v38, %v3748_v19  ;;  %v3738_v36 = vshrl.u32 %v4540_v59, %v3737_v25  ;;  %v2027_v63 = vadd.s32 1, %v4430_v55 }
  0xf4   :  { %v3566_v45 = vsel %vm3555_vm15, nan, %v3565_v41  ;;  %vm4462_vm3 = vcmp.lt.s32.totalorder %v4461_v51, 0  ;;  %v3753_v58 = vor.u32 %v3752_v62, %v3751_v46  ;;  %vm3754_vm4 = vcmp.lt.s32.totalorder %v3735_v26, 1 }
  0xf5   :  { %v3882_v9 = vpack.c.bf16 %v3566_v45, %v3566_v45  ;;  %v3676_v57 = vsel %vm4462_vm3, 0, %v4461_v51  ;;  %vm3755_vm5 = vcmp.lt.s32.totalorder %v3735_v26, 2  ;;  %vm3757_vm6 = vcmp.lt.s32.totalorder %v3735_v26, 4 }
  0xf6   :  { %v3677_v53 = vsub.s32 32, %v3676_v57  ;;  %v3681_v42 = vsub.s32 4294967266, %v3676_v57  ;;  %v3678_v34 = vshll.u32 %v3669_v7, %v3676_v57  ;;  %vm3756_vm7 = vcmp.lt.s32.totalorder %v3735_v26, 3 }
  0xf7   :  { %v3912_v48 = vsel %vm3907_vm9, %v3882_v9, 0  ;;  %v3759_v10 = vsel %vm3757_vm6, %v3747_v44, 2102212464  ;;  %v3762_v13 = vsel %vm3754_vm4, %v3741_v52, %v3744_v21  ;;  %v3763_v4 = vsel %vm3757_vm6, %v3750_v49, 920167782 }
  0xf8   :  { %3945 = vmatpush.bf16.msra.mxu1 %v3912_v48  ;;  %v3679_v30 = vshrl.u32 %v3661_v1, %v3677_v53  ;;  %v3682_v47 = vadd.s32 127, %v3681_v42  ;;  %v3764_v3 = vsel %vm3756_vm7, %v3747_v44, %v3763_v4  ;;  %v3766_v33 = vsel %vm3754_vm4, %v3744_v21, %v3747_v44 }
  0xf9   :  { %v3711_v25 = vadd.s32 3, %v3694_v40  ;;  %v3758_v55 = vsel %vm3754_vm4, %v3738_v36, %v3741_v52  ;;  %v3765_v29 = vsel %vm3755_vm5, %v3762_v13, %v3764_v3  ;;  %v3767_v7 = vsel %vm3757_vm6, %v3753_v58, 1326507024 }
  0xfa   :  { %v3680_v28 = vor.u32 %v3679_v30, %v3678_v34  ;;  %v3683_v50 = vshll.u32 %v3682_v47, 23  ;;  %v3760_v60 = vsel %vm3756_vm7, %v3744_v21, %v3759_v10  ;;  %v3768_v51 = vsel %vm3756_vm7, %v3750_v49, %v3767_v7 }
  0xfb   :  { %v3795_v1 = vand.u32 65535, %v3765_v29  ;;  %v3769_v39 = vsel %vm3755_vm5, %v3766_v33, %v3768_v51  ;;  %v3772_v41 = vshrl.u32 %v5021_v6, 16  ;;  %v3796_v37 = vshrl.u32 %v3765_v29, 16 }
  0xfc   :  { %v3684_v15 = vor.u32 4788187, %v3683_v50  ;;  %vm2028_vm8 = vcmp.gt.s32.totalorder %v2027_v63, 0  ;;  %v3687_v38 = vcvt.s32.f32 %v3680_v28  ;;  %v3773_v45 = vand.u32 65535, %v3769_v39 }
  0xfd   :  { %v3774_v46 = vshrl.u32 %v3769_v39, 16  ;;  %v5056_v62 = vand.u32 3, %v3711_v25  ;;  %v5059_v40 = vsel %vm3755_vm5, %v3758_v55, %v3760_v60  ;;  %v3798_v52 = vmul.u32 %v3796_v37, %v5034_v54 }
  0xfe   :  { %v3685_v19 = vand.u32 2147483647, %v3684_v15  ;;  %v3799_v21 = vmul.u32 %v3795_v1, %v3772_v41  ;;  %v3777_v44 = vmul.u32 %v3773_v45, %v3772_v41  ;;  %v2029_v49 = vsel %vm2028_vm8, %v2027_v63, 0 }
  0xff   :  { %v3776_v57 = vmul.u32 %v3774_v46, %v5034_v54  ;;  %v3797_v53 = vmul.u32 %v3795_v1, %v5034_v54  ;;  %v3800_v42 = vmul.u32 %v3796_v37, %v3772_v41  ;;  %v3801_v36 = vshll.u32 %v3798_v52, 16 }
 0x100   :  { %v3688_v9 = vmul.f32 %v3687_v38, %v3685_v19  ;;  %v5064_v48 = vshrl.u32 %v2029_v49, 5  ;;  %v3775_v58 = vmul.u32 %v3773_v45, %v5034_v54  ;;  %v3778_v26 = vmul.u32 %v3774_v46, %v3772_v41 }
 0x101   :  { %v3779_v30 = vshll.u32 %v3776_v57, 16  ;;  %v3781_v47 = vshll.u32 %v3777_v44, 16  ;;  %v3803_v10 = vshll.u32 %v3799_v21, 16  ;;  %vm3805_vm10 = vc.u32 %v3797_v53, %v3801_v36 }
 0x102   :  { %v3689_v34 = vxor.u32 2147483648, %v3688_v9  ;;  %v3807_v13 = vadd.s32 %v3801_v36, %v3797_v53  ;;  %v3806_v28 = vsel %vm3805_vm10, 1, %v4539_v0  ;;  %v3802_v7 = vshrl.u32 %v3798_v52, 16 }
 0x103   :  { %vm3783_vm13 = vc.u32 %v3775_v58, %v3779_v30  ;;  %v3785_v63 = vadd.s32 %v3779_v30, %v3775_v58  ;;  %v3808_v54 = vadd.s32 %v3806_v28, %v3800_v42  ;;  %v2031_v60 = vand.u32 31, %v2029_v49 }
 0x104   :  { %v3690_v4 = vsel %vm3569_vm11, %v3689_v34, %v3688_v9  ;;  %v3784_v3 = vsel %vm3783_vm13, 1, %v4539_v0  ;;  %vm3809_vm14 = vc.u32 %v3807_v13, %v3803_v10  ;;  %v3780_v39 = vshrl.u32 %v3776_v57, 16 }
 0x105   :  { %v3693_v50 = vsel %vm5015_vm12, %v4675_v31, %v3690_v4  ;;  %v3786_v25 = vadd.s32 %v3784_v3, %v3778_v26  ;;  %vm3787_vm15 = vc.u32 %v3785_v63, %v3781_v47  ;;  %v3810_v55 = vsel %vm3809_vm14, 1, %v4539_v0 }
 0x106   :  { %v3695_v33 = vmul.f32 %v3693_v50, %v3693_v50  ;;  %v3788_v29 = vsel %vm3787_vm15, 1, %v4539_v0  ;;  %v3812_v15 = vadd.s32 %v3810_v55, %v3808_v54  ;;  %v3782_v16 = vshrl.u32 %v3777_v44, 16 }
 0x107   :  { %v3790_v41 = vadd.s32 %v3788_v29, %v3786_v25  ;;  %v3804_v37 = vshrl.u32 %v3799_v21, 16  ;;  %v5076_v38 = vsub.s32 32, %v2031_v60  ;;  %v5078_v53 = vadd.s32 %v3807_v13, %v3803_v10 }
 0x108   :  { %v3696_v51 = vmul.f32 -0.001358992, %v3695_v33  ;;  %v3703_v1 = vmul.f32 -0.00019511016, %v3695_v33  ;;  %v3813_v19 = vadd.s32 %v3812_v15, %v3802_v7  ;;  %v2034_v36 = vshll.u32 %v4540_v59, %v2031_v60 }
 0x109   :  { %v3791_v9 = vadd.s32 %v3790_v41, %v3780_v39  ;;  %v2035_v52 = vshrl.u32 %v4541_v61, %v5076_v38  ;;  %v2037_v49 = vshll.u32 %v4541_v61, %v2031_v60  ;;  %v2040_v21 = vshll.u32 %v4542_v2, %v2031_v60 }
 0x10a   :  { %v3697_v45 = vadd.f32 0.041655596, %v3696_v51  ;;  %v3704_v46 = vadd.f32 0.008332121, %v3703_v1  ;;  %v3814_v42 = vadd.s32 %v3813_v19, %v3804_v37  ;;  %v2038_v26 = vshrl.u32 %v4542_v2, %v5076_v38 }
 0x10b   :  { %v5084_v44 = vadd.s32 %v3791_v9, %v3782_v16  ;;  %v2041_v30 = vshrl.u32 %v4543_v5, %v5076_v38  ;;  %v2043_v47 = vshll.u32 %v4543_v5, %v2031_v60  ;;  %v3815_v4 = vmul.u32 %v5021_v6, %v5059_v40 }
 0x10c   :  { %v3698_v57 = vmul.f32 %v3697_v45, %v3695_v33  ;;  %v3705_v34 = vmul.f32 %v3704_v46, %v3695_v33  ;;  %v3818_v58 = vadd.s32 1, %v3814_v42  ;;  %v5096_v28 = vor.u32 %v2035_v52, %v2034_v36  ;;  %v5131_v36 = vpop.permute.xlu1 %49 }
 0x10d   :  { %vm3817_vm11 = vc.u32 %v5084_v44, %v5078_v53  ;;  %v2044_v3 = vshrl.u32 %v4544_v8, %v5076_v38  ;;  %v2046_v54 = vshll.u32 %v4544_v8, %v2031_v60  ;;  %v2047_v7 = vshrl.u32 %v4545_v11, %v5076_v38 }
 0x10e   :  { %v3699_v10 = vadd.f32 -0.4999988, %v3698_v57  ;;  %v3706_v13 = vadd.f32 -0.16666654, %v3705_v34  ;;  %v3819_v63 = vsel %vm3817_vm11, %v3818_v58, %v3814_v42  ;;  %v5103_v15 = vor.u32 %v2038_v26, %v2037_v49 }
 0x10f   :  { %v3820_v29 = vadd.s32 %v3819_v63, %v3815_v4  ;;  %v5105_v6 = vor.u32 %v2041_v30, %v2040_v21  ;;  %v2045_v40 = vor.u32 %v2044_v3, %v2043_v47  ;;  %vm2052_vm12 = vcmp.lt.s32.totalorder %v5064_v48, 4 }
 0x110   :  { %v3700_v25 = vmul.f32 %v3699_v10, %v3695_v33  ;;  %v3707_v55 = vmul.f32 %v3706_v13, %v3695_v33  ;;  %v2048_v41 = vor.u32 %v2047_v7, %v2046_v54  ;;  %vm3713_vm0 = vcmp.lt.s32.totalorder %v5056_v62, 2 }
 0x111   :  { %v3821_v39 = vadd.s32 536870912, %v3820_v29  ;;  %v2025_v60 = vor.u32 8388608, %v5027_v14  ;;  %v2058_v33 = vsel %vm2052_vm12, %v2045_v40, 920167782  ;;  %vm2049_vm1 = vcmp.lt.s32.totalorder %v5064_v48, 1 }
 0x112   :  { %v3701_v51 = vadd.f32 1.0, %v3700_v25  ;;  %v3708_v1 = vadd.f32 1.0, %v3707_v55  ;;  %vm3714_vm2 = vcmp.eq.s32.totalorder %v5056_v62, 0  ;;  %vm2051_vm3 = vcmp.lt.s32.totalorder %v5064_v48, 3 }
 0x113   :  { %v5112_v19 = vshrl.u32 %v3821_v39, 30  ;;  %v2061_v45 = vsel %vm2049_vm1, %v5103_v15, %v5105_v6  ;;  %v2062_v14 = vsel %vm2052_vm12, %v2048_v41, 1326507024  ;;  %v2057_v9 = vsel %vm2049_vm1, %v5096_v28, %v5103_v15 }
 0x114   :  { %v3709_v16 = vmul.f32 %v3708_v1, %v3693_v50  ;;  %v3718_v37 = vxor.u32 2147483648, %v3701_v51  ;;  %v2059_v42 = vsel %vm2051_vm3, %v5105_v6, %v2058_v33  ;;  %vm3717_vm4 = vcmp.eq.s32.totalorder %v5056_v62, 2 }
 0x115   :  { %v3823_v50 = vshll.u32 %v5112_v19, 30  ;;  %vm2050_vm5 = vcmp.lt.s32.totalorder %v5064_v48, 2  ;;  %v2063_v52 = vsel %vm2051_vm3, %v2045_v40, %v2062_v14  ;;  %v5137_v49 = vshll.u32 %v2025_v60, 8  ;;  %v5151_v40 = vpop.permute.xlu2 %89 }
 0x116   :  { %v3715_v46 = vxor.u32 2147483648, %v3709_v16  ;;  %v3719_v34 = vsel %vm3717_vm4, %v3718_v37, %v3709_v16  ;;  %v2064_v58 = vsel %vm2050_vm5, %v2061_v45, %v2063_v52  ;;  %vm3710_vm6 = vweird.f32 %v4675_v31 }
 0x117   :  { %v3824_v21 = vsub.s32 %v3820_v29, %v3823_v50  ;;  %v2060_v30 = vsel %vm2050_vm5, %v2057_v9, %v2059_v42  ;;  %v1997_v13 = vmul.f32 %v4654_v22, %v5131_v36  ;;  %v2066_v63 = vand.u32 65535, %v5137_v49 }
 0x118   :  { %v3716_v57 = vsel %vm3714_vm2, %v3701_v51, %v3715_v46  ;;  %v2068_v3 = vand.u32 65535, %v2064_v58  ;;  %v2069_v54 = vshrl.u32 %v2064_v58, 16  ;;  %v2067_v31 = vshrl.u32 %v5137_v49, 16 }
 0x119   :  { %v3720_v26 = vsel %vm3713_vm0, %v3716_v57, %v3719_v34  ;;  %vm3825_vm7 = vcmp.lt.s32.totalorder %v3824_v21, 0  ;;  %v3826_v10 = vsub.s32 0, %v3824_v21  ;;  %v2091_v55 = vshrl.u32 %v2060_v30, 16 }
 0x11a   :  { %v3721_v47 = vsel %vm3710_vm6, nan, %v3720_v26  ;;  %v2071_v7 = vmul.u32 %v2069_v54, %v2066_v63  ;;  %v2072_v51 = vmul.u32 %v2068_v3, %v2067_v31  ;;  %v2090_v1 = vand.u32 65535, %v2060_v30 }
 0x11b   :  { %v3883_v4 = vpack.c.bf16 %v3721_v47, %v3721_v47  ;;  %v3827_v25 = vsel %vm3825_vm7, %v3826_v10, %v3824_v21  ;;  %v5154_v22 = vadd.f32 %v1997_v13, %v5151_v40  ;;  %v2070_v41 = vmul.u32 %v2068_v3, %v2066_v63 }
 0x11c   :  { %v3828_v29 = vclz %v3827_v25  ;;  %v2074_v60 = vshll.u32 %v2071_v7, 16  ;;  %v3816_v33 = vadd.s32 %v5078_v53, %v5084_v44  ;;  %v2033_v16 = vshrl.u32 %v4540_v59, %v5076_v38 }
 0x11d   :  { %v3915_v62 = vsel %vm3907_vm9, %v3883_v4, 0  ;;  %v2073_v37 = vmul.u32 %v2069_v54, %v2067_v31  ;;  %v2093_v45 = vmul.u32 %v2091_v55, %v2066_v63  ;;  %v2076_v14 = vshll.u32 %v2072_v51, 16 }
 0x11e   :  { %3964 = vmatpush.bf16.msra.mxu2 %v3915_v62  ;;  %v4464_v39 = vadd.s32 4294967294, %v3828_v29  ;;  %vm2078_vm10 = vc.u32 %v2070_v41, %v2074_v60  ;;  %v2080_v46 = vadd.s32 %v2074_v60, %v2070_v41  ;;  %v2094_v42 = vmul.u32 %v2090_v1, %v2067_v31 }
 0x11f   :  { %v2079_v9 = vsel %vm2078_vm10, 1, %v4539_v0  ;;  %v2096_v52 = vshll.u32 %v2093_v45, 16  ;;  %vm3724_vm13 = vcmp.lt.s32.totalorder %v4991_v56, 0  ;;  %v2092_v53 = vmul.u32 %v2090_v1, %v2066_v63 }
 0x120   :  { %vm4465_vm8 = vcmp.lt.s32.totalorder %v4464_v39, 0  ;;  %v2081_v58 = vadd.s32 %v2079_v9, %v2073_v37  ;;  %v2075_v26 = vshrl.u32 %v2071_v7, 16  ;;  %vm2082_vm14 = vc.u32 %v2080_v46, %v2076_v14 }
 0x121   :  { %v3831_v50 = vsel %vm4465_vm8, 0, %v4464_v39  ;;  %v2095_v38 = vmul.u32 %v2091_v55, %v2067_v31  ;;  %v2083_v10 = vsel %vm2082_vm14, 1, %v4539_v0  ;;  %vm2100_vm15 = vc.u32 %v2092_v53, %v2096_v52 }
 0x122   :  { %v3832_v57 = vsub.s32 32, %v3831_v50  ;;  %v3836_v34 = vsub.s32 4294967266, %v3831_v50  ;;  %v3833_v44 = vshll.u32 %v3824_v21, %v3831_v50  ;;  %v2085_v13 = vadd.s32 %v2083_v10, %v2081_v58 }
 0x123   :  { %v2098_v4 = vshll.u32 %v2094_v42, 16  ;;  %v2101_v3 = vsel %vm2100_vm15, 1, %v4539_v0  ;;  %v2102_v54 = vadd.s32 %v2096_v52, %v2092_v53  ;;  %v2054_v63 = vsel %vm2052_vm12, %v5105_v6, 2102212464 }
 0x124   :  { %v3834_v30 = vshrl.u32 %v3816_v33, %v3832_v57  ;;  %v3837_v47 = vadd.s32 127, %v3836_v34  ;;  %v2103_v21 = vadd.s32 %v2101_v3, %v2095_v38  ;;  %v3846_v29 = vsub.s32 4, %v5112_v19 }
 0x125   :  { %v2086_v31 = vadd.s32 %v2085_v13, %v2075_v26  ;;  %vm2104_vm11 = vc.u32 %v2102_v54, %v2098_v4  ;;  %v2637_v55 = vand.u32 2147483647, %v5154_v22  ;;  %v2077_v1 = vshrl.u32 %v2072_v51, 16 }
 0x126   :  { %v3835_v25 = vor.u32 %v3834_v30, %v3833_v44  ;;  %v3838_v62 = vshll.u32 %v3837_v47, 23  ;;  %v2105_v39 = vsel %vm2104_vm11, 1, %v4539_v0  ;;  %v2640_v41 = vand.u32 2139095040, %v5154_v22 }
 0x127   :  { %v2053_v60 = vsel %vm2049_vm1, %v2033_v16, %v5096_v28  ;;  %v2055_v6 = vsel %vm2051_vm3, %v5103_v15, %v2054_v63  ;;  %v2097_v33 = vshrl.u32 %v2093_v45, 16  ;;  %v2107_v37 = vadd.s32 %v2105_v39, %v2103_v21 }
 0x128   :  { %v3839_v7 = vor.u32 4788187, %v3838_v62  ;;  %v3842_v46 = vcvt.s32.f32 %v3835_v25  ;;  %v2087_v50 = vadd.s32 %v2086_v31, %v2077_v1  ;;  %v2641_v9 = vshrl.u32 %v2640_v41, 23 }
 0x129   :  { %v3847_v51 = vsel %vm3724_vm13, %v3846_v29, %v5112_v19  ;;  %v2099_v52 = vshrl.u32 %v2094_v42, 16  ;;  %v2108_v57 = vadd.s32 %v2107_v37, %v2097_v33  ;;  %v2644_v34 = vand.u32 8388607, %v2637_v55 }
 0x12a   :  { %v3840_v14 = vand.u32 2147483647, %v3839_v7  ;;  %v2106_v16 = vadd.s32 %v2102_v54, %v2098_v4  ;;  %v4442_v58 = vadd.s32 4294967169, %v2641_v9  ;;  %vm3723_vm12 = vcmp.le.f32.partialorder %v3722_v35, 0.7853982 }
 0x12b   :  { %v2056_v15 = vsel %vm2050_vm5, %v2053_v60, %v2055_v6  ;;  %v2109_v45 = vadd.s32 %v2108_v57, %v2099_v52  ;;  %v3849_v44 = vsel %vm3723_vm12, 0, %v3847_v51  ;;  %v2645_v42 = vor.u32 8388608, %v2644_v34 }
 0x12c   :  { %v3843_v28 = vmul.f32 %v3842_v46, %v3840_v14  ;;  %vm2112_vm0 = vc.u32 %v2087_v50, %v2106_v16  ;;  %v2647_v26 = vadd.s32 1, %v4442_v58  ;;  %v2110_v30 = vmul.u32 %v5137_v49, %v2056_v15 }
 0x12d   :  { %v2113_v19 = vadd.s32 1, %v2109_v45  ;;  %v1994_v47 = vmul.f32 %v4656_v23, %v4959_v18  ;;  %v3866_v48 = vadd.s32 3, %v3849_v44  ;;  %v5192_v25 = vshll.u32 %v2645_v42, 8 }
 0x12e   :  { %v3844_v53 = vxor.u32 2147483648, %v3843_v28  ;;  %vm2648_vm1 = vcmp.gt.s32.totalorder %v2647_v26, 0  ;;  %v5203_v41 = vadd.s32 %v2106_v16, %v2087_v50  ;;  %vm3865_vm6 = vweird.f32 %v4991_v56 }
 0x12f   :  { %v2114_v10 = vsel %vm2112_vm0, %v2113_v19, %v2109_v45  ;;  %v2649_v13 = vsel %vm2648_vm1, %v2647_v26, 0  ;;  %v5195_v29 = vadd.f32 %v1994_v47, %v4993_v12  ;;  %v5197_v49 = vand.u32 3, %v3866_v48 }
 0x130   :  { %v3845_v38 = vsel %vm3724_vm13, %v3844_v53, %v3843_v28  ;;  %v2115_v3 = vadd.s32 %v2114_v10, %v2110_v30  ;;  %v2651_v54 = vand.u32 31, %v2649_v13  ;;  %v5206_v60 = vand.u32 65535, %v5192_v25 }
 0x131   :  { %v3848_v35 = vsel %vm3723_vm12, %v4991_v56, %v3845_v38  ;;  %v2175_v14 = vand.u32 2139095040, %v5195_v29  ;;  %vm3872_vm2 = vcmp.eq.s32.totalorder %v5197_v49, 2  ;;  %v5211_v46 = vshrl.u32 %v2649_v13, 5 }
 0x132   :  { %v3850_v4 = vmul.f32 %v3848_v35, %v3848_v35  ;;  %v2116_v21 = vadd.s32 536870912, %v2115_v3  ;;  %v5199_v31 = vsub.s32 32, %v2651_v54  ;;  %v2654_v9 = vshll.u32 %v4540_v59, %v2651_v54 }
 0x133   :  { %vm3869_vm3 = vcmp.eq.s32.totalorder %v5197_v49, 0  ;;  %v2657_v16 = vshll.u32 %v4541_v61, %v2651_v54  ;;  %v2663_v15 = vshll.u32 %v4543_v5, %v2651_v54  ;;  %vm3868_vm4 = vcmp.lt.s32.totalorder %v5197_v49, 2 }
 0x134   :  { %v3851_v62 = vmul.f32 -0.001358992, %v3850_v4  ;;  %v3858_v63 = vmul.f32 -0.00019511016, %v3850_v4  ;;  %v5201_v39 = vshrl.u32 %v2116_v21, 30  ;;  %v2655_v51 = vshrl.u32 %v4541_v61, %v5199_v31 }
 0x135   :  { %v2658_v50 = vshrl.u32 %v4542_v2, %v5199_v31  ;;  %v2664_v28 = vshrl.u32 %v4544_v8, %v5199_v31  ;;  %v2661_v58 = vshrl.u32 %v4543_v5, %v5199_v31  ;;  %v2667_v45 = vshrl.u32 %v4545_v11, %v5199_v31 }
 0x136   :  { %v3852_v7 = vadd.f32 0.041655596, %v3851_v62  ;;  %v3859_v1 = vadd.f32 0.008332121, %v3858_v63  ;;  %v2118_v37 = vshll.u32 %v5201_v39, 30  ;;  %v5233_v19 = vor.u32 %v2655_v51, %v2654_v9 }
 0x137   :  { %v5235_v42 = vor.u32 %v2658_v50, %v2657_v16  ;;  %v2660_v38 = vshll.u32 %v4542_v2, %v2651_v54  ;;  %v2666_v30 = vshll.u32 %v4544_v8, %v2651_v54  ;;  %v2665_v13 = vor.u32 %v2664_v28, %v2663_v15 }
 0x138   :  { %v3853_v6 = vmul.f32 %v3852_v7, %v3850_v4  ;;  %v3860_v33 = vmul.f32 %v3859_v1, %v3850_v4  ;;  %v5218_v34 = vsub.s32 %v2115_v3, %v2118_v37  ;;  %v2687_v63 = vshrl.u32 %v5192_v25, 16 }
 0x139   :  { %v2662_v3 = vor.u32 %v2661_v58, %v2660_v38  ;;  %v2668_v62 = vor.u32 %v2667_v45, %v2666_v30  ;;  %vm2669_vm7 = vcmp.lt.s32.totalorder %v5211_v46, 1  ;;  %v2176_v1 = vshrl.u32 %v2175_v14, 23 }
 0x13a   :  { %v3854_v52 = vadd.f32 -0.4999988, %v3853_v6  ;;  %v3861_v57 = vadd.f32 -0.16666654, %v3860_v33  ;;  %vm2120_vm5 = vcmp.lt.s32.totalorder %v5218_v34, 0  ;;  %v2121_v26 = vsub.s32 0, %v5218_v34 }
 0x13b   :  { %vm2670_vm8 = vcmp.lt.s32.totalorder %v5211_v46, 2  ;;  %vm2672_vm10 = vcmp.lt.s32.totalorder %v5211_v46, 4  ;;  %v2677_v54 = vsel %vm2669_vm7, %v5233_v19, %v5235_v42  ;;  %vm2671_vm13 = vcmp.lt.s32.totalorder %v5211_v46, 3 }
 0x13c   :  { %v3855_v53 = vmul.f32 %v3854_v52, %v3850_v4  ;;  %v3862_v44 = vmul.f32 %v3861_v57, %v3850_v4  ;;  %v2122_v10 = vsel %vm2120_vm5, %v2121_v26, %v5218_v34  ;;  %v2681_v9 = vsel %vm2669_vm7, %v5235_v42, %v2662_v3 }
 0x13d   :  { %v2123_v4 = vclz %v2122_v10  ;;  %v2682_v51 = vsel %vm2672_vm10, %v2668_v62, 1326507024  ;;  %vm2019_vm15 = vcmp.lt.s32.totalorder %v5003_v43, 0  ;;  %vm5285_vm11 = vcmp.le.f32.partialorder %v2017_v32, 0.7853982 }
 0x13e   :  { %v3856_v47 = vadd.f32 1.0, %v3855_v53  ;;  %v3863_v48 = vadd.f32 1.0, %v3862_v44  ;;  %v2683_v28 = vsel %vm2671_vm13, %v2665_v13, %v2682_v51 }
 0x13f   :  { %v4431_v6 = vadd.s32 4294967294, %v2123_v4  ;;  %v2684_v44 = vsel %vm2670_vm8, %v2681_v9, %v2683_v28  ;;  %v2172_v4 = vand.u32 2147483647, %v5195_v29 }
 0x140   :  { %v3864_v21 = vmul.f32 %v3863_v48, %v3848_v35  ;;  %v3873_v7 = vxor.u32 2147483648, %v3856_v47  ;;  %v2678_v35 = vsel %vm2672_vm10, %v2665_v13, 920167782  ;;  %v2688_v10 = vand.u32 65535, %v2684_v44 }
 0x141   :  { %vm4432_vm14 = vcmp.lt.s32.totalorder %v4431_v6, 0  ;;  %v2679_v14 = vsel %vm2671_vm13, %v2662_v3, %v2678_v35  ;;  %v2689_v13 = vshrl.u32 %v2684_v44, 16 }
 0x142   :  { %v3870_v33 = vxor.u32 2147483648, %v3864_v21  ;;  %v3874_v37 = vsel %vm3872_vm2, %v3873_v7, %v3864_v21  ;;  %v2126_v52 = vsel %vm4432_vm14, 0, %v4431_v6  ;;  %v2680_v57 = vsel %vm2670_vm8, %v2677_v54, %v2679_v14 }
 0x143   :  { %v2127_v58 = vsub.s32 32, %v2126_v52  ;;  %v2128_v15 = vshll.u32 %v5218_v34, %v2126_v52  ;;  %v2131_v45 = vsub.s32 4294967266, %v2126_v52  ;;  %v2710_v26 = vand.u32 65535, %v2680_v57 }
 0x144   :  { %v3871_v50 = vsel %vm3869_vm3, %v3856_v47, %v3870_v33  ;;  %v2711_v38 = vshrl.u32 %v2680_v57, 16  ;;  %v4433_v34 = vadd.s32 4294967169, %v2176_v1  ;;  %v2653_v6 = vshrl.u32 %v4540_v59, %v5199_v31 }
 0x145   :  { %v3875_v16 = vsel %vm3868_vm4, %v3871_v50, %v3874_v37  ;;  %v2129_v47 = vshrl.u32 %v5203_v41, %v2127_v58  ;;  %v2132_v48 = vadd.s32 127, %v2131_v45  ;;  %v2714_v7 = vmul.u32 %v2710_v26, %v2687_v63 }
 0x146   :  { %v3876_v53 = vsel %vm3865_vm6, nan, %v3875_v16  ;;  %v2713_v49 = vmul.u32 %v2711_v38, %v5206_v60  ;;  %v2674_v41 = vsel %vm2672_vm10, %v2662_v3, 2102212464  ;;  %v2691_v54 = vmul.u32 %v2689_v13, %v5206_v60 }
 0x147   :  { %v3884_v30 = vpack.c.bf16 %v3876_v53, %v3876_v53  ;;  %v2130_v56 = vor.u32 %v2129_v47, %v2128_v15  ;;  %v2133_v21 = vshll.u32 %v2132_v48, 23  ;;  %v2692_v33 = vmul.u32 %v2688_v10, %v2687_v63 }
 0x148   :  { %v2690_v35 = vmul.u32 %v2688_v10, %v5206_v60  ;;  %v2712_v14 = vmul.u32 %v2710_v26, %v5206_v60  ;;  %v2716_v9 = vshll.u32 %v2713_v49, 16  ;;  %v2693_v31 = vmul.u32 %v2689_v13, %v2687_v63 }
 0x149   :  { %v3918_v62 = vsel %vm3907_vm9, %v3884_v30, 0  ;;  %v2134_v37 = vor.u32 4788187, %v2133_v21  ;;  %v2137_v51 = vcvt.s32.f32 %v2130_v56  ;;  %v2694_v50 = vshll.u32 %v2691_v54, 16 }
 0x14a   :  { %3983 = vmatpush.bf16.msra.mxu3 %v3918_v62  ;;  %v2715_v52 = vmul.u32 %v2711_v38, %v2687_v63  ;;  %v2696_v57 = vshll.u32 %v2692_v33, 16  ;;  %v2718_v28 = vshll.u32 %v2714_v7, 16  ;;  %vm2720_vm12 = vc.u32 %v2712_v14, %v2716_v9 }
 0x14b   :  { %v2135_v3 = vand.u32 2147483647, %v2134_v37  ;;  %vm2698_vm0 = vc.u32 %v2690_v35, %v2694_v50  ;;  %v2700_v16 = vadd.s32 %v2694_v50, %v2690_v35  ;;  %v2721_v32 = vsel %vm2720_vm12, 1, %v4539_v0 }
 0x14c   :  { %v2722_v58 = vadd.s32 %v2716_v9, %v2712_v14  ;;  %v2673_v45 = vsel %vm2669_vm7, %v2653_v6, %v5233_v19  ;;  %v2699_v60 = vsel %vm2698_vm0, 1, %v4539_v0  ;;  %v2723_v53 = vadd.s32 %v2721_v32, %v2715_v52 }
 0x14d   :  { %v2138_v15 = vmul.f32 %v2137_v51, %v2135_v3  ;;  %v2675_v63 = vsel %vm2671_vm13, %v5235_v42, %v2674_v41  ;;  %v2701_v44 = vadd.s32 %v2699_v60, %v2693_v31  ;;  %vm2702_vm1 = vc.u32 %v2700_v16, %v2696_v57 }
 0x14e   :  { %vm2724_vm2 = vc.u32 %v2722_v58, %v2718_v28  ;;  %v2703_v38 = vsel %vm2702_vm1, 1, %v4539_v0  ;;  %v2182_v47 = vadd.s32 1, %v4433_v34  ;;  %v2695_v48 = vshrl.u32 %v2691_v54, 16 }
 0x14f   :  { %v2139_v26 = vxor.u32 2147483648, %v2138_v15  ;;  %v2725_v30 = vsel %vm2724_vm2, 1, %v4539_v0  ;;  %v2705_v10 = vadd.s32 %v2703_v38, %v2701_v44  ;;  %v2717_v13 = vshrl.u32 %v2713_v49, 16 }
 0x150   :  { %v2727_v19 = vadd.s32 %v2725_v30, %v2723_v53  ;;  %v2697_v56 = vshrl.u32 %v2692_v33, 16  ;;  %v2719_v21 = vshrl.u32 %v2714_v7, 16  ;;  %vm2183_vm3 = vcmp.gt.s32.totalorder %v2182_v47, 0 }
 0x151   :  { %v2140_v62 = vsel %vm2019_vm15, %v2139_v26, %v2138_v15  ;;  %v2706_v6 = vadd.s32 %v2705_v10, %v2695_v48  ;;  %v2184_v37 = vsel %vm2183_vm3, %v2182_v47, 0  ;;  %v2141_v34 = vsub.s32 4, %v5201_v39 }
 0x152   :  { %v5306_v42 = vsel %vm5285_vm11, %v5003_v43, %v2140_v62  ;;  %v2728_v41 = vadd.s32 %v2727_v19, %v2717_v13  ;;  %v2179_v54 = vand.u32 8388607, %v2172_v4  ;;  %v2186_v33 = vand.u32 31, %v2184_v37 }
 0x153   :  { %v5311_v49 = vmul.f32 %v5306_v42, %v5306_v42  ;;  %v2676_v7 = vsel %vm2670_vm8, %v2673_v45, %v2675_v63  ;;  %v5317_v35 = vadd.s32 %v2706_v6, %v2697_v56  ;;  %v5319_v14 = vadd.s32 %v2722_v58, %v2718_v28 }
 0x154   :  { %v2729_v9 = vadd.s32 %v2728_v41, %v2719_v21  ;;  %v2187_v50 = vsub.s32 32, %v2186_v33  ;;  %v2730_v57 = vmul.u32 %v5192_v25, %v2676_v7  ;;  %v2180_v16 = vor.u32 8388608, %v2179_v54 }
 0x155   :  { %v2146_v51 = vmul.f32 -0.001358992, %v5311_v49  ;;  %v2153_v31 = vmul.f32 -0.00019511016, %v5311_v49  ;;  %vm2732_vm4 = vc.u32 %v5317_v35, %v5319_v14  ;;  %v2142_v46 = vsel %vm2019_vm15, %v2141_v34, %v5201_v39 }
 0x156   :  { %v2733_v52 = vadd.s32 1, %v2729_v9  ;;  %v2192_v58 = vshll.u32 %v4541_v61, %v2186_v33  ;;  %v2193_v45 = vshrl.u32 %v4542_v2, %v2187_v50  ;;  %v2195_v60 = vshll.u32 %v4542_v2, %v2186_v33 }
 0x157   :  { %v2154_v3 = vadd.f32 0.008332121, %v2153_v31  ;;  %v2147_v28 = vadd.f32 0.041655596, %v2146_v51  ;;  %v2196_v53 = vshrl.u32 %v4543_v5, %v2187_v50  ;;  %v5333_v63 = vshrl.u32 %v2184_v37, 5 }
 0x158   :  { %v2734_v32 = vsel %vm2732_vm4, %v2733_v52, %v2729_v9  ;;  %v2189_v25 = vshll.u32 %v4540_v59, %v2186_v33  ;;  %v2198_v44 = vshll.u32 %v4543_v5, %v2186_v33  ;;  %v2199_v26 = vshrl.u32 %v4544_v8, %v2187_v50 }
 0x159   :  { %v2735_v15 = vadd.s32 %v2734_v32, %v2730_v57  ;;  %v2155_v39 = vmul.f32 %v2154_v3, %v5311_v49  ;;  %v2190_v30 = vshrl.u32 %v4541_v61, %v2187_v50  ;;  %v2201_v47 = vshll.u32 %v4544_v8, %v2186_v33 }
 0x15a   :  { %v1998_v48 = vmul.f32 %v4656_v23, %v5131_v36  ;;  %v2200_v10 = vor.u32 %v2199_v26, %v2198_v44  ;;  %v2202_v13 = vshrl.u32 %v4545_v11, %v2187_v50  ;;  %v2148_v19 = vmul.f32 %v2147_v28, %v5311_v49 }
 0x15b   :  { %v2736_v38 = vadd.s32 536870912, %v2735_v15  ;;  %v5347_v56 = vor.u32 %v2193_v45, %v2192_v58  ;;  %v5349_v21 = vor.u32 %v2196_v53, %v2195_v60  ;;  %v2144_v6 = vsel %vm5285_vm11, 0, %v2142_v46 }
 0x15c   :  { %v2203_v41 = vor.u32 %v2202_v13, %v2201_v47  ;;  %v5353_v37 = vshll.u32 %v2180_v16, 8  ;;  %v2156_v34 = vadd.f32 -0.16666654, %v2155_v39  ;;  %v2191_v54 = vor.u32 %v2190_v30, %v2189_v25 }
 0x15d   :  { %v5345_v62 = vshrl.u32 %v2736_v38, 30  ;;  %vm2207_vm5 = vcmp.lt.s32.totalorder %v5333_v63, 4  ;;  %v5358_v33 = vadd.f32 %v1998_v48, %v5151_v40  ;;  %vm2204_vm6 = vcmp.lt.s32.totalorder %v5333_v63, 1 }
 0x15e   :  { %v2213_v7 = vsel %vm2207_vm5, %v2200_v10, 920167782  ;;  %v2217_v1 = vsel %vm2207_vm5, %v2203_v41, 1326507024  ;;  %v2149_v9 = vadd.f32 -0.4999988, %v2148_v19  ;;  %v2216_v31 = vsel %vm2204_vm6, %v5347_v56, %v5349_v21 }
 0x15f   :  { %v2738_v23 = vshll.u32 %v5345_v62, 30  ;;  %vm2206_vm7 = vcmp.lt.s32.totalorder %v5333_v63, 3  ;;  %v2161_v52 = vadd.s32 3, %v2144_v6  ;;  %vm2205_vm8 = vcmp.lt.s32.totalorder %v5333_v63, 2 }
 0x160   :  { %v2218_v3 = vsel %vm2206_vm7, %v2200_v10, %v2217_v1  ;;  %v2221_v57 = vand.u32 65535, %v5353_v37  ;;  %v2212_v46 = vsel %vm2204_vm6, %v2191_v54, %v5347_v56  ;;  %v2214_v28 = vsel %vm2206_vm7, %v5349_v21, %v2213_v7 }
 0x161   :  { %v2739_v51 = vsub.s32 %v2735_v15, %v2738_v23  ;;  %v2157_v32 = vmul.f32 %v2156_v34, %v5311_v49  ;;  %v2188_v58 = vshrl.u32 %v4540_v59, %v2187_v50  ;;  %v2219_v15 = vsel %vm2205_vm8, %v2216_v31, %v2218_v3 }
 0x162   :  { %v2222_v45 = vshrl.u32 %v5353_v37, 16  ;;  %v2150_v60 = vmul.f32 %v2149_v9, %v5311_v49  ;;  %v2223_v25 = vand.u32 65535, %v2219_v15  ;;  %v2224_v44 = vshrl.u32 %v2219_v15, 16 }
 0x163   :  { %vm2740_vm10 = vcmp.lt.s32.totalorder %v2739_v51, 0  ;;  %v2741_v16 = vsub.s32 0, %v2739_v51  ;;  %vm2639_vm13 = vcmp.lt.s32.totalorder %v5154_v22, 0  ;;  %v2215_v39 = vsel %vm2205_vm8, %v2212_v46, %v2214_v28 }
 0x164   :  { %v5389_v38 = vand.u32 3, %v2161_v52  ;;  %v2226_v30 = vmul.u32 %v2224_v44, %v2221_v57  ;;  %v2227_v50 = vmul.u32 %v2223_v25, %v2222_v45  ;;  %v2792_v47 = vand.u32 2147483647, %v5358_v33 }
 0x165   :  { %v2742_v53 = vsel %vm2740_vm10, %v2741_v16, %v2739_v51  ;;  %v2158_v48 = vadd.f32 1.0, %v2157_v32  ;;  %v2731_v10 = vadd.s32 %v5319_v14, %v5317_v35  ;;  %v5396_v13 = vsel %vm2204_vm6, %v2188_v58, %v2191_v54 }
 0x166   :  { %v2743_v26 = vclz %v2742_v53  ;;  %v5398_v19 = vadd.f32 1.0, %v2150_v60  ;;  %v2225_v6 = vmul.u32 %v2223_v25, %v2221_v57  ;;  %v2229_v41 = vshll.u32 %v2226_v30, 16 }
 0x167   :  { %v2245_v34 = vand.u32 65535, %v2215_v39  ;;  %v2761_v23 = vsub.s32 4, %v5345_v62  ;;  %v2228_v7 = vmul.u32 %v2224_v44, %v2222_v45  ;;  %v2246_v1 = vshrl.u32 %v2215_v39, 16 }
 0x168   :  { %v4443_v49 = vadd.s32 4294967294, %v2743_v26  ;;  %v2231_v31 = vshll.u32 %v2227_v50, 16  ;;  %vm2233_vm15 = vc.u32 %v2225_v6, %v2229_v41  ;;  %v2235_v52 = vadd.s32 %v2229_v41, %v2225_v6 }
 0x169   :  { %v5402_v35 = vmul.f32 %v2158_v48, %v5306_v42  ;;  %vm5406_vm11 = vcmp.le.f32.partialorder %v2637_v55, 0.7853982  ;;  %v2234_v16 = vsel %vm2233_vm15, 1, %v4539_v0  ;;  %v2248_v28 = vmul.u32 %v2246_v1, %v2221_v57 }
 0x16a   :  { %vm4444_vm14 = vcmp.lt.s32.totalorder %v4443_v49, 0  ;;  %v2236_v46 = vadd.s32 %v2234_v16, %v2228_v7  ;;  %vm2237_vm12 = vc.u32 %v2235_v52, %v2231_v31  ;;  %v2249_v32 = vmul.u32 %v2245_v34, %v2222_v45 }
 0x16b   :  { %v2746_v9 = vsel %vm4444_vm14, 0, %v4443_v49  ;;  %v2238_v42 = vsel %vm2237_vm12, 1, %v4539_v0  ;;  %v2762_v55 = vsel %vm2639_vm13, %v2761_v23, %v5345_v62  ;;  %v2247_v25 = vmul.u32 %v2245_v34, %v2221_v57 }
 0x16c   :  { %v2747_v54 = vsub.s32 32, %v2746_v9  ;;  %v2751_v3 = vsub.s32 4294967266, %v2746_v9  ;;  %v2748_v58 = vshll.u32 %v2739_v51, %v2746_v9  ;;  %v2240_v53 = vadd.s32 %v2238_v42, %v2236_v46 }
 0x16d   :  { %v2251_v44 = vshll.u32 %v2248_v28, 16  ;;  %v2230_v48 = vshrl.u32 %v2226_v30, 16  ;;  %v2795_v49 = vand.u32 2139095040, %v5358_v33  ;;  %v2250_v6 = vmul.u32 %v2246_v1, %v2222_v45 }
 0x16e   :  { %v2749_v15 = vshrl.u32 %v2731_v10, %v2747_v54  ;;  %v2752_v60 = vadd.s32 127, %v2751_v3  ;;  %v2253_v41 = vshll.u32 %v2249_v32, 16  ;;  %v2209_v62 = vsel %vm2207_vm5, %v5349_v21, 2102212464 }
 0x16f   :  { %vm2255_vm0 = vc.u32 %v2247_v25, %v2251_v44  ;;  %v2257_v51 = vadd.s32 %v2251_v44, %v2247_v25  ;;  %v2241_v7 = vadd.s32 %v2240_v53, %v2230_v48  ;;  %v2796_v31 = vshrl.u32 %v2795_v49, 23 }
 0x170   :  { %v2750_v26 = vor.u32 %v2749_v15, %v2748_v58  ;;  %v2753_v39 = vshll.u32 %v2752_v60, 23  ;;  %v2256_v9 = vsel %vm2255_vm0, 1, %v4539_v0  ;;  %v2232_v57 = vshrl.u32 %v2227_v50, 16 }
 0x171   :  { %v2258_v34 = vadd.s32 %v2256_v9, %v2250_v6  ;;  %vm2259_vm1 = vc.u32 %v2257_v51, %v2253_v41  ;;  %v4445_v45 = vadd.s32 4294967169, %v2796_v31  ;;  %v2165_v1 = vxor.u32 2147483648, %v5402_v35 }
 0x172   :  { %v2754_v10 = vor.u32 4788187, %v2753_v39  ;;  %v2757_v30 = vcvt.s32.f32 %v2750_v26  ;;  %v2260_v52 = vsel %vm2259_vm1, 1, %v4539_v0  ;;  %v2764_v54 = vsel %vm5406_vm11, 0, %v2762_v55 }
 0x173   :  { %v2252_v3 = vshrl.u32 %v2248_v28, 16  ;;  %v2262_v16 = vadd.s32 %v2260_v52, %v2258_v34  ;;  %v2210_v21 = vsel %vm2206_vm7, %v5347_v56, %v2209_v62  ;;  %v5427_v50 = vadd.s32 %v2241_v7, %v2232_v57 }
 0x174   :  { %v2755_v23 = vand.u32 2147483647, %v2754_v10  ;;  %v2802_v58 = vadd.s32 1, %v4445_v45  ;;  %vm2164_vm2 = vcmp.eq.s32.totalorder %v5389_v38, 0  ;;  %v2168_v15 = vxor.u32 2147483648, %v5398_v19 }
 0x175   :  { %v2254_v60 = vshrl.u32 %v2249_v32, 16  ;;  %v2263_v42 = vadd.s32 %v2262_v16, %v2252_v3  ;;  %v2781_v25 = vadd.s32 3, %v2764_v54  ;;  %v5431_v44 = vadd.s32 %v2257_v51, %v2253_v41 }
 0x176   :  { %v2758_v46 = vmul.f32 %v2757_v30, %v2755_v23  ;;  %vm2803_vm3 = vcmp.gt.s32.totalorder %v2802_v58, 0  ;;  %v2166_v28 = vsel %vm2164_vm2, %v5398_v19, %v2165_v1  ;;  %v2211_v56 = vsel %vm2205_vm8, %v5396_v13, %v2210_v21 }
 0x177   :  { %v2264_v55 = vadd.s32 %v2263_v42, %v2254_v60  ;;  %v2804_v26 = vsel %vm2803_vm3, %v2802_v58, 0  ;;  %vm2267_vm4 = vc.u32 %v5427_v50, %v5431_v44  ;;  %v2799_v32 = vand.u32 8388607, %v2792_v47 }
 0x178   :  { %v2759_v53 = vxor.u32 2147483648, %v2758_v46  ;;  %v2806_v48 = vand.u32 31, %v2804_v26  ;;  %vm2163_vm5 = vcmp.lt.s32.totalorder %v5389_v38, 2  ;;  %vm2167_vm6 = vcmp.eq.s32.totalorder %v5389_v38, 2 }
 0x179   :  { %v2268_v13 = vadd.s32 1, %v2264_v55  ;;  %v2169_v19 = vsel %vm2167_vm6, %v2168_v15, %v5402_v35  ;;  %v2265_v6 = vmul.u32 %v5353_v37, %v2211_v56  ;;  %vm2160_vm7 = vweird.f32 %v5003_v43 }
 0x17a   :  { %v2760_v39 = vsel %vm2639_vm13, %v2759_v53, %v2758_v46  ;;  %v5450_v41 = vsub.s32 32, %v2806_v48  ;;  %v2170_v51 = vsel %vm2163_vm5, %v2166_v28, %v2169_v19  ;;  %v5453_v10 = vand.u32 3, %v2781_v25 }
 0x17b   :  { %v2763_v63 = vsel %vm5406_vm11, %v5154_v22, %v2760_v39  ;;  %v2269_v7 = vsel %vm2267_vm4, %v2268_v13, %v2264_v55  ;;  %v2800_v62 = vor.u32 8388608, %v2799_v32  ;;  %v5455_v14 = vshrl.u32 %v2804_v26, 5 }
 0x17c   :  { %v2765_v49 = vmul.f32 %v2763_v63, %v2763_v63  ;;  %v2270_v31 = vadd.s32 %v2269_v7, %v2265_v6  ;;  %v2813_v35 = vshrl.u32 %v4542_v2, %v5450_v41  ;;  %v2816_v37 = vshrl.u32 %v4543_v5, %v5450_v41 }
 0x17d   :  { %v2819_v57 = vshrl.u32 %v4544_v8, %v5450_v41  ;;  %v2818_v52 = vshll.u32 %v4543_v5, %v2806_v48  ;;  %v2810_v45 = vshrl.u32 %v4541_v61, %v5450_v41  ;;  %v2812_v1 = vshll.u32 %v4541_v61, %v2806_v48 }
 0x17e   :  { %v2766_v9 = vmul.f32 -0.001358992, %v2765_v49  ;;  %v2773_v38 = vmul.f32 -0.00019511016, %v2765_v49  ;;  %v2271_v30 = vadd.s32 536870912, %v2270_v31  ;;  %v2815_v54 = vshll.u32 %v4542_v2, %v2806_v48 }
 0x17f   :  { %v2822_v3 = vshrl.u32 %v4545_v11, %v5450_v41  ;;  %v2820_v58 = vor.u32 %v2819_v57, %v2818_v52  ;;  %v2809_v15 = vshll.u32 %v4540_v59, %v2806_v48  ;;  %v5473_v60 = vor.u32 %v2813_v35, %v2812_v1 }
 0x180   :  { %v2767_v34 = vadd.f32 0.041655596, %v2766_v9  ;;  %v2774_v23 = vadd.f32 0.008332121, %v2773_v38  ;;  %v5470_v21 = vshrl.u32 %v2271_v30, 30  ;;  %v5475_v42 = vor.u32 %v2816_v37, %v2815_v54 }
 0x181   :  { %v2821_v53 = vshll.u32 %v4544_v8, %v2806_v48  ;;  %v2171_v25 = vsel %vm2160_vm7, nan, %v2170_v51  ;;  %v5481_v26 = vor.u32 %v2810_v45, %v2809_v15  ;;  %vm2824_vm8 = vcmp.lt.s32.totalorder %v5455_v14, 1 }
 0x182   :  { %v2768_v16 = vmul.f32 %v2767_v34, %v2765_v49  ;;  %v2775_v46 = vmul.f32 %v2774_v23, %v2765_v49  ;;  %v2273_v55 = vshll.u32 %v5470_v21, 30  ;;  %vm2827_vm10 = vcmp.lt.s32.totalorder %v5455_v14, 4 }
 0x183   :  { %v2823_v39 = vor.u32 %v2822_v3, %v2821_v53  ;;  %v2833_v48 = vsel %vm2827_vm10, %v2820_v58, 920167782  ;;  %vm2780_vm13 = vweird.f32 %v5154_v22  ;;  %vm2783_vm14 = vcmp.lt.s32.totalorder %v5453_v10, 2 }
 0x184   :  { %v2769_v28 = vadd.f32 -0.4999988, %v2768_v16  ;;  %v2776_v56 = vadd.f32 -0.16666654, %v2775_v46  ;;  %v2274_v19 = vsub.s32 %v2270_v31, %v2273_v55  ;;  %vm2826_vm15 = vcmp.lt.s32.totalorder %v5455_v14, 3 }
 0x185   :  { %v2836_v43 = vsel %vm2824_vm8, %v5473_v60, %v5475_v42  ;;  %v5494_v6 = vshll.u32 %v2800_v62, 8  ;;  %vm2825_vm12 = vcmp.lt.s32.totalorder %v5455_v14, 2  ;;  %v2832_v9 = vsel %vm2824_vm8, %v5481_v26, %v5473_v60 }
 0x186   :  { %v2770_v32 = vmul.f32 %v2769_v28, %v2765_v49  ;;  %v2777_v13 = vmul.f32 %v2776_v56, %v2765_v49  ;;  %vm2275_vm11 = vcmp.lt.s32.totalorder %v2274_v19, 0  ;;  %v2276_v49 = vsub.s32 0, %v2274_v19 }
 0x187   :  { %v2834_v38 = vsel %vm2826_vm15, %v5475_v42, %v2833_v48  ;;  %v2837_v31 = vsel %vm2827_vm10, %v2823_v39, 1326507024  ;;  %v2841_v30 = vand.u32 65535, %v5494_v6  ;;  %v2842_v52 = vshrl.u32 %v5494_v6, 16 }
 0x188   :  { %v2771_v51 = vadd.f32 1.0, %v2770_v32  ;;  %v2778_v7 = vadd.f32 1.0, %v2777_v13  ;;  %v2277_v37 = vsel %vm2275_vm11, %v2276_v49, %v2274_v19  ;;  %v2838_v57 = vsel %vm2826_vm15, %v2820_v58, %v2837_v31 }
 0x189   :  { %v2278_v34 = vclz %v2277_v37  ;;  %v2839_v23 = vsel %vm2825_vm12, %v2836_v43, %v2838_v57  ;;  %v2835_v1 = vsel %vm2825_vm12, %v2832_v9, %v2834_v38  ;;  %vm2784_vm0 = vcmp.eq.s32.totalorder %v5453_v10, 0 }
 0x18a   :  { %v2779_v62 = vmul.f32 %v2778_v7, %v2763_v63  ;;  %v2788_v35 = vxor.u32 2147483648, %v2771_v51  ;;  %v2843_v54 = vand.u32 65535, %v2839_v23  ;;  %v2844_v3 = vshrl.u32 %v2839_v23, 16 }
 0x18b   :  { %vm2787_vm1 = vcmp.eq.s32.totalorder %v5453_v10, 2  ;;  %v2266_v63 = vadd.s32 %v5431_v44, %v5427_v50  ;;  %v4434_v16 = vadd.s32 4294967294, %v2278_v34  ;;  %v2865_v55 = vand.u32 65535, %v2835_v1 }
 0x18c   :  { %v2785_v45 = vxor.u32 2147483648, %v2779_v62  ;;  %v2789_v58 = vsel %vm2787_vm1, %v2788_v35, %v2779_v62  ;;  %v2846_v15 = vmul.u32 %v2844_v3, %v2841_v30  ;;  %v2847_v53 = vmul.u32 %v2843_v54, %v2842_v52 }
 0x18d   :  { %vm4435_vm2 = vcmp.lt.s32.totalorder %v4434_v16, 0  ;;  %v2845_v56 = vmul.u32 %v2843_v54, %v2841_v30  ;;  %v2866_v48 = vshrl.u32 %v2835_v1, 16  ;;  %v1995_v44 = vmul.f32 %v4658_v24, %v4959_v18 }
 0x18e   :  { %v2786_v46 = vsel %vm2784_vm0, %v2771_v51, %v2785_v45  ;;  %v2281_v32 = vsel %vm4435_vm2, 0, %v4434_v16  ;;  %v2849_v13 = vshll.u32 %v2846_v15, 16  ;;  %v2848_v51 = vmul.u32 %v2844_v3, %v2842_v52 }
 0x18f   :  { %v2790_v28 = vsel %vm2783_vm14, %v2786_v46, %v2789_v58  ;;  %v2282_v7 = vsub.s32 32, %v2281_v32  ;;  %v2286_v50 = vsub.s32 4294967266, %v2281_v32  ;;  %v2851_v49 = vshll.u32 %v2847_v53, 16 }
 0x190   :  { %v2791_v39 = vsel %vm2780_vm13, nan, %v2790_v28  ;;  %vm2853_vm3 = vc.u32 %v2845_v56, %v2849_v13  ;;  %v2855_v10 = vadd.s32 %v2849_v13, %v2845_v56  ;;  %v2283_v9 = vshll.u32 %v2274_v19, %v2281_v32 }
 0x191   :  { %v3877_v43 = vpack.c.bf16 %v2791_v39, %v2171_v25  ;;  %v2284_v38 = vshrl.u32 %v2266_v63, %v2282_v7  ;;  %v2287_v31 = vadd.s32 127, %v2286_v50  ;;  %v2854_v22 = vsel %vm2853_vm3, 1, %v4539_v0 }
 0x192   :  { %v2856_v62 = vadd.s32 %v2854_v22, %v2848_v51  ;;  %vm2857_vm4 = vc.u32 %v2855_v10, %v2851_v49  ;;  %v2868_v35 = vmul.u32 %v2866_v48, %v2841_v30  ;;  %v2869_v37 = vmul.u32 %v2865_v55, %v2842_v52 }
 0x193   :  { %3927 = vmatpush.bf16.msra.mxu0 %v3877_v43  ;;  %v2285_v25 = vor.u32 %v2284_v38, %v2283_v9  ;;  %v2288_v57 = vshll.u32 %v2287_v31, 23  ;;  %v2858_v34 = vsel %vm2857_vm4, 1, %v4539_v0  ;;  %v5527_v23 = vadd.f32 %v1995_v44, %v4993_v12 }
 0x194   :  { %vm2174_vm5 = vcmp.lt.s32.totalorder %v5195_v29, 0  ;;  %v2860_v45 = vadd.s32 %v2858_v34, %v2856_v62  ;;  %v2867_v1 = vmul.u32 %v2865_v55, %v2841_v30  ;;  %v2871_v19 = vshll.u32 %v2868_v35, 16 }
 0x195   :  { %v2289_v54 = vor.u32 4788187, %v2288_v57  ;;  %v2808_v3 = vshrl.u32 %v4540_v59, %v5450_v41  ;;  %v2850_v63 = vshrl.u32 %v2846_v15, 16  ;;  %v2870_v16 = vmul.u32 %v2866_v48, %v2842_v52 }
 0x196   :  { %v2292_v46 = vcvt.s32.f32 %v2285_v25  ;;  %v2873_v58 = vshll.u32 %v2869_v37, 16  ;;  %vm2875_vm6 = vc.u32 %v2867_v1, %v2871_v19  ;;  %v2877_v28 = vadd.s32 %v2871_v19, %v2867_v1 }
 0x197   :  { %v2290_v56 = vand.u32 2147483647, %v2289_v54  ;;  %v2861_v39 = vadd.s32 %v2860_v45, %v2850_v63  ;;  %v2876_v32 = vsel %vm2875_vm6, 1, %v4539_v0  ;;  %v2330_v13 = vand.u32 2139095040, %v5527_v23 }
 0x198   :  { %v2296_v43 = vsub.s32 4, %v5470_v21  ;;  %v2829_v30 = vsel %vm2827_vm10, %v5475_v42, 2102212464  ;;  %v2878_v55 = vadd.s32 %v2876_v32, %v2870_v16  ;;  %vm2879_vm7 = vc.u32 %v2877_v28, %v2873_v58 }
 0x199   :  { %v2293_v41 = vmul.f32 %v2292_v46, %v2290_v56  ;;  %v2852_v52 = vshrl.u32 %v2847_v53, 16  ;;  %v2880_v15 = vsel %vm2879_vm7, 1, %v4539_v0  ;;  %v2331_v48 = vshrl.u32 %v2330_v13, 23 }
 0x19a   :  { %v2828_v7 = vsel %vm2824_vm8, %v2808_v3, %v5481_v26  ;;  %v2872_v50 = vshrl.u32 %v2868_v35, 16  ;;  %v2882_v44 = vadd.s32 %v2880_v15, %v2878_v55  ;;  %v1999_v51 = vmul.f32 %v4658_v24, %v5131_v36 }
 0x19b   :  { %v2294_v49 = vxor.u32 2147483648, %v2293_v41  ;;  %v2830_v42 = vsel %vm2826_vm15, %v5473_v60, %v2829_v30  ;;  %v2862_v10 = vadd.s32 %v2861_v39, %v2852_v52  ;;  %v4436_v9 = vadd.s32 4294967169, %v2331_v48 }
 0x19c   :  { %v2297_v53 = vsel %vm2174_vm5, %v2296_v43, %v5470_v21  ;;  %v2874_v38 = vshrl.u32 %v2869_v37, 16  ;;  %v2883_v31 = vadd.s32 %v2882_v44, %v2872_v50  ;;  %v2327_v26 = vand.u32 2147483647, %v5527_v23 }
 0x19d   :  { %vm5553_vm8 = vcmp.le.f32.partialorder %v2172_v4, 0.7853982  ;;  %v2295_v24 = vsel %vm2174_vm5, %v2294_v49, %v2293_v41  ;;  %v2881_v60 = vadd.s32 %v2877_v28, %v2873_v58  ;;  %v2337_v62 = vadd.s32 1, %v4436_v9 }
 0x19e   :  { %v5562_v35 = vsel %vm5553_vm8, %v5195_v29, %v2295_v24  ;;  %v2831_v21 = vsel %vm2825_vm12, %v2828_v7, %v2830_v42  ;;  %v2884_v37 = vadd.s32 %v2883_v31, %v2874_v38  ;;  %v2299_v4 = vsel %vm5553_vm8, 0, %v2297_v53 }
 0x19f   :  { %v2300_v25 = vmul.f32 %v5562_v35, %v5562_v35  ;;  %vm2887_vm10 = vc.u32 %v2862_v10, %v2881_v60  ;;  %vm2338_vm13 = vcmp.gt.s32.totalorder %v2337_v62, 0  ;;  %v5571_v34 = vadd.f32 %v1999_v51, %v5151_v40 }
 0x1a0   :  { %v2888_v57 = vadd.s32 1, %v2884_v37  ;;  %v2334_v45 = vand.u32 8388607, %v2327_v26  ;;  %v2339_v1 = vsel %vm2338_vm13, %v2337_v62, 0  ;;  %v2885_v54 = vmul.u32 %v5494_v6, %v2831_v21 }
 0x1a1   :  { %v2301_v19 = vmul.f32 -0.001358992, %v2300_v25  ;;  %v2308_v14 = vmul.f32 -0.00019511016, %v2300_v25  ;;  %v2341_v3 = vand.u32 31, %v2339_v1  ;;  %v2316_v63 = vadd.s32 3, %v2299_v4 }
 0x1a2   :  { %v2889_v16 = vsel %vm2887_vm10, %v2888_v57, %v2884_v37  ;;  %v2335_v39 = vor.u32 8388608, %v2334_v45  ;;  %v2950_v30 = vand.u32 2139095040, %v5571_v34  ;;  %v5585_v44 = vshrl.u32 %v2339_v1, 5 }
 0x1a3   :  { %v2302_v46 = vadd.f32 0.041655596, %v2301_v19  ;;  %v2309_v58 = vadd.f32 0.008332121, %v2308_v14  ;;  %v2890_v28 = vadd.s32 %v2889_v16, %v2885_v54  ;;  %v2342_v56 = vsub.s32 32, %v2341_v3 }
 0x1a4   :  { %v2344_v13 = vshll.u32 %v4540_v59, %v2341_v3  ;;  %v2347_v43 = vshll.u32 %v4541_v61, %v2341_v3  ;;  %v2353_v6 = vshll.u32 %v4543_v5, %v2341_v3  ;;  %v5583_v7 = vand.u32 3, %v2316_v63 }
 0x1a5   :  { %v2891_v32 = vadd.s32 536870912, %v2890_v28  ;;  %v2345_v55 = vshrl.u32 %v4541_v61, %v2342_v56  ;;  %v2348_v41 = vshrl.u32 %v4542_v2, %v2342_v56  ;;  %v2354_v52 = vshrl.u32 %v4544_v8, %v2342_v56 }
 0x1a6   :  { %v2303_v15 = vmul.f32 %v2302_v46, %v2300_v25  ;;  %v2310_v48 = vmul.f32 %v2309_v58, %v2300_v25  ;;  %v2350_v51 = vshll.u32 %v4542_v2, %v2341_v3  ;;  %v2351_v49 = vshrl.u32 %v4543_v5, %v2342_v56 }
 0x1a7   :  { %v2892_v50 = vshrl.u32 %v2891_v32, 30  ;;  %v5589_v42 = vshll.u32 %v2335_v39, 8  ;;  %vm2794_vm14 = vcmp.lt.s32.totalorder %v5358_v33, 0  ;;  %v2886_v9 = vadd.s32 %v2881_v60, %v2862_v10 }
 0x1a8   :  { %v2356_v38 = vshll.u32 %v4544_v8, %v2341_v3  ;;  %v2951_v31 = vshrl.u32 %v2950_v30, 23  ;;  %v2346_v22 = vor.u32 %v2345_v55, %v2344_v13  ;;  %v2349_v24 = vor.u32 %v2348_v41, %v2347_v43 }
 0x1a9   :  { %v2893_v53 = vshll.u32 %v2892_v50, 30  ;;  %v2355_v62 = vor.u32 %v2354_v52, %v2353_v6  ;;  %v2357_v21 = vshrl.u32 %v4545_v11, %v2342_v56  ;;  %v2304_v37 = vadd.f32 -0.4999988, %v2303_v15 }
 0x1aa   :  { %v2311_v4 = vadd.f32 -0.16666654, %v2310_v48  ;;  %v2947_v45 = vand.u32 2147483647, %v5571_v34  ;;  %vm5597_vm15 = vcmp.le.f32.partialorder %v2792_v47, 0.7853982  ;;  %v2352_v10 = vor.u32 %v2351_v49, %v2350_v51 }
 0x1ab   :  { %v2894_v57 = vsub.s32 %v2890_v28, %v2893_v53  ;;  %vm2359_vm11 = vcmp.lt.s32.totalorder %v5585_v44, 1  ;;  %v2376_v60 = vand.u32 65535, %v5589_v42  ;;  %v5605_v19 = vmul.f32 %v4967_v17, %v4959_v18 }
 0x1ac   :  { %v2358_v54 = vor.u32 %v2357_v21, %v2356_v38  ;;  %vm2362_vm0 = vcmp.lt.s32.totalorder %v5585_v44, 4  ;;  %v2916_v3 = vsub.s32 4, %v2892_v50  ;;  %v2367_v47 = vsel %vm2359_vm11, %v2346_v22, %v2349_v24 }
 0x1ad   :  { %vm2895_vm12 = vcmp.lt.s32.totalorder %v2894_v57, 0  ;;  %v2896_v14 = vsub.s32 0, %v2894_v57  ;;  %v2368_v63 = vsel %vm2362_vm0, %v2355_v62, 920167782  ;;  %v4448_v16 = vadd.s32 4294967169, %v2951_v31 }
 0x1ae   :  { %v2305_v46 = vmul.f32 %v2304_v37, %v2300_v25  ;;  %v2312_v58 = vmul.f32 %v2311_v4, %v2300_v25  ;;  %vm2361_vm1 = vcmp.lt.s32.totalorder %v5585_v44, 3  ;;  %vm2360_vm2 = vcmp.lt.s32.totalorder %v5585_v44, 2 }
 0x1af   :  { %v2897_v28 = vsel %vm2895_vm12, %v2896_v14, %v2894_v57  ;;  %v2369_v32 = vsel %vm2361_vm1, %v2352_v10, %v2368_v63  ;;  %v2377_v13 = vshrl.u32 %v5589_v42, 16  ;;  %v2371_v30 = vsel %vm2359_vm11, %v2349_v24, %v2352_v10 }
 0x1b0   :  { %v2898_v39 = vclz %v2897_v28  ;;  %v2370_v43 = vsel %vm2360_vm2, %v2367_v47, %v2369_v32  ;;  %v2372_v25 = vsel %vm2362_vm0, %v2358_v54, 1326507024  ;;  %v5625_v55 = vand.u32 8388607, %v2947_v45 }
 0x1b1   :  { %v5629_v6 = vsel %vm2794_vm14, %v2916_v3, %v2892_v50  ;;  %v2343_v52 = vshrl.u32 %v4540_v59, %v2342_v56  ;;  %v2957_v15 = vadd.s32 1, %v4448_v16  ;;  %v5632_v48 = vadd.f32 1.0, %v2305_v46 }
 0x1b2   :  { %v4446_v41 = vadd.s32 4294967294, %v2898_v39  ;;  %v2313_v51 = vadd.f32 1.0, %v2312_v58  ;;  %v2364_v49 = vsel %vm2362_vm0, %v2352_v10, 2102212464  ;;  %v2373_v53 = vsel %vm2361_vm1, %v2355_v62, %v2372_v25 }
 0x1b3   :  { %v2374_v38 = vsel %vm2360_vm2, %v2371_v30, %v2373_v53  ;;  %v2400_v31 = vand.u32 65535, %v2370_v43  ;;  %v2401_v21 = vshrl.u32 %v2370_v43, 16  ;;  %v2919_v56 = vsel %vm5597_vm15, 0, %v5629_v6 }
 0x1b4   :  { %vm4447_vm3 = vcmp.lt.s32.totalorder %v4446_v41, 0  ;;  %v2378_v37 = vand.u32 65535, %v2374_v38  ;;  %v2379_v4 = vshrl.u32 %v2374_v38, 16  ;;  %v2363_v10 = vsel %vm2359_vm11, %v2343_v52, %v2346_v22 }
 0x1b5   :  { %v2901_v50 = vsel %vm4447_vm3, 0, %v4446_v41  ;;  %v2403_v3 = vmul.u32 %v2401_v21, %v2376_v60  ;;  %v5646_v62 = vmul.f32 %v2313_v51, %v5562_v35  ;;  %v2365_v47 = vsel %vm2361_vm1, %v2349_v24, %v2364_v49 }
 0x1b6   :  { %v2902_v14 = vsub.s32 32, %v2901_v50  ;;  %v2906_v54 = vsub.s32 4294967266, %v2901_v50  ;;  %v2381_v63 = vmul.u32 %v2379_v4, %v2376_v60  ;;  %v2382_v16 = vmul.u32 %v2378_v37, %v2377_v13 }
 0x1b7   :  { %v2903_v46 = vshll.u32 %v2894_v57, %v2901_v50  ;;  %v2404_v39 = vmul.u32 %v2400_v31, %v2377_v13  ;;  %v2380_v32 = vmul.u32 %v2378_v37, %v2376_v60  ;;  %v2383_v43 = vmul.u32 %v2379_v4, %v2377_v13 }
 0x1b8   :  { %v2904_v58 = vshrl.u32 %v2886_v9, %v2902_v14  ;;  %v2907_v28 = vadd.s32 127, %v2906_v54  ;;  %v2384_v30 = vshll.u32 %v2381_v63, 16  ;;  %v2402_v25 = vmul.u32 %v2400_v31, %v2376_v60 }
 0x1b9   :  { %v2405_v22 = vmul.u32 %v2401_v21, %v2377_v13  ;;  %v2406_v52 = vshll.u32 %v2403_v3, 16  ;;  %v2386_v53 = vshll.u32 %v2382_v16, 16  ;;  %v2408_v51 = vshll.u32 %v2404_v39, 16 }
 0x1ba   :  { %v2905_v41 = vor.u32 %v2904_v58, %v2903_v46  ;;  %v2908_v6 = vshll.u32 %v2907_v28, 23  ;;  %vm2388_vm4 = vc.u32 %v2380_v32, %v2384_v30  ;;  %v2390_v35 = vadd.s32 %v2384_v30, %v2380_v32 }
 0x1bb   :  { %v2389_v49 = vsel %vm2388_vm4, 1, %v4539_v0  ;;  %vm2410_vm5 = vc.u32 %v2402_v25, %v2406_v52  ;;  %v2412_v50 = vadd.s32 %v2406_v52, %v2402_v25  ;;  %vm2958_vm7 = vcmp.gt.s32.totalorder %v2957_v15, 0 }
 0x1bc   :  { %v2909_v38 = vor.u32 4788187, %v2908_v6  ;;  %v2912_v24 = vcvt.s32.f32 %v2905_v41  ;;  %v2391_v9 = vadd.s32 %v2389_v49, %v2383_v43  ;;  %vm2392_vm6 = vc.u32 %v2390_v35, %v2386_v53 }
 0x1bd   :  { %v2411_v57 = vsel %vm2410_vm5, 1, %v4539_v0  ;;  %v2393_v60 = vsel %vm2392_vm6, 1, %v4539_v0  ;;  %v2385_v13 = vshrl.u32 %v2381_v63, 16  ;;  %vm2414_vm8 = vc.u32 %v2412_v50, %v2408_v51 }
 0x1be   :  { %v2910_v37 = vand.u32 2147483647, %v2909_v38  ;;  %v2413_v31 = vadd.s32 %v2411_v57, %v2405_v22  ;;  %v2395_v21 = vadd.s32 %v2393_v60, %v2391_v9  ;;  %v2959_v4 = vsel %vm2958_vm7, %v2957_v15, 0 }
 0x1bf   :  { %v2366_v54 = vsel %vm2360_vm2, %v2363_v10, %v2365_v47  ;;  %v2415_v46 = vsel %vm2414_vm8, 1, %v4539_v0  ;;  %v2961_v58 = vand.u32 31, %v2959_v4  ;;  %v2387_v28 = vshrl.u32 %v2382_v16, 16 }
 0x1c0   :  { %v2913_v14 = vmul.f32 %v2912_v24, %v2910_v37  ;;  %v2396_v32 = vadd.s32 %v2395_v21, %v2385_v13  ;;  %v2407_v43 = vshrl.u32 %v2403_v3, 16  ;;  %v2417_v30 = vadd.s32 %v2415_v46, %v2413_v31 }
 0x1c1   :  { %vm2319_vm10 = vcmp.eq.s32.totalorder %v5583_v7, 0  ;;  %v2323_v25 = vxor.u32 2147483648, %v5632_v48  ;;  %v2955_v63 = vor.u32 8388608, %v5625_v55  ;;  %v5659_v6 = vsub.s32 32, %v2961_v58 }
 0x1c2   :  { %v2914_v41 = vxor.u32 2147483648, %v2913_v14  ;;  %v2936_v15 = vadd.s32 3, %v2919_v56  ;;  %v5661_v22 = vadd.s32 %v2396_v32, %v2387_v28  ;;  %v2409_v44 = vshrl.u32 %v2404_v39, 16 }
 0x1c3   :  { %v2418_v10 = vadd.s32 %v2417_v30, %v2407_v43  ;;  %v2320_v47 = vxor.u32 2147483648, %v5646_v62  ;;  %v5666_v16 = vadd.s32 %v2412_v50, %v2408_v51  ;;  %v2420_v52 = vmul.u32 %v5589_v42, %v2366_v54 }
 0x1c4   :  { %v2915_v3 = vsel %vm2794_vm14, %v2914_v41, %v2913_v14  ;;  %v5674_v56 = vshrl.u32 %v2959_v4, 5  ;;  %v2968_v39 = vshrl.u32 %v4542_v2, %v5659_v6  ;;  %vm2322_vm13 = vcmp.eq.s32.totalorder %v5583_v7, 2 }
 0x1c5   :  { %v5672_v55 = vsel %vm5597_vm15, %v5358_v33, %v2915_v3  ;;  %v2419_v53 = vadd.s32 %v2418_v10, %v2409_v44  ;;  %vm2422_vm14 = vc.u32 %v5661_v22, %v5666_v16  ;;  %v2967_v42 = vshll.u32 %v4541_v61, %v2961_v58 }
 0x1c6   :  { %v2920_v35 = vmul.f32 %v5672_v55, %v5672_v55  ;;  %v2971_v1 = vshrl.u32 %v4543_v5, %v5659_v6  ;;  %v2974_v38 = vshrl.u32 %v4544_v8, %v5659_v6  ;;  %v2976_v24 = vshll.u32 %v4544_v8, %v2961_v58 }
 0x1c7   :  { %v2423_v51 = vadd.s32 1, %v2419_v53  ;;  %v2977_v49 = vshrl.u32 %v4545_v11, %v5659_v6  ;;  %vm2318_vm15 = vcmp.lt.s32.totalorder %v5583_v7, 2  ;;  %v2970_v50 = vshll.u32 %v4542_v2, %v2961_v58 }
 0x1c8   :  { %v2921_v9 = vmul.f32 -0.001358992, %v2920_v35  ;;  %v2928_v57 = vmul.f32 -0.00019511016, %v2920_v35  ;;  %v2973_v37 = vshll.u32 %v4543_v5, %v2961_v58  ;;  %v2965_v31 = vshrl.u32 %v4541_v61, %v5659_v6 }
 0x1c9   :  { %v2424_v60 = vsel %vm2422_vm14, %v2423_v51, %v2419_v53  ;;  %v5696_v13 = vor.u32 %v2968_v39, %v2967_v42  ;;  %v2978_v21 = vor.u32 %v2977_v49, %v2976_v24  ;;  %v5698_v46 = vor.u32 %v2971_v1, %v2970_v50 }
 0x1ca   :  { %v2922_v4 = vadd.f32 0.041655596, %v2921_v9  ;;  %v2929_v14 = vadd.f32 0.008332121, %v2928_v57  ;;  %v2425_v54 = vadd.s32 %v2424_v60, %v2420_v52  ;;  %v2321_v28 = vsel %vm2319_vm10, %v5632_v48, %v2320_v47 }
 0x1cb   :  { %v2937_v32 = vand.u32 3, %v2936_v15  ;;  %v2964_v43 = vshll.u32 %v4540_v59, %v2961_v58  ;;  %v2975_v30 = vor.u32 %v2974_v38, %v2973_v37  ;;  %vm2315_vm11 = vweird.f32 %v5195_v29 }
 0x1cc   :  { %v2923_v41 = vmul.f32 %v2922_v4, %v2920_v35  ;;  %v2930_v44 = vmul.f32 %v2929_v14, %v2920_v35  ;;  %v2426_v10 = vadd.s32 536870912, %v2425_v54  ;;  %vm2982_vm12 = vcmp.lt.s32.totalorder %v5674_v56, 4 }
 0x1cd   :  { %v5706_v3 = vor.u32 %v2965_v31, %v2964_v43  ;;  %vm2979_vm0 = vcmp.lt.s32.totalorder %v5674_v56, 1  ;;  %vm2981_vm1 = vcmp.lt.s32.totalorder %v5674_v56, 3  ;;  %v2992_v48 = vsel %vm2982_vm12, %v2978_v21, 1326507024 }
 0x1ce   :  { %v2924_v15 = vadd.f32 -0.4999988, %v2923_v41  ;;  %v2931_v47 = vadd.f32 -0.16666654, %v2930_v44  ;;  %v5712_v58 = vshrl.u32 %v2426_v10, 30  ;;  %v2991_v52 = vsel %vm2979_vm0, %v5696_v13, %v5698_v46 }
 0x1cf   :  { %v2324_v53 = vsel %vm2322_vm13, %v2323_v25, %v5646_v62  ;;  %v2988_v39 = vsel %vm2982_vm12, %v2975_v30, 920167782  ;;  %v2993_v42 = vsel %vm2981_vm1, %v2975_v30, %v2992_v48  ;;  %v5725_v1 = vshll.u32 %v2955_v63, 8 }
 0x1d0   :  { %v2925_v51 = vmul.f32 %v2924_v15, %v2920_v35  ;;  %v2932_v38 = vmul.f32 %v2931_v47, %v2920_v35  ;;  %v2428_v24 = vshll.u32 %v5712_v58, 30  ;;  %vm2980_vm2 = vcmp.lt.s32.totalorder %v5674_v56, 2 }
 0x1d1   :  { %v2325_v49 = vsel %vm2318_vm15, %v2321_v28, %v2324_v53  ;;  %vm2935_vm3 = vweird.f32 %v5358_v33  ;;  %vm2938_vm4 = vcmp.lt.s32.totalorder %v2937_v32, 2  ;;  %v2987_v62 = vsel %vm2979_vm0, %v5706_v3, %v5696_v13 }
 0x1d2   :  { %v2994_v25 = vsel %vm2980_vm2, %v2991_v52, %v2993_v42  ;;  %v2926_v63 = vadd.f32 1.0, %v2925_v51  ;;  %v2933_v35 = vadd.f32 1.0, %v2932_v38  ;;  %v2429_v9 = vsub.s32 %v2425_v54, %v2428_v24 }
 0x1d3   :  { %v2989_v57 = vsel %vm2981_vm1, %v5698_v46, %v2988_v39  ;;  %v2996_v7 = vand.u32 65535, %v5725_v1  ;;  %v2997_v50 = vshrl.u32 %v5725_v1, 16  ;;  %v2998_v37 = vand.u32 65535, %v2994_v25 }
 0x1d4   :  { %v2999_v60 = vshrl.u32 %v2994_v25, 16  ;;  %v2934_v31 = vmul.f32 %v2933_v35, %v5672_v55  ;;  %v2943_v21 = vxor.u32 2147483648, %v2926_v63  ;;  %vm2430_vm5 = vcmp.lt.s32.totalorder %v2429_v9, 0 }
 0x1d5   :  { %v2431_v4 = vsub.s32 0, %v2429_v9  ;;  %v2326_v14 = vsel %vm2315_vm11, nan, %v2325_v49  ;;  %vm2939_vm6 = vcmp.eq.s32.totalorder %v2937_v32, 0  ;;  %v2990_v54 = vsel %vm2980_vm2, %v2987_v62, %v2989_v57 }
 0x1d6   :  { %v3001_v28 = vmul.u32 %v2999_v60, %v2996_v7  ;;  %v2940_v43 = vxor.u32 2147483648, %v2934_v31  ;;  %vm2942_vm7 = vcmp.eq.s32.totalorder %v2937_v32, 2  ;;  %v5748_v41 = vmul.u32 %v2998_v37, %v2997_v50 }
 0x1d7   :  { %v2432_v30 = vsel %vm2430_vm5, %v2431_v4, %v2429_v9  ;;  %v2421_v44 = vadd.s32 %v5666_v16, %v5661_v22  ;;  %v2963_v10 = vshrl.u32 %v4540_v59, %v5659_v6  ;;  %v2944_v15 = vsel %vm2942_vm7, %v2943_v21, %v2934_v31 }
 0x1d8   :  { %v2433_v55 = vclz %v2432_v30  ;;  %v3004_v48 = vshll.u32 %v3001_v28, 16  ;;  %v2941_v29 = vsel %vm2939_vm6, %v2926_v63, %v2940_v43  ;;  %v3000_v47 = vmul.u32 %v2998_v37, %v2996_v7 }
 0x1d9   :  { %v3021_v52 = vshrl.u32 %v2990_v54, 16  ;;  %v2945_v53 = vsel %vm2938_vm4, %v2941_v29, %v2944_v15  ;;  %v3003_v42 = vmul.u32 %v2999_v60, %v2997_v50  ;;  %v3020_v51 = vand.u32 65535, %v2990_v54 }
 0x1da   :  { %v4437_v39 = vadd.s32 4294967294, %v2433_v55  ;;  %v2946_v38 = vsel %vm2935_vm3, nan, %v2945_v53  ;;  %v3006_v24 = vshll.u32 %v5748_v41, 16  ;;  %vm3008_vm8 = vc.u32 %v3000_v47, %v3004_v48 }
 0x1db   :  { %v3010_v22 = vadd.s32 %v3004_v48, %v3000_v47  ;;  %v3878_v16 = vpack.c.bf16 %v2946_v38, %v2326_v14  ;;  %v2984_v6 = vsel %vm2982_vm12, %v5698_v46, 2102212464  ;;  %v3009_v49 = vsel %vm3008_vm8, 1, %v4539_v0 }
 0x1dc   :  { %vm4438_vm10 = vcmp.lt.s32.totalorder %v4437_v39, 0  ;;  %v3011_v62 = vadd.s32 %v3009_v49, %v3003_v42  ;;  %v3023_v25 = vmul.u32 %v3021_v52, %v2996_v7  ;;  %v2451_v35 = vsub.s32 4, %v5712_v58 }
 0x1dd   :  { %v2436_v32 = vsel %vm4438_vm10, 0, %v4437_v39  ;;  %vm3012_vm13 = vc.u32 %v3010_v22, %v3006_v24  ;;  %3946 = vmatpush.bf16.msra.mxu1 %v3878_v16  ;;  %v3022_v60 = vmul.u32 %v3020_v51, %v2996_v7  ;;  %v3024_v31 = vmul.u32 %v3020_v51, %v2997_v50 }
 0x1de   :  { %v2437_v63 = vsub.s32 32, %v2436_v32  ;;  %v2441_v33 = vsub.s32 4294967266, %v2436_v32  ;;  %v3013_v57 = vsel %vm3012_vm13, 1, %v4539_v0  ;;  %v3026_v21 = vshll.u32 %v3023_v25, 16 }
 0x1df   :  { %v3015_v37 = vadd.s32 %v3013_v57, %v3011_v62  ;;  %v2438_v4 = vshll.u32 %v2429_v9, %v2436_v32  ;;  %v5766_v54 = vadd.f32 %v5605_v19, %v4993_v12  ;;  %v3005_v43 = vshrl.u32 %v3001_v28, 16 }
 0x1e0   :  { %v2439_v14 = vshrl.u32 %v2421_v44, %v2437_v63  ;;  %v2442_v46 = vadd.s32 127, %v2441_v33  ;;  %v3025_v30 = vmul.u32 %v3021_v52, %v2997_v50  ;;  %v3028_v55 = vshll.u32 %v3024_v31, 16 }
 0x1e1   :  { %vm3030_vm14 = vc.u32 %v3022_v60, %v3026_v21  ;;  %v3032_v47 = vadd.s32 %v3026_v21, %v3022_v60  ;;  %vm2329_vm15 = vcmp.lt.s32.totalorder %v5527_v23, 0  ;;  %v3016_v7 = vadd.s32 %v3015_v37, %v3005_v43 }
 0x1e2   :  { %v2440_v48 = vor.u32 %v2439_v14, %v2438_v4  ;;  %v2443_v29 = vshll.u32 %v2442_v46, 23  ;;  %v3031_v15 = vsel %vm3030_vm14, 1, %v4539_v0  ;;  %v2000_v9 = vmul.f32 %v4967_v17, %v5131_v36 }
 0x1e3   :  { %v3033_v53 = vadd.s32 %v3031_v15, %v3025_v30  ;;  %v2983_v19 = vsel %vm2979_vm0, %v2963_v10, %v5706_v3  ;;  %v2985_v50 = vsel %vm2981_vm1, %v5696_v13, %v2984_v6  ;;  %vm3034_vm11 = vc.u32 %v3032_v47, %v3028_v55 }
 0x1e4   :  { %v2444_v44 = vor.u32 4788187, %v2443_v29  ;;  %v2452_v28 = vsel %vm2329_vm15, %v2451_v35, %v5712_v58  ;;  %v3007_v52 = vshrl.u32 %v5748_v41, 16  ;;  %v3035_v39 = vsel %vm3034_vm11, 1, %v4539_v0 }
 0x1e5   :  { %v2485_v17 = vand.u32 2139095040, %v5766_v54  ;;  %v2447_v51 = vcvt.s32.f32 %v2440_v48  ;;  %v3027_v38 = vshrl.u32 %v3023_v25, 16  ;;  %v3037_v24 = vadd.s32 %v3035_v39, %v3033_v53 }
 0x1e6   :  { %v2445_v42 = vand.u32 2147483647, %v2444_v44  ;;  %v3017_v3 = vadd.s32 %v3016_v7, %v3007_v52  ;;  %v5785_v10 = vadd.f32 %v2000_v9, %v5151_v40  ;;  %v2482_v13 = vand.u32 2147483647, %v5766_v54 }
 0x1e7   :  { %v2486_v22 = vshrl.u32 %v2485_v17, 23  ;;  %v3029_v6 = vshrl.u32 %v3024_v31, 16  ;;  %v3038_v58 = vadd.s32 %v3037_v24, %v3027_v38  ;;  %vm2328_vm12 = vcmp.le.f32.partialorder %v2327_v26, 0.7853982 }
 0x1e8   :  { %v2448_v16 = vmul.f32 %v2447_v51, %v2445_v42  ;;  %v3036_v41 = vadd.s32 %v3032_v47, %v3028_v55  ;;  %v2454_v62 = vsel %vm2328_vm12, 0, %v2452_v28  ;;  %v2986_v25 = vsel %vm2980_vm2, %v2983_v19, %v2985_v50 }
 0x1e9   :  { %v4439_v49 = vadd.s32 4294967169, %v2486_v22  ;;  %v3039_v63 = vadd.s32 %v3038_v58, %v3029_v6  ;;  %v2489_v33 = vand.u32 8388607, %v2482_v13  ;;  %v3105_v57 = vand.u32 2139095040, %v5785_v10 }
 0x1ea   :  { %v2449_v32 = vxor.u32 2147483648, %v2448_v16  ;;  %vm3042_vm0 = vc.u32 %v3017_v3, %v3036_v41  ;;  %v2471_v31 = vadd.s32 3, %v2454_v62  ;;  %v3040_v21 = vmul.u32 %v5725_v1, %v2986_v25 }
 0x1eb   :  { %v2492_v35 = vadd.s32 1, %v4439_v49  ;;  %v3043_v60 = vadd.s32 1, %v3039_v63  ;;  %v2490_v43 = vor.u32 8388608, %v2489_v33  ;;  %v3106_v55 = vshrl.u32 %v3105_v57, 23 }
 0x1ec   :  { %v2450_v37 = vsel %vm2329_vm15, %v2449_v32, %v2448_v16  ;;  %v5803_v15 = vand.u32 3, %v2471_v31  ;;  %vm5807_vm2 = vcmp.le.f32.partialorder %v2947_v45, 0.7853982  ;;  %vm2949_vm3 = vcmp.lt.s32.totalorder %v5571_v34, 0 }
 0x1ed   :  { %v5798_v26 = vsel %vm2328_vm12, %v5527_v23, %v2450_v37  ;;  %vm2493_vm1 = vcmp.gt.s32.totalorder %v2492_v35, 0  ;;  %v3044_v4 = vsel %vm3042_vm0, %v3043_v60, %v3039_v63  ;;  %v5812_v9 = vadd.s32 %v3036_v41, %v3017_v3 }
 0x1ee   :  { %v2455_v56 = vmul.f32 %v5798_v26, %v5798_v26  ;;  %v2494_v14 = vsel %vm2493_vm1, %v2492_v35, 0  ;;  %v3045_v46 = vadd.s32 %v3044_v4, %v3040_v21  ;;  %v5814_v50 = vshll.u32 %v2490_v43, 8 }
 0x1ef   :  { %v2496_v30 = vand.u32 31, %v2494_v14  ;;  %v3102_v28 = vand.u32 2147483647, %v5785_v10  ;;  %v4451_v52 = vadd.s32 4294967169, %v3106_v55  ;;  %v2495_v25 = vshrl.u32 %v2494_v14, 5 }
 0x1f0   :  { %v2456_v48 = vmul.f32 -0.001358992, %v2455_v56  ;;  %v2463_v29 = vmul.f32 -0.00019511016, %v2455_v56  ;;  %v3046_v1 = vadd.s32 536870912, %v3045_v46  ;;  %v5830_v63 = vand.u32 65535, %v5814_v50 }
 0x1f1   :  { %v2497_v44 = vsub.s32 32, %v2496_v30  ;;  %v2499_v39 = vshll.u32 %v4540_v59, %v2496_v30  ;;  %v2502_v45 = vshll.u32 %v4541_v61, %v2496_v30  ;;  %v2505_v17 = vshll.u32 %v4542_v2, %v2496_v30 }
 0x1f2   :  { %v2457_v7 = vadd.f32 0.041655596, %v2456_v48  ;;  %v2464_v53 = vadd.f32 0.008332121, %v2463_v29  ;;  %v3047_v19 = vshrl.u32 %v3046_v1, 30  ;;  %v2508_v42 = vshll.u32 %v4543_v5, %v2496_v30 }
 0x1f3   :  { %v2500_v22 = vshrl.u32 %v4541_v61, %v2497_v44  ;;  %v2503_v16 = vshrl.u32 %v4542_v2, %v2497_v44  ;;  %v2506_v6 = vshrl.u32 %v4543_v5, %v2497_v44  ;;  %v2509_v58 = vshrl.u32 %v4544_v8, %v2497_v44 }
 0x1f4   :  { %v2458_v51 = vmul.f32 %v2457_v7, %v2455_v56  ;;  %v2465_v38 = vmul.f32 %v2464_v53, %v2455_v56  ;;  %v3048_v24 = vshll.u32 %v3047_v19, 30  ;;  %v3071_v3 = vsub.s32 4, %v3047_v19 }
 0x1f5   :  { %v2511_v32 = vshll.u32 %v4544_v8, %v2496_v30  ;;  %v2512_v62 = vshrl.u32 %v4545_v11, %v2497_v44  ;;  %v5834_v33 = vand.u32 8388607, %v3102_v28  ;;  %v3112_v35 = vadd.s32 1, %v4451_v52 }
 0x1f6   :  { %v3049_v41 = vsub.s32 %v3045_v46, %v3048_v24  ;;  %v3072_v49 = vsel %vm2949_vm3, %v3071_v3, %v3047_v19  ;;  %v2459_v57 = vadd.f32 -0.4999988, %v2458_v51  ;;  %v2466_v37 = vadd.f32 -0.16666654, %v2465_v38 }
 0x1f7   :  { %v3074_v31 = vsel %vm5807_vm2, 0, %v3072_v49  ;;  %v2501_v21 = vor.u32 %v2500_v22, %v2499_v39  ;;  %v2504_v4 = vor.u32 %v2503_v16, %v2502_v45  ;;  %v5839_v46 = vshrl.u32 %v5814_v50, 16 }
 0x1f8   :  { %vm3050_vm4 = vcmp.lt.s32.totalorder %v3049_v41, 0  ;;  %v3051_v60 = vsub.s32 0, %v3049_v41  ;;  %v2507_v43 = vor.u32 %v2506_v6, %v2505_v17  ;;  %v2510_v30 = vor.u32 %v2509_v58, %v2508_v42 }
 0x1f9   :  { %v2513_v55 = vor.u32 %v2512_v62, %v2511_v32  ;;  %v2498_v29 = vshrl.u32 %v4540_v59, %v2497_v44  ;;  %v3110_v1 = vor.u32 8388608, %v5834_v33  ;;  %vm3113_vm5 = vcmp.gt.s32.totalorder %v3112_v35, 0 }
 0x1fa   :  { %v3052_v14 = vsel %vm3050_vm4, %v3051_v60, %v3049_v41  ;;  %v2460_v7 = vmul.f32 %v2459_v57, %v2455_v56  ;;  %v2467_v53 = vmul.f32 %v2466_v37, %v2455_v56  ;;  %v3091_v19 = vadd.s32 3, %v3074_v31 }
 0x1fb   :  { %v3053_v48 = vclz %v3052_v14  ;;  %vm2514_vm6 = vcmp.lt.s32.totalorder %v2495_v25, 1  ;;  %vm2515_vm7 = vcmp.lt.s32.totalorder %v2495_v25, 2  ;;  %vm2516_vm8 = vcmp.lt.s32.totalorder %v2495_v25, 3 }
 0x1fc   :  { %vm2517_vm10 = vcmp.lt.s32.totalorder %v2495_v25, 4  ;;  %v2522_v39 = vsel %vm2514_vm6, %v2501_v21, %v2504_v4  ;;  %v2526_v17 = vsel %vm2514_vm6, %v2504_v4, %v2507_v43  ;;  %v2468_v24 = vadd.f32 1.0, %v2467_v53 }
 0x1fd   :  { %v4449_v52 = vadd.s32 4294967294, %v3053_v48  ;;  %v2523_v45 = vsel %vm2517_vm10, %v2510_v30, 920167782  ;;  %v2527_v42 = vsel %vm2517_vm10, %v2513_v55, 1326507024  ;;  %v5849_v16 = vadd.f32 1.0, %v2460_v7 }
 0x1fe   :  { %v2519_v51 = vsel %vm2517_vm10, %v2507_v43, 2102212464  ;;  %v2524_v44 = vsel %vm2516_vm8, %v2507_v43, %v2523_v45  ;;  %v2528_v38 = vsel %vm2516_vm8, %v2510_v30, %v2527_v42  ;;  %v2518_v49 = vsel %vm2514_vm6, %v2498_v29, %v2501_v21 }
 0x1ff   :  { %vm4450_vm13 = vcmp.lt.s32.totalorder %v4449_v52, 0  ;;  %v2525_v3 = vsel %vm2515_vm7, %v2522_v39, %v2524_v44  ;;  %v2529_v22 = vsel %vm2515_vm7, %v2526_v17, %v2528_v38  ;;  %v2520_v32 = vsel %vm2516_vm8, %v2504_v4, %v2519_v51 }
 0x200   :  { %v3056_v56 = vsel %vm4450_vm13, 0, %v4449_v52  ;;  %v2533_v62 = vand.u32 65535, %v2529_v22  ;;  %v2534_v57 = vshrl.u32 %v2529_v22, 16  ;;  %v2556_v37 = vshrl.u32 %v2525_v3, 16 }
 0x201   :  { %v3057_v6 = vsub.s32 32, %v3056_v56  ;;  %v3061_v58 = vsub.s32 4294967266, %v3056_v56  ;;  %v3058_v60 = vshll.u32 %v3049_v41, %v3056_v56  ;;  %v2555_v43 = vand.u32 65535, %v2525_v3 }
 0x202   :  { %v5855_v30 = vmul.f32 %v2468_v24, %v5798_v26  ;;  %v5857_v55 = vand.u32 3, %v3091_v19  ;;  %v2536_v48 = vmul.u32 %v2534_v57, %v5830_v63  ;;  %v2537_v7 = vmul.u32 %v2533_v62, %v5839_v46 }
 0x203   :  { %v3059_v31 = vshrl.u32 %v5812_v9, %v3057_v6  ;;  %v3062_v14 = vadd.s32 127, %v3061_v58  ;;  %v5862_v4 = vsel %vm2515_vm7, %v2518_v49, %v2520_v32  ;;  %v2558_v41 = vmul.u32 %v2556_v37, %v5830_v63 }
 0x204   :  { %v2535_v9 = vmul.u32 %v2533_v62, %v5830_v63  ;;  %v2538_v53 = vmul.u32 %v2534_v57, %v5839_v46  ;;  %v2539_v52 = vshll.u32 %v2536_v48, 16  ;;  %v3114_v26 = vsel %vm3113_vm5, %v3112_v35, 0 }
 0x205   :  { %v3060_v21 = vor.u32 %v3059_v31, %v3058_v60  ;;  %v3063_v29 = vshll.u32 %v3062_v14, 23  ;;  %v2541_v39 = vshll.u32 %v2537_v7, 16  ;;  %v2557_v45 = vmul.u32 %v2555_v43, %v5830_v63 }
 0x206   :  { %v2559_v17 = vmul.u32 %v2555_v43, %v5839_v46  ;;  %vm2543_vm14 = vc.u32 %v2535_v9, %v2539_v52  ;;  %v2545_v25 = vadd.s32 %v2539_v52, %v2535_v9  ;;  %v2561_v51 = vshll.u32 %v2558_v41, 16 }
 0x207   :  { %v3064_v19 = vor.u32 4788187, %v3063_v29  ;;  %v3067_v42 = vcvt.s32.f32 %v3060_v21  ;;  %v2544_v38 = vsel %vm2543_vm14, 1, %v4539_v0  ;;  %v2560_v24 = vmul.u32 %v2556_v37, %v5839_v46 }
 0x208   :  { %v2563_v56 = vshll.u32 %v2559_v17, 16  ;;  %v2546_v3 = vadd.s32 %v2544_v38, %v2538_v53  ;;  %vm2547_vm15 = vc.u32 %v2545_v25, %v2541_v39  ;;  %vm2565_vm11 = vc.u32 %v2557_v45, %v2561_v51 }
 0x209   :  { %v3065_v44 = vand.u32 2147483647, %v3064_v19  ;;  %v2567_v35 = vadd.s32 %v2561_v51, %v2557_v45  ;;  %v2540_v6 = vshrl.u32 %v2536_v48, 16  ;;  %v2548_v63 = vsel %vm2547_vm15, 1, %v4539_v0 }
 0x20a   :  { %v2566_v58 = vsel %vm2565_vm11, 1, %v4539_v0  ;;  %v2550_v49 = vadd.s32 %v2548_v63, %v2546_v3  ;;  %v5874_v62 = vshrl.u32 %v3114_v26, 5  ;;  %v2575_v46 = vmul.u32 %v5814_v50, %v5862_v4 }
 0x20b   :  { %v3068_v22 = vmul.f32 %v3067_v42, %v3065_v44  ;;  %v2568_v32 = vadd.s32 %v2566_v58, %v2560_v24  ;;  %vm2569_vm12 = vc.u32 %v2567_v35, %v2563_v56  ;;  %v3116_v37 = vand.u32 31, %v3114_v26 }
 0x20c   :  { %v2570_v60 = vsel %vm2569_vm12, 1, %v4539_v0  ;;  %v2542_v31 = vshrl.u32 %v2537_v7, 16  ;;  %v2551_v14 = vadd.s32 %v2550_v49, %v2540_v6  ;;  %v2562_v43 = vshrl.u32 %v2558_v41, 16 }
 0x20d   :  { %v3069_v57 = vxor.u32 2147483648, %v3068_v22  ;;  %v2572_v48 = vadd.s32 %v2570_v60, %v2568_v32  ;;  %v2564_v29 = vshrl.u32 %v2559_v17, 16  ;;  %v5881_v9 = vadd.s32 %v2567_v35, %v2563_v56 }
 0x20e   :  { %v5883_v53 = vsub.s32 32, %v3116_v37  ;;  %v5890_v19 = vadd.s32 %v2551_v14, %v2542_v31  ;;  %vm3134_vm0 = vcmp.lt.s32.totalorder %v5874_v62, 1  ;;  %v3119_v4 = vshll.u32 %v4540_v59, %v3116_v37 }
 0x20f   :  { %v3070_v21 = vsel %vm2949_vm3, %v3069_v57, %v3068_v22  ;;  %v2573_v50 = vadd.s32 %v2572_v48, %v2562_v43  ;;  %v3122_v47 = vshll.u32 %v4541_v61, %v3116_v37  ;;  %v3125_v45 = vshll.u32 %v4542_v2, %v3116_v37 }
 0x210   :  { %v5888_v52 = vsel %vm5807_vm2, %v5571_v34, %v3070_v21  ;;  %v3120_v41 = vshrl.u32 %v4541_v61, %v5883_v53  ;;  %v3123_v26 = vshrl.u32 %v4542_v2, %v5883_v53  ;;  %v3126_v17 = vshrl.u32 %v4543_v5, %v5883_v53 }
 0x211   :  { %v3075_v7 = vmul.f32 %v5888_v52, %v5888_v52  ;;  %v2574_v39 = vadd.s32 %v2573_v50, %v2564_v29  ;;  %vm2577_vm1 = vc.u32 %v5890_v19, %v5881_v9  ;;  %v3128_v24 = vshll.u32 %v4543_v5, %v3116_v37 }
 0x212   :  { %v5906_v51 = vor.u32 %v3120_v41, %v3119_v4  ;;  %v5908_v38 = vor.u32 %v3123_v26, %v3122_v47  ;;  %v3129_v56 = vshrl.u32 %v4544_v8, %v5883_v53  ;;  %v3131_v22 = vshll.u32 %v4544_v8, %v3116_v37 }
 0x213   :  { %v3076_v42 = vmul.f32 -0.001358992, %v3075_v7  ;;  %v3083_v25 = vmul.f32 -0.00019511016, %v3075_v7  ;;  %v2578_v44 = vadd.s32 1, %v2574_v39  ;;  %v3132_v6 = vshrl.u32 %v4545_v11, %v5883_v53 }
 0x214   :  { %v5916_v58 = vor.u32 %v3126_v17, %v3125_v45  ;;  %v3130_v49 = vor.u32 %v3129_v56, %v3128_v24  ;;  %vm3137_vm2 = vcmp.lt.s32.totalorder %v5874_v62, 4  ;;  %vm2473_vm3 = vcmp.lt.s32.totalorder %v5803_v15, 2 }
 0x215   :  { %v3077_v3 = vadd.f32 0.041655596, %v3076_v42  ;;  %v3084_v35 = vadd.f32 0.008332121, %v3083_v25  ;;  %v2579_v63 = vsel %vm2577_vm1, %v2578_v44, %v2574_v39  ;;  %v3133_v31 = vor.u32 %v3132_v6, %v3131_v22 }
 0x216   :  { %v2580_v60 = vadd.s32 %v2579_v63, %v2575_v46  ;;  %v2475_v14 = vxor.u32 2147483648, %v5855_v30  ;;  %v2478_v43 = vxor.u32 2147483648, %v5849_v16  ;;  %v3142_v37 = vsel %vm3134_vm0, %v5906_v51, %v5908_v38 }
 0x217   :  { %v3078_v32 = vmul.f32 %v3077_v3, %v3075_v7  ;;  %v3085_v57 = vmul.f32 %v3084_v35, %v3075_v7  ;;  %v3143_v48 = vsel %vm3137_vm2, %v3130_v49, 920167782  ;;  %vm3136_vm4 = vcmp.lt.s32.totalorder %v5874_v62, 3 }
 0x218   :  { %v2581_v50 = vadd.s32 536870912, %v2580_v60  ;;  %vm3135_vm5 = vcmp.lt.s32.totalorder %v5874_v62, 2  ;;  %v3144_v46 = vsel %vm3136_vm4, %v5916_v58, %v3143_v48  ;;  %v3146_v4 = vsel %vm3134_vm0, %v5908_v38, %v5916_v58 }
 0x219   :  { %v3079_v21 = vadd.f32 -0.4999988, %v3078_v32  ;;  %v3086_v29 = vadd.f32 -0.16666654, %v3085_v57  ;;  %v3147_v41 = vsel %vm3137_vm2, %v3133_v31, 1326507024  ;;  %vm2470_vm6 = vweird.f32 %v5527_v23 }
 0x21a   :  { %v5940_v47 = vshrl.u32 %v2581_v50, 30  ;;  %v3145_v45 = vsel %vm3135_vm5, %v3142_v37, %v3144_v46  ;;  %vm2474_vm7 = vcmp.eq.s32.totalorder %v5803_v15, 0  ;;  %vm2477_vm8 = vcmp.eq.s32.totalorder %v5803_v15, 2 }
 0x21b   :  { %v3080_v26 = vmul.f32 %v3079_v21, %v3075_v7  ;;  %v3087_v39 = vmul.f32 %v3086_v29, %v3075_v7  ;;  %vm3090_vm10 = vweird.f32 %v5571_v34  ;;  %v3148_v17 = vsel %vm3136_vm4, %v3130_v49, %v3147_v41 }
 0x21c   :  { %v5951_v42 = vshll.u32 %v3110_v1, 8  ;;  %v2476_v7 = vsel %vm2474_vm7, %v5849_v16, %v2475_v14  ;;  %v2583_v24 = vshll.u32 %v5940_v47, 30  ;;  %vm3093_vm13 = vcmp.lt.s32.totalorder %v5857_v55, 2 }
 0x21d   :  { %v3081_v25 = vadd.f32 1.0, %v3080_v26  ;;  %v3088_v44 = vadd.f32 1.0, %v3087_v39  ;;  %vm3094_vm14 = vcmp.eq.s32.totalorder %v5857_v55, 0  ;;  %v3149_v56 = vsel %vm3135_vm5, %v3146_v4, %v3148_v17 }
 0x21e   :  { %v3176_v3 = vshrl.u32 %v3145_v45, 16  ;;  %v2479_v35 = vsel %vm2477_vm8, %v2478_v43, %v5855_v30  ;;  %v2584_v22 = vsub.s32 %v2580_v60, %v2583_v24  ;;  %v3151_v6 = vand.u32 65535, %v5951_v42 }
 0x21f   :  { %v3089_v33 = vmul.f32 %v3088_v44, %v5888_v52  ;;  %v3098_v1 = vxor.u32 2147483648, %v3081_v25  ;;  %v2480_v16 = vsel %vm2473_vm3, %v2476_v7, %v2479_v35  ;;  %v3153_v63 = vand.u32 65535, %v3149_v56 }
 0x220   :  { %v3154_v49 = vshrl.u32 %v3149_v56, 16  ;;  %vm2585_vm15 = vcmp.lt.s32.totalorder %v2584_v22, 0  ;;  %v2586_v57 = vsub.s32 0, %v2584_v22  ;;  %v3152_v31 = vshrl.u32 %v5951_v42, 16 }
 0x221   :  { %v3095_v32 = vxor.u32 2147483648, %v3089_v33  ;;  %vm3097_vm11 = vcmp.eq.s32.totalorder %v5857_v55, 2  ;;  %v3175_v30 = vand.u32 65535, %v3145_v45  ;;  %v3178_v43 = vmul.u32 %v3176_v3, %v3151_v6 }
 0x222   :  { %v3156_v14 = vmul.u32 %v3154_v49, %v3151_v6  ;;  %v3099_v60 = vsel %vm3097_vm11, %v3098_v1, %v3089_v33  ;;  %v2587_v15 = vsel %vm2585_vm15, %v2586_v57, %v2584_v22  ;;  %v3157_v37 = vmul.u32 %v3153_v63, %v3152_v31 }
 0x223   :  { %v3096_v52 = vsel %vm3094_vm14, %v3081_v25, %v3095_v32  ;;  %v2481_v48 = vsel %vm2470_vm6, nan, %v2480_v16  ;;  %v2588_v29 = vclz %v2587_v15  ;;  %v2576_v4 = vadd.s32 %v5881_v9, %v5890_v19 }
 0x224   :  { %v3100_v21 = vsel %vm3093_vm13, %v3096_v52, %v3099_v60  ;;  %v3159_v50 = vshll.u32 %v3156_v14, 16  ;;  %v3118_v41 = vshrl.u32 %v4540_v59, %v5883_v53  ;;  %v3155_v26 = vmul.u32 %v3153_v63, %v3151_v6 }
 0x225   :  { %v3101_v46 = vsel %vm3090_vm10, nan, %v3100_v21  ;;  %v4440_v45 = vadd.s32 4294967294, %v2588_v29  ;;  %v3158_v17 = vmul.u32 %v3154_v49, %v3152_v31  ;;  %v3179_v23 = vmul.u32 %v3175_v30, %v3152_v31 }
 0x226   :  { %v3879_v39 = vpack.c.bf16 %v3101_v46, %v2481_v48  ;;  %v3161_v7 = vshll.u32 %v3157_v37, 16  ;;  %vm3163_vm12 = vc.u32 %v3155_v26, %v3159_v50  ;;  %v3165_v55 = vadd.s32 %v3159_v50, %v3155_v26 }
 0x227   :  { %v3181_v25 = vshll.u32 %v3178_v43, 16  ;;  %vm4441_vm1 = vcmp.lt.s32.totalorder %v4440_v45, 0  ;;  %v3139_v34 = vsel %vm3137_vm2, %v5916_v58, 2102212464  ;;  %v3164_v9 = vsel %vm3163_vm12, 1, %v4539_v0 }
 0x228   :  { %3965 = vmatpush.bf16.msra.mxu2 %v3879_v39  ;;  %v3177_v19 = vmul.u32 %v3175_v30, %v3151_v6  ;;  %v2591_v44 = vsel %vm4441_vm1, 0, %v4440_v45  ;;  %v3166_v53 = vadd.s32 %v3164_v9, %v3158_v17  ;;  %vm3167_vm3 = vc.u32 %v3165_v55, %v3161_v7 }
 0x229   :  { %v3180_v24 = vmul.u32 %v3176_v3, %v3152_v31  ;;  %v2592_v56 = vsub.s32 32, %v2591_v44  ;;  %v2596_v35 = vsub.s32 4294967266, %v2591_v44  ;;  %v3160_v33 = vshrl.u32 %v3156_v14, 16  ;;  %v5988_v14 = vld [vmem:[%s7453_s0] sm:$0xff] }
 0x22a   :  { %v3168_v1 = vsel %vm3167_vm3, 1, %v4539_v0  ;;  %v3183_v63 = vshll.u32 %v3179_v23, 16  ;;  %vm3185_vm6 = vc.u32 %v3177_v19, %v3181_v25  ;;  %v3187_v49 = vadd.s32 %v3181_v25, %v3177_v19 }
 0x22b   :  { %v3170_v16 = vadd.s32 %v3168_v1, %v3166_v53  ;;  %v2593_v32 = vshll.u32 %v2584_v22, %v2591_v44  ;;  %v2594_v57 = vshrl.u32 %v2576_v4, %v2592_v56  ;;  %v2597_v52 = vadd.s32 127, %v2596_v35 }
 0x22c   :  { %v3186_v58 = vsel %vm3185_vm6, 1, %v4539_v0  ;;  %v3162_v60 = vshrl.u32 %v3157_v37, 16  ;;  %vm3189_vm2 = vc.u32 %v3187_v49, %v3183_v63  ;;  %v58_v48 = vperm.slane %v5988_v14, 0 }
 0x22d   :  { %v3171_v6 = vadd.s32 %v3170_v16, %v3160_v33  ;;  %v3188_v30 = vadd.s32 %v3186_v58, %v3180_v24  ;;  %v2595_v15 = vor.u32 %v2594_v57, %v2593_v32  ;;  %v2598_v3 = vshll.u32 %v2597_v52, 23 }
 0x22e   :  { %v3190_v31 = vsel %vm3189_vm2, 1, %v4539_v0  ;;  %v3138_v22 = vsel %vm3134_vm0, %v3118_v41, %v5906_v51  ;;  %v3182_v21 = vshrl.u32 %v3178_v43, 16  ;;  %v59_v29 = vperm.slane %v5988_v14, 2 }
 0x22f   :  { %v3192_v37 = vadd.s32 %v3190_v31, %v3188_v30  ;;  %v2599_v50 = vor.u32 4788187, %v2598_v3  ;;  %v3140_v46 = vsel %vm3136_vm4, %v5908_v38, %v3139_v34  ;;  %v5998_v4 = vadd.s32 %v3171_v6, %v3162_v60 }
 0x230   :  { %v6000_v26 = vperm.slane %v58_v48, 0  ;;  %v3184_v39 = vshrl.u32 %v3179_v23, 16  ;;  %v6002_v17 = vperm.slane %v59_v29, 0  ;;  %v2602_v55 = vcvt.s32.f32 %v2595_v15 }
 0x231   :  { %v3193_v45 = vadd.s32 %v3192_v37, %v3182_v21  ;;  %v2600_v7 = vand.u32 2147483647, %v2599_v50  ;;  %v6004_v51 = vadd.s32 %v3187_v49, %v3183_v63  ;;  %v3141_v41 = vsel %vm3135_vm5, %v3138_v22, %v3140_v46 }
 0x232   :  { %v78_v43 = vmul.f32 %v6000_v26, %v4651_v20  ;;  %v79_v38 = vmul.f32 %v6002_v17, %v4651_v20  ;;  %v2606_v53 = vsub.s32 4, %v5940_v47  ;;  %v3195_v62 = vmul.u32 %v5951_v42, %v3141_v41 }
 0x233   :  { %v3194_v25 = vadd.s32 %v3193_v45, %v3184_v39  ;;  %v2603_v34 = vmul.f32 %v2602_v55, %v2600_v7  ;;  %vm3197_vm0 = vc.u32 %v5998_v4, %v6004_v51  ;;  %vm2484_vm4 = vcmp.lt.s32.totalorder %v5766_v54, 0 }
 0x234   :  { %v6015_v23 = vadd.f32 %v4664_v27, %v78_v43  ;;  %v6018_v19 = vadd.f32 %v4664_v27, %v79_v38  ;;  %vm6027_vm5 = vcmp.le.f32.partialorder %v2482_v13, 0.7853982  ;;  %v2607_v32 = vsel %vm2484_vm4, %v2606_v53, %v5940_v47 }
 0x235   :  { %v3198_v9 = vadd.s32 1, %v3194_v25  ;;  %v2604_v44 = vxor.u32 2147483648, %v2603_v34  ;;  %v2609_v31 = vsel %vm6027_vm5, 0, %v2607_v32  ;;  %vm3104_vm7 = vcmp.lt.s32.totalorder %v5785_v10, 0 }
 0x236   :  { %v1352_v24 = vand.u32 2139095040, %v6015_v23  ;;  %v1349_v35 = vand.u32 2147483647, %v6015_v23  ;;  %v1507_v49 = vand.u32 2139095040, %v6018_v19  ;;  %v1504_v48 = vand.u32 2147483647, %v6018_v19 }
 0x237   :  { %v3199_v56 = vsel %vm3197_vm0, %v3198_v9, %v3194_v25  ;;  %v2605_v1 = vsel %vm2484_vm4, %v2604_v44, %v2603_v34  ;;  %v2626_v45 = vadd.s32 3, %v2609_v31  ;;  %vm6050_vm13 = vcmp.le.f32.partialorder %v3102_v28, 0.7853982 }
 0x238   :  { %v3200_v16 = vadd.s32 %v3199_v56, %v3195_v62  ;;  %v1353_v63 = vshrl.u32 %v1352_v24, 23  ;;  %v2608_v42 = vsel %vm6027_vm5, %v5766_v54, %v2605_v1  ;;  %v1356_v13 = vand.u32 8388607, %v1349_v35 }
 0x239   :  { %v2610_v57 = vmul.f32 %v2608_v42, %v2608_v42  ;;  %v1508_v60 = vshrl.u32 %v1507_v49, 23  ;;  %v6046_v41 = vand.u32 8388607, %v1504_v48  ;;  %v6058_v32 = vand.u32 3, %v2626_v45 }
 0x23a   :  { %v3201_v52 = vadd.s32 536870912, %v3200_v16  ;;  %v4418_v58 = vadd.s32 4294967169, %v1353_v63  ;;  %v1357_v50 = vor.u32 8388608, %v1356_v13  ;;  %v3196_v28 = vadd.s32 %v6004_v51, %v5998_v4 }
 0x23b   :  { %v2611_v6 = vmul.f32 -0.001358992, %v2610_v57  ;;  %v2618_v30 = vmul.f32 -0.00019511016, %v2610_v57  ;;  %v4421_v22 = vadd.s32 4294967169, %v1508_v60  ;;  %vm2629_vm11 = vcmp.eq.s32.totalorder %v6058_v32, 0 }
 0x23c   :  { %v3202_v15 = vshrl.u32 %v3201_v52, 30  ;;  %v1359_v3 = vadd.s32 1, %v4418_v58  ;;  %v6054_v62 = vshll.u32 %v1357_v50, 8  ;;  %v1512_v52 = vor.u32 8388608, %v6046_v41 }
 0x23d   :  { %v2612_v21 = vadd.f32 0.041655596, %v2611_v6  ;;  %v2619_v37 = vadd.f32 0.008332121, %v2618_v30  ;;  %v1514_v25 = vadd.s32 1, %v4421_v22 }
 0x23e   :  { %v3203_v47 = vshll.u32 %v3202_v15, 30  ;;  %v3226_v29 = vsub.s32 4, %v3202_v15  ;;  %vm1360_vm8 = vcmp.gt.s32.totalorder %v1359_v3, 0  ;;  %v6064_v60 = vand.u32 65535, %v6054_v62 }
 0x23f   :  { %v2613_v46 = vmul.f32 %v2612_v21, %v2610_v57  ;;  %v2620_v39 = vmul.f32 %v2619_v37, %v2610_v57  ;;  %v1361_v43 = vsel %vm1360_vm8, %v1359_v3, 0  ;;  %vm1515_vm14 = vcmp.gt.s32.totalorder %v1514_v25, 0 }
 0x240   :  { %v3204_v7 = vsub.s32 %v3200_v16, %v3203_v47  ;;  %v3227_v55 = vsel %vm3104_vm7, %v3226_v29, %v3202_v15  ;;  %v1363_v53 = vand.u32 31, %v1361_v43  ;;  %v6067_v6 = vshrl.u32 %v6054_v62, 16 }
 0x241   :  { %v2614_v38 = vadd.f32 -0.4999988, %v2613_v46  ;;  %v2621_v34 = vadd.f32 -0.16666654, %v2620_v39  ;;  %v3229_v33 = vsel %vm6050_vm13, 0, %v3227_v55  ;;  %v1516_v3 = vsel %vm1515_vm14, %v1514_v25, 0 }
 0x242   :  { %vm3205_vm10 = vcmp.lt.s32.totalorder %v3204_v7, 0  ;;  %v3206_v9 = vsub.s32 0, %v3204_v7  ;;  %v1364_v63 = vsub.s32 32, %v1363_v53  ;;  %v3246_v13 = vadd.s32 3, %v3229_v33 }
 0x243   :  { %v2622_v24 = vmul.f32 %v2621_v34, %v2610_v57  ;;  %v2615_v1 = vmul.f32 %v2614_v38, %v2610_v57  ;;  %v1362_v57 = vshrl.u32 %v1361_v43, 5  ;;  %v1366_v30 = vshll.u32 %v4540_v59, %v1363_v53 }
 0x244   :  { %v3207_v56 = vsel %vm3205_vm10, %v3206_v9, %v3204_v7  ;;  %v1367_v15 = vshrl.u32 %v4541_v61, %v1364_v63  ;;  %v1370_v4 = vshrl.u32 %v4542_v2, %v1364_v63  ;;  %v1373_v51 = vshrl.u32 %v4543_v5, %v1364_v63 }
 0x245   :  { %v3208_v16 = vclz %v3207_v56  ;;  %v2623_v49 = vadd.f32 1.0, %v2622_v24  ;;  %v6071_v31 = vadd.f32 1.0, %v2615_v1  ;;  %v1369_v37 = vshll.u32 %v4541_v61, %v1363_v53 }
 0x246   :  { %v1372_v47 = vshll.u32 %v4542_v2, %v1363_v53  ;;  %v1368_v46 = vor.u32 %v1367_v15, %v1366_v30  ;;  %v1375_v39 = vshll.u32 %v4543_v5, %v1363_v53  ;;  %v1376_v25 = vshrl.u32 %v4544_v8, %v1364_v63 }
 0x247   :  { %v4452_v58 = vadd.s32 4294967294, %v3208_v16  ;;  %v6075_v22 = vmul.f32 %v2623_v49, %v2608_v42  ;;  %v1371_v55 = vor.u32 %v1370_v4, %v1369_v37  ;;  %v1378_v34 = vshll.u32 %v4544_v8, %v1363_v53 }
 0x248   :  { %v1374_v43 = vor.u32 %v1373_v51, %v1372_v47  ;;  %v1379_v9 = vshrl.u32 %v4545_v11, %v1364_v63  ;;  %v1365_v56 = vshrl.u32 %v4540_v59, %v1364_v63  ;;  %v1377_v33 = vor.u32 %v1376_v25, %v1375_v39 }
 0x249   :  { %vm4453_vm15 = vcmp.lt.s32.totalorder %v4452_v58, 0  ;;  %v2630_v24 = vxor.u32 2147483648, %v6075_v22  ;;  %vm1381_vm12 = vcmp.lt.s32.totalorder %v1362_v57, 1  ;;  %vm1382_vm1 = vcmp.lt.s32.totalorder %v1362_v57, 2 }
 0x24a   :  { %v3211_v21 = vsel %vm4453_vm15, 0, %v4452_v58  ;;  %v1380_v16 = vor.u32 %v1379_v9, %v1378_v34  ;;  %vm1383_vm3 = vcmp.lt.s32.totalorder %v1362_v57, 3  ;;  %vm1384_vm6 = vcmp.lt.s32.totalorder %v1362_v57, 4 }
 0x24b   :  { %v3212_v29 = vsub.s32 32, %v3211_v21  ;;  %v3216_v50 = vsub.s32 4294967266, %v3211_v21  ;;  %v3213_v45 = vshll.u32 %v3204_v7, %v3211_v21  ;;  %v1385_v49 = vsel %vm1381_vm12, %v1365_v56, %v1368_v46 }
 0x24c   :  { %v1389_v58 = vsel %vm1381_vm12, %v1368_v46, %v1371_v55  ;;  %v1386_v30 = vsel %vm1384_vm6, %v1374_v43, 2102212464  ;;  %v1390_v15 = vsel %vm1384_vm6, %v1377_v33, 920167782  ;;  %v1393_v53 = vsel %vm1381_vm12, %v1371_v55, %v1374_v43 }
 0x24d   :  { %v3214_v38 = vshrl.u32 %v3196_v28, %v3212_v29  ;;  %v3217_v42 = vadd.s32 127, %v3216_v50  ;;  %v1387_v51 = vsel %vm1383_vm3, %v1371_v55, %v1386_v30  ;;  %v1391_v21 = vsel %vm1383_vm3, %v1374_v43, %v1390_v15 }
 0x24e   :  { %v1394_v37 = vsel %vm1384_vm6, %v1380_v16, 1326507024  ;;  %v1392_v63 = vsel %vm1382_vm1, %v1389_v58, %v1391_v21  ;;  %v6087_v50 = vand.u32 31, %v1516_v3  ;;  %v6097_v55 = vsel %vm2629_vm11, %v6071_v31, %v2630_v24 }
 0x24f   :  { %v3215_v1 = vor.u32 %v3214_v38, %v3213_v45  ;;  %v3218_v7 = vshll.u32 %v3217_v42, 23  ;;  %v1395_v29 = vsel %vm1383_vm3, %v1377_v33, %v1394_v37  ;;  %v1422_v45 = vand.u32 65535, %v1392_v63 }
 0x250   :  { %v1396_v39 = vsel %vm1382_vm1, %v1393_v53, %v1395_v29  ;;  %v1423_v25 = vshrl.u32 %v1392_v63, 16  ;;  %v6090_v38 = vshrl.u32 %v1516_v3, 5  ;;  %v6092_v42 = vand.u32 3, %v3246_v13 }
 0x251   :  { %v3219_v28 = vor.u32 4788187, %v3218_v7  ;;  %v3222_v4 = vcvt.s32.f32 %v3215_v1  ;;  %v1400_v34 = vand.u32 65535, %v1396_v39  ;;  %v1401_v9 = vshrl.u32 %v1396_v39, 16 }
 0x252   :  { %v2633_v43 = vxor.u32 2147483648, %v6071_v31  ;;  %v6101_v56 = vsel %vm1382_vm1, %v1385_v49, %v1387_v51  ;;  %v1425_v33 = vmul.u32 %v1423_v25, %v6064_v60  ;;  %v6107_v7 = vsub.s32 32, %v6087_v50 }
 0x253   :  { %v3220_v47 = vand.u32 2147483647, %v3219_v28  ;;  %v1403_v3 = vmul.u32 %v1401_v9, %v6064_v60  ;;  %v1404_v13 = vmul.u32 %v1400_v34, %v6067_v6  ;;  %v1424_v16 = vmul.u32 %v1422_v45, %v6064_v60 }
 0x254   :  { %v1426_v24 = vmul.u32 %v1422_v45, %v6067_v6  ;;  %v1427_v58 = vmul.u32 %v1423_v25, %v6067_v6  ;;  %v1428_v28 = vshll.u32 %v1425_v33, 16  ;;  %v1402_v49 = vmul.u32 %v1400_v34, %v6064_v60 }
 0x255   :  { %v3223_v46 = vmul.f32 %v3222_v4, %v3220_v47  ;;  %v1405_v30 = vmul.u32 %v1401_v9, %v6067_v6  ;;  %v1406_v15 = vshll.u32 %v1403_v3, 16  ;;  %v1408_v4 = vshll.u32 %v1404_v13, 16 }
 0x256   :  { %v1429_v51 = vshrl.u32 %v1425_v33, 16  ;;  %vm1432_vm2 = vc.u32 %v1424_v16, %v1428_v28  ;;  %v1430_v63 = vshll.u32 %v1426_v24, 16  ;;  %v1434_v6 = vadd.s32 %v1428_v28, %v1424_v16 }
 0x257   :  { %v3224_v1 = vxor.u32 2147483648, %v3223_v46  ;;  %vm1410_vm0 = vc.u32 %v1402_v49, %v1406_v15  ;;  %v1412_v37 = vadd.s32 %v1406_v15, %v1402_v49  ;;  %v1433_v47 = vsel %vm1432_vm2, 1, %v4539_v0 }
 0x258   :  { %v1411_v60 = vsel %vm1410_vm0, 1, %v4539_v0  ;;  %v1435_v29 = vadd.s32 %v1433_v47, %v1427_v58  ;;  %v1407_v25 = vshrl.u32 %v1403_v3, 16  ;;  %vm1436_vm5 = vc.u32 %v1434_v6, %v1430_v63 }
 0x259   :  { %v3225_v57 = vsel %vm3104_vm7, %v3224_v1, %v3223_v46  ;;  %v1413_v44 = vadd.s32 %v1411_v60, %v1405_v30  ;;  %vm1414_vm4 = vc.u32 %v1412_v37, %v1408_v4  ;;  %v1409_v46 = vshrl.u32 %v1404_v13, 16 }
 0x25a   :  { %v6119_v53 = vsel %vm6050_vm13, %v5785_v10, %v3225_v57  ;;  %v1415_v34 = vsel %vm1414_vm4, 1, %v4539_v0  ;;  %vm2632_vm7 = vcmp.eq.s32.totalorder %v6058_v32, 2  ;;  %v1437_v57 = vsel %vm1436_vm5, 1, %v4539_v0 }
 0x25b   :  { %v3230_v21 = vmul.f32 %v6119_v53, %v6119_v53  ;;  %v1417_v1 = vadd.s32 %v1415_v34, %v1413_v44  ;;  %v1431_v49 = vshrl.u32 %v1426_v24, 16  ;;  %v6128_v15 = vadd.s32 %v1434_v6, %v1430_v63 }
 0x25c   :  { %v1439_v16 = vadd.s32 %v1437_v57, %v1435_v29  ;;  %v1522_v58 = vshrl.u32 %v4541_v61, %v6107_v7  ;;  %vm2628_vm8 = vcmp.lt.s32.totalorder %v6058_v32, 2  ;;  %v1525_v30 = vshrl.u32 %v4542_v2, %v6107_v7 }
 0x25d   :  { %v3231_v39 = vmul.f32 -0.001358992, %v3230_v21  ;;  %v3238_v45 = vmul.f32 -0.00019511016, %v3230_v21  ;;  %v1418_v28 = vadd.s32 %v1417_v1, %v1407_v25  ;;  %v1521_v37 = vshll.u32 %v4540_v59, %v6087_v50 }
 0x25e   :  { %v1440_v4 = vadd.s32 %v1439_v16, %v1429_v51  ;;  %v1524_v24 = vshll.u32 %v4541_v61, %v6087_v50  ;;  %v1527_v47 = vshll.u32 %v4542_v2, %v6087_v50  ;;  %vm3252_vm10 = vcmp.eq.s32.totalorder %v6092_v42, 2 }
 0x25f   :  { %v3232_v9 = vadd.f32 0.041655596, %v3231_v39  ;;  %v3239_v33 = vadd.f32 0.008332121, %v3238_v45  ;;  %v6142_v6 = vadd.s32 %v1418_v28, %v1409_v46  ;;  %v1528_v29 = vshrl.u32 %v4543_v5, %v6107_v7 }
 0x260   :  { %vm3249_vm13 = vcmp.eq.s32.totalorder %v6092_v42, 0  ;;  %v1441_v51 = vadd.s32 %v1440_v4, %v1431_v49  ;;  %v6147_v39 = vor.u32 %v1522_v58, %v1521_v37  ;;  %v1530_v45 = vshll.u32 %v4543_v5, %v6087_v50 }
 0x261   :  { %v3233_v3 = vmul.f32 %v3232_v9, %v3230_v21  ;;  %v3240_v13 = vmul.f32 %v3239_v33, %v3230_v21  ;;  %v1531_v44 = vshrl.u32 %v4544_v8, %v6107_v7  ;;  %vm2625_vm14 = vweird.f32 %v5766_v54 }
 0x262   :  { %vm3248_vm15 = vcmp.lt.s32.totalorder %v6092_v42, 2  ;;  %vm1444_vm11 = vc.u32 %v6142_v6, %v6128_v15  ;;  %v6157_v46 = vor.u32 %v1525_v30, %v1524_v24  ;;  %v1445_v9 = vadd.s32 1, %v1441_v51 }
 0x263   :  { %v3234_v60 = vadd.f32 -0.4999988, %v3233_v3  ;;  %v3241_v63 = vadd.f32 -0.16666654, %v3240_v13  ;;  %v1532_v33 = vor.u32 %v1531_v44, %v1530_v45  ;;  %v1533_v1 = vshll.u32 %v4544_v8, %v6087_v50 }
 0x264   :  { %v1534_v57 = vshrl.u32 %v4545_v11, %v6107_v7  ;;  %v1529_v58 = vor.u32 %v1528_v29, %v1527_v47  ;;  %v2634_v3 = vsel %vm2632_vm7, %v2633_v43, %v6075_v22  ;;  %v1446_v13 = vsel %vm1444_vm11, %v1445_v9, %v1441_v51 }
 0x265   :  { %v3235_v25 = vmul.f32 %v3234_v60, %v3230_v21  ;;  %v3242_v34 = vmul.f32 %v3241_v63, %v3230_v21  ;;  %v1442_v21 = vmul.u32 %v6054_v62, %v6101_v56  ;;  %vm1536_vm12 = vcmp.lt.s32.totalorder %v6090_v38, 1 }
 0x266   :  { %v1535_v28 = vor.u32 %v1534_v57, %v1533_v1  ;;  %vm1539_vm1 = vcmp.lt.s32.totalorder %v6090_v38, 4  ;;  %v2635_v62 = vsel %vm2628_vm8, %v6097_v55, %v2634_v3  ;;  %vm1537_vm3 = vcmp.lt.s32.totalorder %v6090_v38, 2 }
 0x267   :  { %v3236_v49 = vadd.f32 1.0, %v3235_v25  ;;  %v3243_v16 = vadd.f32 1.0, %v3242_v34  ;;  %v1447_v4 = vadd.s32 %v1446_v13, %v1442_v21  ;;  %v1544_v31 = vsel %vm1536_vm12, %v6147_v39, %v6157_v46 }
 0x268   :  { %v1545_v22 = vsel %vm1539_vm1, %v1532_v33, 920167782  ;;  %vm1538_vm6 = vcmp.lt.s32.totalorder %v6090_v38, 3  ;;  %v1549_v37 = vsel %vm1539_vm1, %v1535_v28, 1326507024  ;;  %v6195_v24 = vshll.u32 %v1512_v52, 8 }
 0x269   :  { %v3244_v50 = vmul.f32 %v3243_v16, %v6119_v53  ;;  %v3253_v30 = vxor.u32 2147483648, %v3236_v49  ;;  %v1448_v56 = vadd.s32 536870912, %v1447_v4  ;;  %v1548_v53 = vsel %vm1536_vm12, %v6157_v46, %v1529_v58 }
 0x26a   :  { %v1546_v55 = vsel %vm1538_vm6, %v1529_v58, %v1545_v22  ;;  %v1550_v29 = vsel %vm1538_vm6, %v1532_v33, %v1549_v37  ;;  %v2636_v51 = vsel %vm2625_vm14, nan, %v2635_v62  ;;  %vm3245_vm2 = vweird.f32 %v5785_v10 }
 0x26b   :  { %v3250_v43 = vxor.u32 2147483648, %v3244_v50  ;;  %v3254_v32 = vsel %vm3252_vm10, %v3253_v30, %v3244_v50  ;;  %v6199_v60 = vshrl.u32 %v1448_v56, 30  ;;  %v1547_v63 = vsel %vm1537_vm3, %v1544_v31, %v1546_v55 }
 0x26c   :  { %v1551_v52 = vsel %vm1537_vm3, %v1548_v53, %v1550_v29  ;;  %v1554_v25 = vshrl.u32 %v6195_v24, 16  ;;  %v1553_v33 = vand.u32 65535, %v6195_v24  ;;  %v1578_v54 = vshrl.u32 %v1547_v63, 16 }
 0x26d   :  { %v3251_v47 = vsel %vm3249_vm13, %v3236_v49, %v3250_v43  ;;  %v1450_v44 = vshll.u32 %v6199_v60, 30  ;;  %v1555_v34 = vand.u32 65535, %v1551_v52  ;;  %v1556_v1 = vshrl.u32 %v1551_v52, 16 }
 0x26e   :  { %v3255_v41 = vsel %vm3248_vm15, %v3251_v47, %v3254_v32  ;;  %v60_v42 = vperm.slane %v5988_v14, 4  ;;  %v1520_v21 = vshrl.u32 %v4540_v59, %v6107_v7  ;;  %v1577_v3 = vand.u32 65535, %v1547_v63 }
 0x26f   :  { %v3256_v45 = vsel %vm3245_vm2, nan, %v3255_v41  ;;  %v1451_v57 = vsub.s32 %v1447_v4, %v1450_v44  ;;  %v1559_v49 = vmul.u32 %v1555_v34, %v1554_v25  ;;  %v1558_v10 = vmul.u32 %v1556_v1, %v1553_v33 }
 0x270   :  { %v3880_v9 = vpack.c.bf16 %v3256_v45, %v2636_v51  ;;  %v1443_v13 = vadd.s32 %v6128_v15, %v6142_v6  ;;  %v1557_v28 = vmul.u32 %v1555_v34, %v1553_v33  ;;  %v1580_v30 = vmul.u32 %v1578_v54, %v1553_v33 }
 0x271   :  { %vm1452_vm0 = vcmp.lt.s32.totalorder %v1451_v57, 0  ;;  %v1453_v16 = vsub.s32 0, %v1451_v57  ;;  %v1561_v50 = vshll.u32 %v1558_v10, 16  ;;  %v1541_v4 = vsel %vm1539_vm1, %v1529_v58, 2102212464 }
 0x272   :  { %3984 = vmatpush.bf16.msra.mxu3 %v3880_v9  ;;  %v1560_v31 = vmul.u32 %v1556_v1, %v1554_v25  ;;  %v1563_v22 = vshll.u32 %v1559_v49, 16  ;;  %v1583_v53 = vshll.u32 %v1580_v30, 16  ;;  %v1540_v7 = vsel %vm1536_vm12, %v1520_v21, %v6147_v39 }
 0x273   :  { %v1454_v62 = vsel %vm1452_vm0, %v1453_v16, %v1451_v57  ;;  %vm1565_vm4 = vc.u32 %v1557_v28, %v1561_v50  ;;  %v1567_v56 = vadd.s32 %v1561_v50, %v1557_v28  ;;  %v1579_v15 = vmul.u32 %v1577_v3, %v1553_v33 }
 0x274   :  { %v1455_v43 = vclz %v1454_v62  ;;  %v1566_v32 = vsel %vm1565_vm4, 1, %v4539_v0  ;;  %v1581_v6 = vmul.u32 %v1577_v3, %v1554_v25  ;;  %v1542_v37 = vsel %vm1538_vm6, %v6157_v46, %v1541_v4 }
 0x275   :  { %v1568_v58 = vadd.s32 %v1566_v32, %v1560_v31  ;;  %vm1569_vm5 = vc.u32 %v1567_v56, %v1563_v22  ;;  %v1562_v47 = vshrl.u32 %v1558_v10, 16  ;;  %v1582_v29 = vmul.u32 %v1578_v54, %v1554_v25 }
 0x276   :  { %v4419_v55 = vadd.s32 4294967294, %v1455_v43  ;;  %v1570_v63 = vsel %vm1569_vm5, 1, %v4539_v0  ;;  %vm1587_vm7 = vc.u32 %v1579_v15, %v1583_v53  ;;  %v1589_v41 = vadd.s32 %v1583_v53, %v1579_v15 }
 0x277   :  { %v1572_v51 = vadd.s32 %v1570_v63, %v1568_v58  ;;  %v1588_v39 = vsel %vm1587_vm7, 1, %v4539_v0  ;;  %v1585_v45 = vshll.u32 %v1581_v6, 16  ;;  %v6231_v34 = vperm.slane %v60_v42, 0 }
 0x278   :  { %vm4420_vm8 = vcmp.lt.s32.totalorder %v4419_v55, 0  ;;  %v1590_v44 = vadd.s32 %v1588_v39, %v1582_v29  ;;  %v1473_v46 = vsub.s32 4, %v6199_v60  ;;  %v1564_v10 = vshrl.u32 %v1559_v49, 16 }
 0x279   :  { %v1458_v52 = vsel %vm4420_vm8, 0, %v4419_v55  ;;  %v1573_v1 = vadd.s32 %v1572_v51, %v1562_v47  ;;  %vm1591_vm10 = vc.u32 %v1589_v41, %v1585_v45  ;;  %v80_v25 = vmul.f32 %v6231_v34, %v4651_v20 }
 0x27a   :  { %v1459_v9 = vsub.s32 32, %v1458_v52  ;;  %v1463_v33 = vsub.s32 4294967266, %v1458_v52  ;;  %v61_v54 = vperm.slane %v5988_v14, 6  ;;  %v1460_v16 = vshll.u32 %v1451_v57, %v1458_v52 }
 0x27b   :  { %v1592_v28 = vsel %vm1591_vm10, 1, %v4539_v0  ;;  %v1584_v50 = vshrl.u32 %v1580_v30, 16  ;;  %v6239_v62 = vadd.f32 %v4664_v27, %v80_v25  ;;  %vm1351_vm13 = vcmp.lt.s32.totalorder %v6015_v23, 0 }
 0x27c   :  { %v1461_v21 = vshrl.u32 %v1443_v13, %v1459_v9  ;;  %v1464_v3 = vadd.s32 127, %v1463_v33  ;;  %v1594_v42 = vadd.s32 %v1592_v28, %v1590_v44  ;;  %v6241_v4 = vperm.slane %v61_v54, 0 }
 0x27d   :  { %v1574_v22 = vadd.s32 %v1573_v1, %v1564_v10  ;;  %v1586_v43 = vshrl.u32 %v1581_v6, 16  ;;  %v1659_v14 = vand.u32 2147483647, %v6239_v62  ;;  %v1662_v57 = vand.u32 2139095040, %v6239_v62 }
 0x27e   :  { %v1462_v49 = vor.u32 %v1461_v21, %v1460_v16  ;;  %v1465_v31 = vshll.u32 %v1464_v3, 23  ;;  %v1595_v56 = vadd.s32 %v1594_v42, %v1584_v50  ;;  %v1543_v30 = vsel %vm1537_vm3, %v1540_v7, %v1542_v37 }
 0x27f   :  { %v1593_v53 = vadd.s32 %v1589_v41, %v1585_v45  ;;  %v81_v32 = vmul.f32 %v6241_v4, %v4651_v20  ;;  %v1474_v15 = vsel %vm1351_vm13, %v1473_v46, %v6199_v60  ;;  %v1663_v58 = vshrl.u32 %v1662_v57, 23 }
 0x280   :  { %v1466_v13 = vor.u32 4788187, %v1465_v31  ;;  %v1596_v55 = vadd.s32 %v1595_v56, %v1586_v43  ;;  %v1666_v6 = vand.u32 8388607, %v1659_v14  ;;  %v1469_v63 = vcvt.s32.f32 %v1462_v49 }
 0x281   :  { %vm1599_vm14 = vc.u32 %v1574_v22, %v1593_v53  ;;  %v6256_v29 = vadd.f32 %v4664_v27, %v81_v32  ;;  %v4424_v7 = vadd.s32 4294967169, %v1663_v58  ;;  %vm6260_vm15 = vcmp.le.f32.partialorder %v1349_v35, 0.7853982 }
 0x282   :  { %v1467_v47 = vand.u32 2147483647, %v1466_v13  ;;  %v1600_v38 = vadd.s32 1, %v1596_v55  ;;  %v1597_v37 = vmul.u32 %v6195_v24, %v1543_v30  ;;  %v1476_v39 = vsel %vm6260_vm15, 0, %v1474_v15 }
 0x283   :  { %v1817_v51 = vand.u32 2139095040, %v6256_v29  ;;  %v1667_v52 = vor.u32 8388608, %v1666_v6  ;;  %v1669_v27 = vadd.s32 1, %v4424_v7  ;;  %v1493_v33 = vadd.s32 3, %v1476_v39 }
 0x284   :  { %v1470_v60 = vmul.f32 %v1469_v63, %v1467_v47  ;;  %v1601_v41 = vsel %vm1599_vm14, %v1600_v38, %v1596_v55  ;;  %v1814_v54 = vand.u32 2147483647, %v6256_v29  ;;  %vm1506_vm12 = vcmp.lt.s32.totalorder %v6018_v19, 0 }
 0x285   :  { %v1602_v44 = vadd.s32 %v1601_v41, %v1597_v37  ;;  %vm1670_vm11 = vcmp.gt.s32.totalorder %v1669_v27, 0  ;;  %v1818_v9 = vshrl.u32 %v1817_v51, 23  ;;  %v6273_v25 = vshll.u32 %v1667_v52, 8 }
 0x286   :  { %v1471_v45 = vxor.u32 2147483648, %v1470_v60  ;;  %v1671_v1 = vsel %vm1670_vm11, %v1669_v27, 0  ;;  %v6277_v49 = vand.u32 3, %v1493_v33  ;;  %v1598_v43 = vadd.s32 %v1593_v53, %v1574_v22 }
 0x287   :  { %v1603_v46 = vadd.s32 536870912, %v1602_v44  ;;  %v1673_v10 = vand.u32 31, %v1671_v1  ;;  %v4427_v28 = vadd.s32 4294967169, %v1818_v9  ;;  %v6280_v56 = vand.u32 65535, %v6273_v25 }
 0x288   :  { %v1472_v35 = vsel %vm1351_vm13, %v1471_v45, %v1470_v60  ;;  %v6283_v57 = vshrl.u32 %v6273_v25, 16  ;;  %v6287_v13 = vand.u32 8388607, %v1814_v54  ;;  %v6291_v55 = vshrl.u32 %v1671_v1, 5 }
 0x289   :  { %v1475_v24 = vsel %vm6260_vm15, %v6015_v23, %v1472_v35  ;;  %v1604_v21 = vshrl.u32 %v1603_v46, 30  ;;  %v1674_v3 = vsub.s32 32, %v1673_v10  ;;  %v1676_v6 = vshll.u32 %v4540_v59, %v1673_v10 }
 0x28a   :  { %v1477_v16 = vmul.f32 %v1475_v24, %v1475_v24  ;;  %v6295_v53 = vadd.s32 1, %v4427_v28  ;;  %v1679_v7 = vshll.u32 %v4541_v61, %v1673_v10  ;;  %v1682_v60 = vshll.u32 %v4542_v2, %v1673_v10 }
 0x28b   :  { %v1605_v31 = vshll.u32 %v1604_v21, 30  ;;  %v1628_v58 = vsub.s32 4, %v1604_v21  ;;  %v1677_v22 = vshrl.u32 %v4541_v61, %v1674_v3  ;;  %v1680_v20 = vshrl.u32 %v4542_v2, %v1674_v3 }
 0x28c   :  { %v1478_v50 = vmul.f32 -0.001358992, %v1477_v16  ;;  %v1485_v42 = vmul.f32 -0.00019511016, %v1477_v16  ;;  %v1683_v37 = vshrl.u32 %v4543_v5, %v1674_v3  ;;  %v1686_v52 = vshrl.u32 %v4544_v8, %v1674_v3 }
 0x28d   :  { %v6289_v15 = vsub.s32 %v1602_v44, %v1605_v31  ;;  %vm1496_vm3 = vcmp.eq.s32.totalorder %v6277_v49, 0  ;;  %vm1499_vm6 = vcmp.eq.s32.totalorder %v6277_v49, 2  ;;  %v6309_v45 = vsel %vm1506_vm12, %v1628_v58, %v1604_v21 }
 0x28e   :  { %v1479_v30 = vadd.f32 0.041655596, %v1478_v50  ;;  %v1486_v32 = vadd.f32 0.008332121, %v1485_v42  ;;  %v1675_v44 = vshrl.u32 %v4540_v59, %v1674_v3  ;;  %v1689_v9 = vshrl.u32 %v4545_v11, %v1674_v3 }
 0x28f   :  { %vm1607_vm1 = vcmp.lt.s32.totalorder %v6289_v15, 0  ;;  %v1608_v38 = vsub.s32 0, %v6289_v15  ;;  %vm1495_vm2 = vcmp.lt.s32.totalorder %v6277_v49, 2  ;;  %v1678_v46 = vor.u32 %v1677_v22, %v1676_v6 }
 0x290   :  { %v1480_v47 = vmul.f32 %v1479_v30, %v1477_v16  ;;  %v1487_v63 = vmul.f32 %v1486_v32, %v1477_v16  ;;  %v1685_v1 = vshll.u32 %v4543_v5, %v1673_v10  ;;  %vm1492_vm0 = vweird.f32 %v6015_v23 }
 0x291   :  { %v1609_v41 = vsel %vm1607_vm1, %v1608_v38, %v6289_v15  ;;  %v1681_v50 = vor.u32 %v1680_v20, %v1679_v7  ;;  %v1684_v42 = vor.u32 %v1683_v37, %v1682_v60  ;;  %v1688_v31 = vshll.u32 %v4544_v8, %v1673_v10 }
 0x292   :  { %v1481_v51 = vadd.f32 -0.4999988, %v1480_v47  ;;  %v1488_v39 = vadd.f32 -0.16666654, %v1487_v63  ;;  %v1610_v27 = vclz %v1609_v41  ;;  %vm6319_vm4 = vcmp.le.f32.partialorder %v1504_v48, 0.7853982 }
 0x293   :  { %vm1691_vm5 = vcmp.lt.s32.totalorder %v6291_v55, 1  ;;  %v1690_v32 = vor.u32 %v1689_v9, %v1688_v31  ;;  %vm1692_vm8 = vcmp.lt.s32.totalorder %v6291_v55, 2  ;;  %vm1693_vm10 = vcmp.lt.s32.totalorder %v6291_v55, 3 }
 0x294   :  { %v1482_v35 = vmul.f32 %v1481_v51, %v1477_v16  ;;  %v1489_v33 = vmul.f32 %v1488_v39, %v1477_v16  ;;  %v4422_v28 = vadd.s32 4294967294, %v1610_v27  ;;  %v1687_v16 = vor.u32 %v1686_v52, %v1685_v1 }
 0x295   :  { %vm1694_vm13 = vcmp.lt.s32.totalorder %v6291_v55, 4  ;;  %v1699_v63 = vsel %vm1691_vm5, %v1678_v46, %v1681_v50  ;;  %v1703_v60 = vsel %vm1691_vm5, %v1681_v50, %v1684_v42  ;;  %v1695_v49 = vsel %vm1691_vm5, %v1675_v44, %v1678_v46 }
 0x296   :  { %v1483_v21 = vadd.f32 1.0, %v1482_v35  ;;  %v1490_v30 = vadd.f32 1.0, %v1489_v33  ;;  %vm4423_vm7 = vcmp.lt.s32.totalorder %v4422_v28, 0  ;;  %v1696_v48 = vsel %vm1694_vm13, %v1684_v42, 2102212464 }
 0x297   :  { %v1613_v10 = vsel %vm4423_vm7, 0, %v4422_v28  ;;  %v1700_v20 = vsel %vm1694_vm13, %v1687_v16, 920167782  ;;  %v1704_v39 = vsel %vm1694_vm13, %v1690_v32, 1326507024  ;;  %vm1825_vm15 = vcmp.gt.s32.totalorder %v6295_v53, 0 }
 0x298   :  { %v1491_v58 = vmul.f32 %v1490_v30, %v1475_v24  ;;  %v1500_v6 = vxor.u32 2147483648, %v1483_v21  ;;  %v1614_v22 = vsub.s32 32, %v1613_v10  ;;  %v1618_v47 = vsub.s32 4294967266, %v1613_v10 }
 0x299   :  { %v1615_v7 = vshll.u32 %v6289_v15, %v1613_v10  ;;  %v1701_v24 = vsel %vm1693_vm10, %v1684_v42, %v1700_v20  ;;  %v1705_v15 = vsel %vm1693_vm10, %v1687_v16, %v1704_v39  ;;  %v1631_v16 = vsel %vm6319_vm4, 0, %v6309_v45 }
 0x29a   :  { %v1497_v38 = vxor.u32 2147483648, %v1491_v58  ;;  %v1616_v37 = vshrl.u32 %v1598_v43, %v1614_v22  ;;  %v1619_v51 = vadd.s32 127, %v1618_v47  ;;  %v1501_v52 = vsel %vm1499_vm6, %v1500_v6, %v1491_v58 }
 0x29b   :  { %v1702_v27 = vsel %vm1692_vm8, %v1699_v63, %v1701_v24  ;;  %v1706_v33 = vsel %vm1692_vm8, %v1703_v60, %v1705_v15  ;;  %v1697_v58 = vsel %vm1693_vm10, %v1681_v50, %v1696_v48  ;;  %vm1647_vm6 = vweird.f32 %v6018_v19 }
 0x29c   :  { %v1498_v41 = vsel %vm1496_vm3, %v1483_v21, %v1497_v38  ;;  %v1617_v9 = vor.u32 %v1616_v37, %v1615_v7  ;;  %v1620_v35 = vshll.u32 %v1619_v51, 23  ;;  %v1710_v28 = vand.u32 65535, %v1706_v33 }
 0x29d   :  { %v1502_v43 = vsel %vm1495_vm2, %v1498_v41, %v1501_v52  ;;  %v1711_v42 = vshrl.u32 %v1706_v33, 16  ;;  %v1732_v31 = vand.u32 65535, %v1702_v27  ;;  %v1733_v32 = vshrl.u32 %v1702_v27, 16 }
 0x29e   :  { %v1503_v1 = vsel %vm1492_vm0, nan, %v1502_v43  ;;  %v1621_v30 = vor.u32 4788187, %v1620_v35  ;;  %v1714_v23 = vmul.u32 %v1710_v28, %v6283_v57  ;;  %v1624_v47 = vcvt.s32.f32 %v1617_v9 }
 0x29f   :  { %v1973_v21 = vpack.c.bf16 %v1503_v1, %v1503_v1  ;;  %v1713_v6 = vmul.u32 %v1711_v42, %v6280_v56  ;;  %v1735_v63 = vmul.u32 %v1733_v32, %v6280_v56  ;;  %v1712_v45 = vmul.u32 %v1710_v28, %v6280_v56 }
 0x2a0   :  { %v1622_v22 = vand.u32 2147483647, %v1621_v30  ;;  %v1715_v38 = vmul.u32 %v1711_v42, %v6283_v57  ;;  %v1734_v44 = vmul.u32 %v1732_v31, %v6280_v56  ;;  %v1736_v48 = vmul.u32 %v1732_v31, %v6283_v57 }
 0x2a1   :  { %v4013_v10 = vsel %vm3907_vm9, %v1973_v21, 0  ;;  %v1716_v7 = vshll.u32 %v1713_v6, 16  ;;  %v1717_v50 = vshrl.u32 %v1713_v6, 16  ;;  %v1738_v20 = vshll.u32 %v1735_v63, 16 }
 0x2a2   :  { %4030 = vmatpush.bf16.msrb.mxu0 %v4013_v10  ;;  %v1625_v46 = vmul.f32 %v1624_v47, %v1622_v22  ;;  %v1718_v60 = vshll.u32 %v1714_v23, 16  ;;  %v1737_v39 = vmul.u32 %v1733_v32, %v6283_v57  ;;  %v1740_v41 = vshll.u32 %v1736_v48, 16 }
 0x2a3   :  { %vm1720_vm14 = vc.u32 %v1712_v45, %v1716_v7  ;;  %v1722_v37 = vadd.s32 %v1716_v7, %v1712_v45  ;;  %vm1742_vm1 = vc.u32 %v1734_v44, %v1738_v20  ;;  %v1744_v56 = vadd.s32 %v1738_v20, %v1734_v44 }
 0x2a4   :  { %v1626_v51 = vxor.u32 2147483648, %v1625_v46  ;;  %v1721_v24 = vsel %vm1720_vm14, 1, %v4539_v0  ;;  %v1743_v43 = vsel %vm1742_vm1, 1, %v4539_v0  ;;  %v1826_v9 = vsel %vm1825_vm15, %v6295_v53, 0 }
 0x2a5   :  { %v1723_v52 = vadd.s32 %v1721_v24, %v1715_v38  ;;  %vm1724_vm11 = vc.u32 %v1722_v37, %v1718_v60  ;;  %v1745_v57 = vadd.s32 %v1743_v43, %v1737_v39  ;;  %vm1746_vm3 = vc.u32 %v1744_v56, %v1740_v41 }
 0x2a6   :  { %v1627_v27 = vsel %vm1506_vm12, %v1626_v51, %v1625_v46  ;;  %v1725_v15 = vsel %vm1724_vm11, 1, %v4539_v0  ;;  %v1648_v28 = vadd.s32 3, %v1631_v16  ;;  %v1719_v42 = vshrl.u32 %v1714_v23, 16 }
 0x2a7   :  { %v1630_v35 = vsel %vm6319_vm4, %v6018_v19, %v1627_v27  ;;  %v1727_v33 = vadd.s32 %v1725_v15, %v1723_v52  ;;  %v1747_v31 = vsel %vm1746_vm3, 1, %v4539_v0  ;;  %v1739_v30 = vshrl.u32 %v1735_v63, 16 }
 0x2a8   :  { %v1632_v1 = vmul.f32 %v1630_v35, %v1630_v35  ;;  %v1749_v32 = vadd.s32 %v1747_v31, %v1745_v57  ;;  %v1828_v6 = vand.u32 31, %v1826_v9  ;;  %v1698_v53 = vsel %vm1692_vm8, %v1695_v49, %v1697_v58 }
 0x2a9   :  { %v1728_v21 = vadd.s32 %v1727_v33, %v1717_v50  ;;  %v1741_v3 = vshrl.u32 %v1736_v48, 16  ;;  %v6381_v23 = vadd.s32 %v1744_v56, %v1740_v41  ;;  %v1822_v44 = vor.u32 8388608, %v6287_v13 }
 0x2aa   :  { %v1633_v10 = vmul.f32 -0.001358992, %v1632_v1  ;;  %v1640_v22 = vmul.f32 -0.00019511016, %v1632_v1  ;;  %v1750_v45 = vadd.s32 %v1749_v32, %v1739_v30  ;;  %v6379_v38 = vsub.s32 32, %v1828_v6 }
 0x2ab   :  { %v6377_v47 = vadd.s32 %v1728_v21, %v1719_v42  ;;  %v1649_v63 = vand.u32 3, %v1648_v28  ;;  %v1752_v50 = vmul.u32 %v6273_v25, %v1698_v53  ;;  %v6385_v20 = vshrl.u32 %v1826_v9, 5 }
 0x2ac   :  { %v1634_v7 = vadd.f32 0.041655596, %v1633_v10  ;;  %v1641_v16 = vadd.f32 0.008332121, %v1640_v22  ;;  %v1751_v46 = vadd.s32 %v1750_v45, %v1741_v3  ;;  %v1835_v58 = vshrl.u32 %v4542_v2, %v6379_v38 }
 0x2ad   :  { %vm1754_vm12 = vc.u32 %v6377_v47, %v6381_v23  ;;  %v1838_v60 = vshrl.u32 %v4543_v5, %v6379_v38  ;;  %v1840_v13 = vshll.u32 %v4543_v5, %v1828_v6  ;;  %v1841_v37 = vshrl.u32 %v4544_v8, %v6379_v38 }
 0x2ae   :  { %v1635_v55 = vmul.f32 %v1634_v7, %v1632_v1  ;;  %v1642_v49 = vmul.f32 %v1641_v16, %v1632_v1  ;;  %v1755_v48 = vadd.s32 1, %v1751_v46  ;;  %v1834_v24 = vshll.u32 %v4541_v61, %v1828_v6 }
 0x2af   :  { %v1837_v39 = vshll.u32 %v4542_v2, %v1828_v6  ;;  %v1832_v52 = vshrl.u32 %v4541_v61, %v6379_v38  ;;  %v1842_v56 = vor.u32 %v1841_v37, %v1840_v13  ;;  %v1843_v27 = vshll.u32 %v4544_v8, %v1828_v6 }
 0x2b0   :  { %v1636_v25 = vadd.f32 -0.4999988, %v1635_v55  ;;  %v1643_v51 = vadd.f32 -0.16666654, %v1642_v49  ;;  %v1756_v41 = vsel %vm1754_vm12, %v1755_v48, %v1751_v46  ;;  %v1844_v33 = vshrl.u32 %v4545_v11, %v6379_v38 }
 0x2b1   :  { %v1757_v9 = vadd.s32 %v1756_v41, %v1752_v50  ;;  %vm1650_vm2 = vcmp.lt.s32.totalorder %v1649_v63, 2  ;;  %v1831_v57 = vshll.u32 %v4540_v59, %v1828_v6  ;;  %v6405_v28 = vor.u32 %v1835_v58, %v1834_v24 }
 0x2b2   :  { %v1637_v15 = vmul.f32 %v1636_v25, %v1632_v1  ;;  %v1644_v43 = vmul.f32 %v1643_v51, %v1632_v1  ;;  %v1839_v42 = vor.u32 %v1838_v60, %v1837_v39  ;;  %v1845_v32 = vor.u32 %v1844_v33, %v1843_v27 }
 0x2b3   :  { %v1758_v30 = vadd.s32 536870912, %v1757_v9  ;;  %v6407_v10 = vor.u32 %v1832_v52, %v1831_v57  ;;  %vm1846_vm0 = vcmp.lt.s32.totalorder %v6385_v20, 1  ;;  %vm1849_vm4 = vcmp.lt.s32.totalorder %v6385_v20, 4 }
 0x2b4   :  { %v1638_v31 = vadd.f32 1.0, %v1637_v15  ;;  %v1645_v21 = vadd.f32 1.0, %v1644_v43  ;;  %v6411_v1 = vshll.u32 %v1822_v44, 8  ;;  %v1855_v6 = vsel %vm1849_vm4, %v1842_v56, 920167782 }
 0x2b5   :  { %v6413_v3 = vshrl.u32 %v1758_v30, 30  ;;  %vm1651_vm5 = vcmp.eq.s32.totalorder %v1649_v63, 0  ;;  %vm1654_vm7 = vcmp.eq.s32.totalorder %v1649_v63, 2  ;;  %v1858_v45 = vsel %vm1846_vm0, %v6405_v28, %v1839_v42 }
 0x2b6   :  { %v1646_v22 = vmul.f32 %v1645_v21, %v1630_v35  ;;  %v1655_v53 = vxor.u32 2147483648, %v1638_v31  ;;  %v1859_v7 = vsel %vm1849_vm4, %v1845_v32, 1326507024  ;;  %vm1847_vm8 = vcmp.lt.s32.totalorder %v6385_v20, 2 }
 0x2b7   :  { %v1760_v44 = vshll.u32 %v6413_v3, 30  ;;  %vm1848_vm10 = vcmp.lt.s32.totalorder %v6385_v20, 3  ;;  %v1854_v35 = vsel %vm1846_vm0, %v6407_v10, %v6405_v28  ;;  %v1863_v55 = vand.u32 65535, %v6411_v1 }
 0x2b8   :  { %v1652_v16 = vxor.u32 2147483648, %v1646_v22  ;;  %v1856_v46 = vsel %vm1848_vm10, %v1839_v42, %v1855_v6  ;;  %v1860_v50 = vsel %vm1848_vm10, %v1842_v56, %v1859_v7  ;;  %v1656_v58 = vsel %vm1654_vm7, %v1655_v53, %v1646_v22 }
 0x2b9   :  { %v1761_v48 = vsub.s32 %v1757_v9, %v1760_v44  ;;  %v1861_v60 = vsel %vm1847_vm8, %v1858_v45, %v1860_v50  ;;  %v1864_v37 = vshrl.u32 %v6411_v1, 16  ;;  %v1857_v41 = vsel %vm1847_vm8, %v1854_v35, %v1856_v46 }
 0x2ba   :  { %v1653_v49 = vsel %vm1651_vm5, %v1638_v31, %v1652_v16  ;;  %v1865_v25 = vand.u32 65535, %v1861_v60  ;;  %v1866_v51 = vshrl.u32 %v1861_v60, 16  ;;  %v1887_v57 = vand.u32 65535, %v1857_v41 }
 0x2bb   :  { %v1657_v13 = vsel %vm1650_vm2, %v1653_v49, %v1656_v58  ;;  %vm1762_vm13 = vcmp.lt.s32.totalorder %v1761_v48, 0  ;;  %v1763_v39 = vsub.s32 0, %v1761_v48  ;;  %v1753_v32 = vadd.s32 %v6381_v23, %v6377_v47 }
 0x2bc   :  { %v1658_v24 = vsel %vm1647_vm6, nan, %v1657_v13  ;;  %v1868_v56 = vmul.u32 %v1866_v51, %v1863_v55  ;;  %v1869_v27 = vmul.u32 %v1865_v25, %v1864_v37  ;;  %v1867_v43 = vmul.u32 %v1865_v25, %v1863_v55 }
 0x2bd   :  { %v1974_v52 = vpack.c.bf16 %v1658_v24, %v1658_v24  ;;  %v1764_v15 = vsel %vm1762_vm13, %v1763_v39, %v1761_v48  ;;  %v1870_v31 = vmul.u32 %v1866_v51, %v1864_v37  ;;  %v1830_v22 = vshrl.u32 %v4540_v59, %v6379_v38 }
 0x2be   :  { %v1765_v9 = vclz %v1764_v15  ;;  %v1871_v33 = vshll.u32 %v1868_v56, 16  ;;  %v1873_v19 = vshll.u32 %v1869_v27, 16  ;;  %v1888_v6 = vshrl.u32 %v1857_v41, 16 }
 0x2bf   :  { %v4016_v63 = vsel %vm3907_vm9, %v1974_v52, 0  ;;  %v1891_v7 = vmul.u32 %v1887_v57, %v1864_v37  ;;  %v1851_v44 = vsel %vm1849_vm4, %v1839_v42, 2102212464  ;;  %vm1661_vm1 = vcmp.lt.s32.totalorder %v6239_v62, 0 }
 0x2c0   :  { %4049 = vmatpush.bf16.msrb.mxu1 %v4016_v63  ;;  %v4425_v21 = vadd.s32 4294967294, %v1765_v9  ;;  %vm1875_vm14 = vc.u32 %v1867_v43, %v1871_v33  ;;  %v1877_v30 = vadd.s32 %v1871_v33, %v1867_v43  ;;  %v1890_v46 = vmul.u32 %v1888_v6, %v1863_v55 }
 0x2c1   :  { %v1876_v53 = vsel %vm1875_vm14, 1, %v4539_v0  ;;  %v70_v38 = vmul.f32 %v6000_v26, %v4959_v18  ;;  %v1872_v49 = vshrl.u32 %v1868_v56, 16  ;;  %v1889_v58 = vmul.u32 %v1887_v57, %v1863_v55 }
 0x2c2   :  { %vm4426_vm15 = vcmp.lt.s32.totalorder %v4425_v21, 0  ;;  %v1878_v45 = vadd.s32 %v1876_v53, %v1870_v31  ;;  %vm1879_vm11 = vc.u32 %v1877_v30, %v1873_v19  ;;  %v1892_v60 = vmul.u32 %v1888_v6, %v1864_v37 }
 0x2c3   :  { %v1768_v16 = vsel %vm4426_vm15, 0, %v4425_v21  ;;  %v1880_v35 = vsel %vm1879_vm11, 1, %v4539_v0  ;;  %v1893_v13 = vshll.u32 %v1890_v46, 16  ;;  %v1895_v39 = vshll.u32 %v1891_v7, 16 }
 0x2c4   :  { %v1769_v47 = vsub.s32 32, %v1768_v16  ;;  %v1773_v23 = vsub.s32 4294967266, %v1768_v16  ;;  %v1882_v50 = vadd.s32 %v1880_v35, %v1878_v45  ;;  %v1770_v25 = vshll.u32 %v1761_v48, %v1768_v16 }
 0x2c5   :  { %vm1897_vm3 = vc.u32 %v1889_v58, %v1893_v13  ;;  %v1899_v41 = vadd.s32 %v1893_v13, %v1889_v58  ;;  %v74_v52 = vmul.f32 %v6000_v26, %v5131_v36  ;;  %v6458_v9 = vadd.f32 %v4993_v12, %v70_v38 }
 0x2c6   :  { %v1771_v51 = vshrl.u32 %v1753_v32, %v1769_v47  ;;  %v1774_v24 = vadd.s32 127, %v1773_v23  ;;  %v1883_v42 = vadd.s32 %v1882_v50, %v1872_v49  ;;  %v1898_v63 = vsel %vm1897_vm3, 1, %v4539_v0 }
 0x2c7   :  { %v1783_v55 = vsub.s32 4, %v6413_v3  ;;  %v1850_v48 = vsel %vm1846_vm0, %v1830_v22, %v6407_v10  ;;  %v1900_v37 = vadd.s32 %v1898_v63, %v1892_v60  ;;  %vm1901_vm12 = vc.u32 %v1899_v41, %v1895_v39 }
 0x2c8   :  { %v1772_v15 = vor.u32 %v1771_v51, %v1770_v25  ;;  %v1775_v43 = vshll.u32 %v1774_v24, 23  ;;  %v1874_v33 = vshrl.u32 %v1869_v27, 16  ;;  %v1902_v57 = vsel %vm1901_vm12, 1, %v4539_v0 }
 0x2c9   :  { %v109_v26 = vand.u32 2147483647, %v6458_v9  ;;  %v1852_v31 = vsel %vm1848_vm10, %v6405_v28, %v1851_v44  ;;  %v1894_v21 = vshrl.u32 %v1890_v46, 16  ;;  %v1904_v19 = vadd.s32 %v1902_v57, %v1900_v37 }
 0x2ca   :  { %v1776_v56 = vor.u32 4788187, %v1775_v43  ;;  %v6470_v30 = vadd.f32 %v5151_v40, %v74_v52  ;;  %v1779_v53 = vcvt.s32.f32 %v1772_v15  ;;  %v1884_v10 = vadd.s32 %v1883_v42, %v1874_v33 }
 0x2cb   :  { %v112_v22 = vand.u32 2139095040, %v6458_v9  ;;  %v1784_v27 = vsel %vm1661_vm1, %v1783_v55, %v6413_v3  ;;  %v1896_v6 = vshrl.u32 %v1891_v7, 16  ;;  %v1905_v45 = vadd.s32 %v1904_v19, %v1894_v21 }
 0x2cc   :  { %v1777_v32 = vand.u32 2147483647, %v1776_v56  ;;  %v1903_v35 = vadd.s32 %v1899_v41, %v1895_v39  ;;  %v116_v28 = vand.u32 8388607, %v109_v26  ;;  %v1853_v44 = vsel %vm1847_vm8, %v1850_v48, %v1852_v31 }
 0x2cd   :  { %v113_v47 = vshrl.u32 %v112_v22, 23  ;;  %v1906_v46 = vadd.s32 %v1905_v45, %v1896_v6  ;;  %v732_v23 = vand.u32 2139095040, %v6470_v30  ;;  %vm1660_vm6 = vcmp.le.f32.partialorder %v1659_v14, 0.7853982 }
 0x2ce   :  { %v1780_v16 = vmul.f32 %v1779_v53, %v1777_v32  ;;  %vm1909_vm2 = vc.u32 %v1884_v10, %v1903_v35  ;;  %v1786_v7 = vsel %vm1660_vm6, 0, %v1784_v27  ;;  %v1907_v58 = vmul.u32 %v6411_v1, %v1853_v44 }
 0x2cf   :  { %v4394_v3 = vadd.s32 4294967169, %v113_v47  ;;  %v1910_v38 = vadd.s32 1, %v1906_v46  ;;  %v117_v60 = vor.u32 8388608, %v116_v28  ;;  %v733_v51 = vshrl.u32 %v732_v23, 23 }
 0x2d0   :  { %v1781_v50 = vxor.u32 2147483648, %v1780_v16  ;;  %v1803_v39 = vadd.s32 3, %v1786_v7  ;;  %v6491_v33 = vadd.s32 %v1903_v35, %v1884_v10  ;;  %v729_v31 = vand.u32 2147483647, %v6470_v30 }
 0x2d1   :  { %v119_v13 = vadd.s32 1, %v4394_v3  ;;  %v1911_v25 = vsel %vm1909_vm2, %v1910_v38, %v1906_v46  ;;  %v6487_v43 = vshll.u32 %v117_v60, 8  ;;  %v4406_v55 = vadd.s32 4294967169, %v733_v51 }
 0x2d2   :  { %v1782_v49 = vsel %vm1661_vm1, %v1781_v50, %v1780_v16  ;;  %v1912_v42 = vadd.s32 %v1911_v25, %v1907_v58  ;;  %v6489_v37 = vand.u32 3, %v1803_v39  ;;  %vm1816_vm4 = vcmp.lt.s32.totalorder %v6256_v29, 0 }
 0x2d3   :  { %v1785_v20 = vsel %vm1660_vm6, %v6239_v62, %v1782_v49  ;;  %vm120_vm0 = vcmp.gt.s32.totalorder %v119_v13, 0  ;;  %v6496_v53 = vand.u32 65535, %v6487_v43  ;;  %v6502_v6 = vshrl.u32 %v6487_v43, 16 }
 0x2d4   :  { %v1787_v24 = vmul.f32 %v1785_v20, %v1785_v20  ;;  %v121_v14 = vsel %vm120_vm0, %v119_v13, 0  ;;  %v1913_v15 = vadd.s32 536870912, %v1912_v42  ;;  %v6504_v10 = vadd.s32 1, %v4406_v55 }
 0x2d5   :  { %v123_v63 = vand.u32 31, %v121_v14  ;;  %v6498_v22 = vshrl.u32 %v121_v14, 5  ;;  %vm1809_vm5 = vcmp.eq.s32.totalorder %v6489_v37, 2  ;;  %vm1806_vm7 = vcmp.eq.s32.totalorder %v6489_v37, 0 }
 0x2d6   :  { %v1788_v41 = vmul.f32 -0.001358992, %v1787_v24  ;;  %v1795_v52 = vmul.f32 -0.00019511016, %v1787_v24  ;;  %v1914_v56 = vshrl.u32 %v1913_v15, 30  ;;  %vm1805_vm8 = vcmp.lt.s32.totalorder %v6489_v37, 2 }
 0x2d7   :  { %v124_v57 = vsub.s32 32, %v123_v63  ;;  %v126_v27 = vshll.u32 %v4540_v59, %v123_v63  ;;  %v129_v47 = vshll.u32 %v4541_v61, %v123_v63  ;;  %v132_v46 = vshll.u32 %v4542_v2, %v123_v63 }
 0x2d8   :  { %v1789_v48 = vadd.f32 0.041655596, %v1788_v41  ;;  %v1796_v1 = vadd.f32 0.008332121, %v1795_v52  ;;  %v1915_v32 = vshll.u32 %v1914_v56, 30  ;;  %vm1802_vm13 = vweird.f32 %v6239_v62 }
 0x2d9   :  { %v127_v28 = vshrl.u32 %v4541_v61, %v124_v57  ;;  %v130_v44 = vshrl.u32 %v4542_v2, %v124_v57  ;;  %v133_v23 = vshrl.u32 %v4543_v5, %v124_v57  ;;  %v1938_v38 = vsub.s32 4, %v1914_v56 }
 0x2da   :  { %v1790_v21 = vmul.f32 %v1789_v48, %v1787_v24  ;;  %v1797_v19 = vmul.f32 %v1796_v1, %v1787_v24  ;;  %v6507_v35 = vsub.s32 %v1912_v42, %v1915_v32  ;;  %v135_v49 = vshll.u32 %v4543_v5, %v123_v63 }
 0x2db   :  { %v136_v58 = vshrl.u32 %v4544_v8, %v124_v57  ;;  %v138_v60 = vshll.u32 %v4544_v8, %v123_v63  ;;  %v128_v42 = vor.u32 %v127_v28, %v126_v27  ;;  %v131_v14 = vor.u32 %v130_v44, %v129_v47 }
 0x2dc   :  { %v1791_v45 = vadd.f32 -0.4999988, %v1790_v21  ;;  %v1798_v16 = vadd.f32 -0.16666654, %v1797_v19  ;;  %vm1917_vm10 = vcmp.lt.s32.totalorder %v6507_v35, 0  ;;  %v1918_v7 = vsub.s32 0, %v6507_v35 }
 0x2dd   :  { %v137_v41 = vor.u32 %v136_v58, %v135_v49  ;;  %v125_v55 = vshrl.u32 %v4540_v59, %v124_v57  ;;  %v134_v48 = vor.u32 %v133_v23, %v132_v46  ;;  %v6527_v21 = vsel %vm1816_vm4, %v1938_v38, %v1914_v56 }
 0x2de   :  { %v1792_v50 = vmul.f32 %v1791_v45, %v1787_v24  ;;  %v1799_v3 = vmul.f32 %v1798_v16, %v1787_v24  ;;  %v1919_v51 = vsel %vm1917_vm10, %v1918_v7, %v6507_v35  ;;  %v139_v24 = vshrl.u32 %v4545_v11, %v124_v57 }
 0x2df   :  { %v1920_v39 = vclz %v1919_v51  ;;  %vm141_vm14 = vcmp.lt.s32.totalorder %v6498_v22, 1  ;;  %vm142_vm15 = vcmp.lt.s32.totalorder %v6498_v22, 2  ;;  %vm6533_vm11 = vcmp.le.f32.partialorder %v1814_v54, 0.7853982 }
 0x2e0   :  { %v1793_v13 = vadd.f32 1.0, %v1792_v50  ;;  %v1800_v25 = vadd.f32 1.0, %v1799_v3  ;;  %vm143_vm1 = vcmp.lt.s32.totalorder %v6498_v22, 3  ;;  %vm144_vm3 = vcmp.lt.s32.totalorder %v6498_v22, 4 }
 0x2e1   :  { %v4428_v1 = vadd.s32 4294967294, %v1920_v39  ;;  %v149_v57 = vsel %vm141_vm14, %v128_v42, %v131_v14  ;;  %v150_v32 = vsel %vm144_vm3, %v137_v41, 920167782  ;;  %v145_v45 = vsel %vm141_vm14, %v125_v55, %v128_v42 }
 0x2e2   :  { %v1801_v52 = vmul.f32 %v1800_v25, %v1785_v20  ;;  %v1810_v15 = vxor.u32 2147483648, %v1793_v13  ;;  %v140_v20 = vor.u32 %v139_v24, %v138_v60  ;;  %v151_v16 = vsel %vm143_vm1, %v134_v48, %v150_v32 }
 0x2e3   :  { %vm4429_vm12 = vcmp.lt.s32.totalorder %v4428_v1, 0  ;;  %v146_v46 = vsel %vm144_vm3, %v134_v48, 2102212464  ;;  %v152_v3 = vsel %vm142_vm15, %v149_v57, %v151_v16  ;;  %v153_v7 = vsel %vm141_vm14, %v131_v14, %v134_v48 }
 0x2e4   :  { %v1807_v63 = vxor.u32 2147483648, %v1801_v52  ;;  %v1811_v56 = vsel %vm1809_vm5, %v1810_v15, %v1801_v52  ;;  %v1923_v27 = vsel %vm4429_vm12, 0, %v4428_v1  ;;  %v154_v58 = vsel %vm144_vm3, %v140_v20, 1326507024 }
 0x2e5   :  { %v1924_v28 = vsub.s32 32, %v1923_v27  ;;  %v1928_v44 = vsub.s32 4294967266, %v1923_v27  ;;  %v1925_v50 = vshll.u32 %v6507_v35, %v1923_v27  ;;  %v147_v60 = vsel %vm143_vm1, %v131_v14, %v146_v46 }
 0x2e6   :  { %v1808_v54 = vsel %vm1806_vm7, %v1793_v13, %v1807_v63  ;;  %v155_v62 = vsel %vm143_vm1, %v137_v41, %v154_v58  ;;  %v182_v35 = vand.u32 65535, %v152_v3  ;;  %v183_v13 = vshrl.u32 %v152_v3, 16 }
 0x2e7   :  { %v1812_v47 = vsel %vm1805_vm8, %v1808_v54, %v1811_v56  ;;  %v1926_v37 = vshrl.u32 %v6491_v33, %v1924_v28  ;;  %v1929_v49 = vadd.s32 127, %v1928_v44  ;;  %v156_v39 = vsel %vm142_vm15, %v153_v7, %v155_v62 }
 0x2e8   :  { %v1813_v23 = vsel %vm1802_vm13, nan, %v1812_v47  ;;  %v160_v33 = vand.u32 65535, %v156_v39  ;;  %v161_v42 = vshrl.u32 %v156_v39, 16  ;;  %v185_v52 = vmul.u32 %v183_v13, %v6496_v53 }
 0x2e9   :  { %v1975_v38 = vpack.c.bf16 %v1813_v23, %v1813_v23  ;;  %v1927_v51 = vor.u32 %v1926_v37, %v1925_v50  ;;  %v1930_v24 = vshll.u32 %v1929_v49, 23  ;;  %v6575_v14 = vand.u32 8388607, %v729_v31 }
 0x2ea   :  { %v1941_v41 = vsel %vm6533_vm11, 0, %v6527_v21  ;;  %v186_v55 = vmul.u32 %v182_v35, %v6502_v6  ;;  %vm740_vm6 = vcmp.gt.s32.totalorder %v6504_v10, 0  ;;  %v6584_v48 = vsel %vm142_vm15, %v145_v45, %v147_v60  ;;  %v4524_v21 = vld [vmem:[%s7454_s3 + $0x10] sm:$0xff] }
 0x2eb   :  { %v4019_v25 = vsel %vm3907_vm9, %v1975_v38, 0  ;;  %v1931_v15 = vor.u32 4788187, %v1930_v24  ;;  %v163_v1 = vmul.u32 %v161_v42, %v6496_v53  ;;  %v164_v63 = vmul.u32 %v160_v33, %v6502_v6 }
 0x2ec   :  { %4068 = vmatpush.bf16.msrb.mxu2 %v4019_v25  ;;  %v184_v20 = vmul.u32 %v182_v35, %v6496_v53  ;;  %v1934_v57 = vcvt.s32.f32 %v1927_v51  ;;  %vm3900_vm2 = vcmask 162816   ;;  %v188_v32 = vshll.u32 %v185_v52, 16 }
 0x2ed   :  { %v1932_v56 = vand.u32 2147483647, %v1931_v15  ;;  %v162_v54 = vmul.u32 %v160_v33, %v6496_v53  ;;  %v165_v22 = vmul.u32 %v161_v42, %v6502_v6  ;;  %v166_v27 = vshll.u32 %v163_v1, 16  ;;  %4478 = vmatmul.msk.bf16.vlgmr.msra.gmra.mxu0 %vm3900_vm2, %v4524_v21  ;;  %4480 = vmatmul.msk.bf16.vlgmr.msra.gmra.mxu1 %vm3900_vm2, %v4524_v21 }
 0x2ee   :  { %v187_v45 = vmul.u32 %v183_v13, %v6502_v6  ;;  %v168_v47 = vshll.u32 %v164_v63, 16  ;;  %v190_v28 = vshll.u32 %v186_v55, 16  ;;  %vm192_vm0 = vc.u32 %v184_v20, %v188_v32  ;;  %4482 = vmatmul.msk.bf16.vlgmr.msra.gmra.mxu2 %vm3900_vm2, %v4524_v21  ;;  %4484 = vmatmul.msk.bf16.vlgmr.msra.gmra.mxu3 %vm3900_vm2, %v4524_v21 }
 0x2ef   :  { %v1935_v16 = vmul.f32 %v1934_v57, %v1932_v56  ;;  %vm170_vm5 = vc.u32 %v162_v54, %v166_v27  ;;  %v172_v44 = vadd.s32 %v166_v27, %v162_v54  ;;  %v193_v53 = vsel %vm192_vm0, 1, %v4539_v0 }
 0x2f0   :  { %v194_v46 = vadd.s32 %v188_v32, %v184_v20  ;;  %v171_v6 = vsel %vm170_vm5, 1, %v4539_v0  ;;  %v195_v50 = vadd.s32 %v193_v53, %v187_v45  ;;  %v741_v3 = vsel %vm740_vm6, %v6504_v10, 0 }
 0x2f1   :  { %v1936_v23 = vxor.u32 2147483648, %v1935_v16  ;;  %v173_v7 = vadd.s32 %v171_v6, %v165_v22  ;;  %vm174_vm7 = vc.u32 %v172_v44, %v168_v47  ;;  %v189_v38 = vshrl.u32 %v185_v52, 16 }
 0x2f2   :  { %vm196_vm8 = vc.u32 %v194_v46, %v190_v28  ;;  %v167_v49 = vshrl.u32 %v163_v1, 16  ;;  %v175_v58 = vsel %vm174_vm7, 1, %v4539_v0  ;;  %v743_v25 = vand.u32 31, %v741_v3 }
 0x2f3   :  { %v1937_v37 = vsel %vm1816_vm4, %v1936_v23, %v1935_v16  ;;  %v197_v60 = vsel %vm196_vm8, 1, %v4539_v0  ;;  %v177_v35 = vadd.s32 %v175_v58, %v173_v7  ;;  %v1958_v51 = vadd.s32 3, %v1941_v41 }
 0x2f4   :  { %v1940_v62 = vsel %vm6533_vm11, %v6256_v29, %v1937_v37  ;;  %v199_v13 = vadd.s32 %v197_v60, %v195_v50  ;;  %v169_v24 = vshrl.u32 %v164_v63, 16  ;;  %v202_v39 = vmul.u32 %v6487_v43, %v6584_v48 }
 0x2f5   :  { %v1942_v10 = vmul.f32 %v1940_v62, %v1940_v62  ;;  %v178_v33 = vadd.s32 %v177_v35, %v167_v49  ;;  %v191_v42 = vshrl.u32 %v186_v55, 16  ;;  %v6613_v15 = vsub.s32 32, %v743_v25 }
 0x2f6   :  { %v200_v52 = vadd.s32 %v199_v13, %v189_v38  ;;  %v6615_v56 = vadd.s32 %v194_v46, %v190_v28  ;;  %v6617_v19 = vshrl.u32 %v741_v3, 5  ;;  %v746_v41 = vshll.u32 %v4540_v59, %v743_v25 }
 0x2f7   :  { %v1943_v1 = vmul.f32 -0.001358992, %v1942_v10  ;;  %v1950_v20 = vmul.f32 -0.00019511016, %v1942_v10  ;;  %v6619_v57 = vadd.s32 %v178_v33, %v169_v24  ;;  %v747_v63 = vshrl.u32 %v4541_v61, %v6613_v15 }
 0x2f8   :  { %v201_v21 = vadd.s32 %v200_v52, %v191_v42  ;;  %v749_v55 = vshll.u32 %v4541_v61, %v743_v25  ;;  %v750_v32 = vshrl.u32 %v4542_v2, %v6613_v15  ;;  %v752_v22 = vshll.u32 %v4542_v2, %v743_v25 }
 0x2f9   :  { %v1944_v43 = vadd.f32 0.041655596, %v1943_v1  ;;  %v1951_v48 = vadd.f32 0.008332121, %v1950_v20  ;;  %vm204_vm4 = vc.u32 %v6619_v57, %v6615_v56  ;;  %v753_v27 = vshrl.u32 %v4543_v5, %v6613_v15 }
 0x2fa   :  { %v205_v54 = vadd.s32 1, %v201_v21  ;;  %v6632_v47 = vor.u32 %v747_v63, %v746_v41  ;;  %v6634_v28 = vor.u32 %v750_v32, %v749_v55  ;;  %v755_v53 = vshll.u32 %v4543_v5, %v743_v25 }
 0x2fb   :  { %v1945_v45 = vmul.f32 %v1944_v43, %v1942_v10  ;;  %v1952_v16 = vmul.f32 %v1951_v48, %v1942_v10  ;;  %v756_v46 = vshrl.u32 %v4544_v8, %v6613_v15  ;;  %v758_v23 = vshll.u32 %v4544_v8, %v743_v25 }
 0x2fc   :  { %v206_v44 = vsel %vm204_vm4, %v205_v54, %v201_v21  ;;  %v759_v7 = vshrl.u32 %v4545_v11, %v6613_v15  ;;  %v737_v38 = vor.u32 8388608, %v6575_v14  ;;  %v754_v37 = vor.u32 %v753_v27, %v752_v22 }
 0x2fd   :  { %v1946_v6 = vadd.f32 -0.4999988, %v1945_v45  ;;  %v1953_v50 = vadd.f32 -0.16666654, %v1952_v16  ;;  %v207_v3 = vadd.s32 %v206_v44, %v202_v39  ;;  %v757_v49 = vor.u32 %v756_v46, %v755_v53 }
 0x2fe   :  { %vm764_vm10 = vcmp.lt.s32.totalorder %v6617_v19, 4  ;;  %v760_v13 = vor.u32 %v759_v7, %v758_v23  ;;  %v1959_v24 = vand.u32 3, %v1958_v51  ;;  %vm761_vm13 = vcmp.lt.s32.totalorder %v6617_v19, 1 }
 0x2ff   :  { %v1947_v58 = vmul.f32 %v1946_v6, %v1942_v10  ;;  %v1954_v60 = vmul.f32 %v1953_v50, %v1942_v10  ;;  %v208_v35 = vadd.s32 536870912, %v207_v3  ;;  %vm763_vm14 = vcmp.lt.s32.totalorder %v6617_v19, 3 }
 0x300   :  { %v770_v25 = vsel %vm764_vm10, %v757_v49, 920167782  ;;  %v769_v14 = vsel %vm761_vm13, %v6632_v47, %v6634_v28  ;;  %vm762_vm15 = vcmp.lt.s32.totalorder %v6617_v19, 2  ;;  %v774_v51 = vsel %vm764_vm10, %v760_v13, 1326507024 }
 0x301   :  { %v1948_v39 = vadd.f32 1.0, %v1947_v58  ;;  %v1955_v33 = vadd.f32 1.0, %v1954_v60  ;;  %v6648_v42 = vshrl.u32 %v208_v35, 30  ;;  %v771_v10 = vsel %vm763_vm14, %v754_v37, %v770_v25 }
 0x302   :  { %v773_v21 = vsel %vm761_vm13, %v6634_v28, %v754_v37  ;;  %v772_v41 = vsel %vm762_vm15, %v769_v14, %v771_v10  ;;  %v775_v63 = vsel %vm763_vm14, %v757_v49, %v774_v51  ;;  %v6667_v43 = vshll.u32 %v737_v38, 8 }
 0x303   :  { %v1956_v52 = vmul.f32 %v1955_v33, %v1940_v62  ;;  %v1965_v1 = vxor.u32 2147483648, %v1948_v39  ;;  %v210_v20 = vshll.u32 %v6648_v42, 30  ;;  %vm1957_vm11 = vweird.f32 %v6256_v29 }
 0x304   :  { %vm1964_vm1 = vcmp.eq.s32.totalorder %v1959_v24, 2  ;;  %vm1960_vm3 = vcmp.lt.s32.totalorder %v1959_v24, 2  ;;  %vm1961_vm12 = vcmp.eq.s32.totalorder %v1959_v24, 0  ;;  %v776_v32 = vsel %vm762_vm15, %v773_v21, %v775_v63 }
 0x305   :  { %v1962_v48 = vxor.u32 2147483648, %v1956_v52  ;;  %v211_v62 = vsub.s32 %v207_v3, %v210_v20  ;;  %v1966_v55 = vsel %vm1964_vm1, %v1965_v1, %v1956_v52  ;;  %v803_v27 = vshrl.u32 %v772_v41, 16 }
 0x306   :  { %v778_v16 = vand.u32 65535, %v6667_v43  ;;  %v780_v44 = vand.u32 65535, %v776_v32  ;;  %v781_v53 = vshrl.u32 %v776_v32, 16  ;;  %v779_v6 = vshrl.u32 %v6667_v43, 16 }
 0x307   :  { %v1963_v54 = vsel %vm1961_vm12, %v1948_v39, %v1962_v48  ;;  %vm212_vm6 = vcmp.lt.s32.totalorder %v211_v62, 0  ;;  %v213_v22 = vsub.s32 0, %v211_v62  ;;  %v802_v50 = vand.u32 65535, %v772_v41 }
 0x308   :  { %v1967_v45 = vsel %vm1960_vm3, %v1963_v54, %v1966_v55  ;;  %v783_v38 = vmul.u32 %v781_v53, %v778_v16  ;;  %v745_v49 = vshrl.u32 %v4540_v59, %v6613_v15  ;;  %v784_v58 = vmul.u32 %v780_v44, %v779_v6 }
 0x309   :  { %v1968_v46 = vsel %vm1957_vm11, nan, %v1967_v45  ;;  %v214_v23 = vsel %vm212_vm6, %v213_v22, %v211_v62  ;;  %v805_v60 = vmul.u32 %v803_v27, %v778_v16  ;;  %v782_v24 = vmul.u32 %v780_v44, %v778_v16 }
 0x30a   :  { %v1976_v3 = vpack.c.bf16 %v1968_v46, %v1968_v46  ;;  %v215_v7 = vclz %v214_v23  ;;  %v786_v25 = vshll.u32 %v783_v38, 16  ;;  %v203_v29 = vadd.s32 %v6615_v56, %v6619_v57 }
 0x30b   :  { %v766_v39 = vsel %vm764_vm10, %v754_v37, 2102212464  ;;  %v785_v33 = vmul.u32 %v781_v53, %v779_v6  ;;  %v804_v14 = vmul.u32 %v802_v50, %v778_v16  ;;  %v788_v10 = vshll.u32 %v784_v58, 16 }
 0x30c   :  { %v4022_v35 = vsel %vm3907_vm9, %v1976_v3, 0  ;;  %v4395_v13 = vadd.s32 4294967294, %v215_v7  ;;  %vm790_vm5 = vc.u32 %v782_v24, %v786_v25  ;;  %v792_v15 = vadd.s32 %v786_v25, %v782_v24 }
 0x30d   :  { %4087 = vmatpush.bf16.msrb.mxu3 %v4022_v35  ;;  %v791_v52 = vsel %vm790_vm5, 1, %v4539_v0  ;;  %v806_v1 = vmul.u32 %v802_v50, %v779_v6  ;;  %v808_v20 = vshll.u32 %v805_v60, 16  ;;  %v787_v63 = vshrl.u32 %v783_v38, 16 }
 0x30e   :  { %vm4396_vm0 = vcmp.lt.s32.totalorder %v4395_v13, 0  ;;  %v793_v48 = vadd.s32 %v791_v52, %v785_v33  ;;  %vm794_vm7 = vc.u32 %v792_v15, %v788_v10  ;;  %v807_v56 = vmul.u32 %v803_v27, %v779_v6 }
 0x30f   :  { %v218_v51 = vsel %vm4396_vm0, 0, %v4395_v13  ;;  %vm812_vm8 = vc.u32 %v804_v14, %v808_v20  ;;  %v795_v32 = vsel %vm794_vm7, 1, %v4539_v0  ;;  %v810_v45 = vshll.u32 %v806_v1, 16 }
 0x310   :  { %v219_v21 = vsub.s32 32, %v218_v51  ;;  %v223_v41 = vsub.s32 4294967266, %v218_v51  ;;  %v220_v55 = vshll.u32 %v211_v62, %v218_v51  ;;  %v813_v54 = vsel %vm812_vm8, 1, %v4539_v0 }
 0x311   :  { %v797_v22 = vadd.s32 %v795_v32, %v793_v48  ;;  %v814_v16 = vadd.s32 %v808_v20, %v804_v14  ;;  %v815_v44 = vadd.s32 %v813_v54, %v807_v56  ;;  %v71_v23 = vmul.f32 %v6002_v17, %v4959_v18 }
 0x312   :  { %v221_v57 = vshrl.u32 %v203_v29, %v219_v21  ;;  %v224_v37 = vadd.s32 127, %v223_v41  ;;  %v765_v62 = vsel %vm761_vm13, %v745_v49, %v6632_v47  ;;  %v767_v27 = vsel %vm763_vm14, %v6634_v28, %v766_v39 }
 0x313   :  { %v798_v6 = vadd.s32 %v797_v22, %v787_v63  ;;  %vm816_vm4 = vc.u32 %v814_v16, %v810_v45  ;;  %v789_v3 = vshrl.u32 %v784_v58, 16  ;;  %v6696_v38 = vadd.f32 %v4993_v12, %v71_v23 }
 0x314   :  { %v222_v53 = vor.u32 %v221_v57, %v220_v55  ;;  %v225_v46 = vshll.u32 %v224_v37, 23  ;;  %v817_v7 = vsel %vm816_vm4, 1, %v4539_v0  ;;  %v233_v35 = vsub.s32 4, %v6648_v42 }
 0x315   :  { %v809_v13 = vshrl.u32 %v805_v60, 16  ;;  %v819_v24 = vadd.s32 %v817_v7, %v815_v44  ;;  %v75_v47 = vmul.f32 %v6002_v17, %v5131_v36  ;;  %v799_v29 = vadd.s32 %v798_v6, %v789_v3 }
 0x316   :  { %v226_v50 = vor.u32 4788187, %v225_v46  ;;  %v229_v25 = vcvt.s32.f32 %v222_v53  ;;  %v267_v28 = vand.u32 2139095040, %v6696_v38  ;;  %vm111_vm10 = vcmp.lt.s32.totalorder %v6458_v9, 0 }
 0x317   :  { %v811_v58 = vshrl.u32 %v806_v1, 16  ;;  %v820_v39 = vadd.s32 %v819_v24, %v809_v13  ;;  %v768_v14 = vsel %vm762_vm15, %v765_v62, %v767_v27  ;;  %v818_v10 = vadd.s32 %v814_v16, %v810_v45 }
 0x318   :  { %v227_v49 = vand.u32 2147483647, %v226_v50  ;;  %v268_v15 = vshrl.u32 %v267_v28, 23  ;;  %v234_v60 = vsel %vm111_vm10, %v233_v35, %v6648_v42  ;;  %v6709_v51 = vadd.f32 %v5151_v40, %v75_v47 }
 0x319   :  { %v821_v17 = vadd.s32 %v820_v39, %v811_v58  ;;  %v264_v52 = vand.u32 2147483647, %v6696_v38  ;;  %vm824_vm13 = vc.u32 %v799_v29, %v818_v10  ;;  %vm110_vm14 = vcmp.le.f32.partialorder %v109_v26, 0.7853982 }
 0x31a   :  { %v230_v33 = vmul.f32 %v229_v25, %v227_v49  ;;  %v4397_v1 = vadd.s32 4294967169, %v268_v15  ;;  %v236_v41 = vsel %vm110_vm14, 0, %v234_v60  ;;  %v822_v63 = vmul.u32 %v6667_v43, %v768_v14 }
 0x31b   :  { %v825_v19 = vadd.s32 1, %v821_v17  ;;  %v271_v56 = vand.u32 8388607, %v264_v52  ;;  %v884_v57 = vand.u32 2147483647, %v6709_v51  ;;  %v887_v32 = vand.u32 2139095040, %v6709_v51 }
 0x31c   :  { %v231_v20 = vxor.u32 2147483648, %v230_v33  ;;  %v274_v42 = vadd.s32 1, %v4397_v1  ;;  %v253_v54 = vadd.s32 3, %v236_v41  ;;  %vm731_vm11 = vcmp.lt.s32.totalorder %v6470_v30, 0 }
 0x31d   :  { %v826_v55 = vsel %vm824_vm13, %v825_v19, %v821_v17  ;;  %v272_v44 = vor.u32 8388608, %v271_v56  ;;  %v888_v62 = vshrl.u32 %v887_v32, 23  ;;  %v6732_v27 = vand.u32 8388607, %v884_v57 }
 0x31e   :  { %v232_v21 = vsel %vm111_vm10, %v231_v20, %v230_v33  ;;  %v827_v37 = vadd.s32 %v826_v55, %v822_v63  ;;  %vm275_vm15 = vcmp.gt.s32.totalorder %v274_v42, 0  ;;  %v6734_v6 = vand.u32 3, %v253_v54 }
 0x31f   :  { %v6718_v48 = vsel %vm110_vm14, %v6458_v9, %v232_v21  ;;  %v276_v43 = vsel %vm275_vm15, %v274_v42, 0  ;;  %vm6740_vm1 = vcmp.le.f32.partialorder %v729_v31, 0.7853982  ;;  %v823_v13 = vadd.s32 %v818_v10, %v799_v29 }
 0x320   :  { %v6725_v26 = vmul.f32 %v6718_v48, %v6718_v48  ;;  %v828_v16 = vadd.s32 536870912, %v827_v37  ;;  %v278_v53 = vand.u32 31, %v276_v43  ;;  %v6746_v28 = vshll.u32 %v272_v44, 8 }
 0x321   :  { %v4409_v33 = vadd.s32 4294967169, %v888_v62  ;;  %v892_v14 = vor.u32 8388608, %v6732_v27  ;;  %v277_v20 = vshrl.u32 %v276_v43, 5  ;;  %vm256_vm15 = vcmp.eq.s32.totalorder %v6734_v6, 0 }
 0x322   :  { %v238_v22 = vmul.f32 -0.001358992, %v6725_v26  ;;  %v245_v45 = vmul.f32 -0.00019511016, %v6725_v26  ;;  %v829_v23 = vshrl.u32 %v828_v16, 30  ;;  %v279_v50 = vsub.s32 32, %v278_v53 }
 0x323   :  { %v281_v49 = vshll.u32 %v4540_v59, %v278_v53  ;;  %v284_v15 = vshll.u32 %v4541_v61, %v278_v53  ;;  %v287_v60 = vshll.u32 %v4542_v2, %v278_v53  ;;  %v290_v21 = vshll.u32 %v4543_v5, %v278_v53 }
 0x324   :  { %v246_v46 = vadd.f32 0.008332121, %v245_v45  ;;  %v239_v3 = vadd.f32 0.041655596, %v238_v22  ;;  %v830_v24 = vshll.u32 %v829_v23, 30  ;;  %v853_v47 = vsub.s32 4, %v829_v23 }
 0x325   :  { %v282_v25 = vshrl.u32 %v4541_v61, %v279_v50  ;;  %v285_v31 = vshrl.u32 %v4542_v2, %v279_v50  ;;  %v288_v29 = vshrl.u32 %v4543_v5, %v279_v50  ;;  %v291_v41 = vshrl.u32 %v4544_v8, %v279_v50 }
 0x326   :  { %v247_v7 = vmul.f32 %v246_v46, %v6725_v26  ;;  %v831_v39 = vsub.s32 %v827_v37, %v830_v24  ;;  %v240_v10 = vmul.f32 %v239_v3, %v6725_v26  ;;  %v854_v1 = vsel %vm731_vm11, %v853_v47, %v829_v23 }
 0x327   :  { %v283_v19 = vor.u32 %v282_v25, %v281_v49  ;;  %v293_v55 = vshll.u32 %v4544_v8, %v278_v53  ;;  %v294_v56 = vshrl.u32 %v4545_v11, %v279_v50  ;;  %v286_v32 = vor.u32 %v285_v31, %v284_v15 }
 0x328   :  { %v248_v58 = vadd.f32 -0.16666654, %v247_v7  ;;  %vm832_vm3 = vcmp.lt.s32.totalorder %v831_v39, 0  ;;  %v833_v17 = vsub.s32 0, %v831_v39  ;;  %v289_v54 = vor.u32 %v288_v29, %v287_v60 }
 0x329   :  { %v292_v22 = vor.u32 %v291_v41, %v290_v21  ;;  %v241_v43 = vadd.f32 -0.4999988, %v240_v10  ;;  %v313_v45 = vand.u32 65535, %v6746_v28  ;;  %v314_v16 = vshrl.u32 %v6746_v28, 16 }
 0x32a   :  { %v249_v63 = vmul.f32 %v248_v58, %v6725_v26  ;;  %v834_v42 = vsel %vm832_vm3, %v833_v17, %v831_v39  ;;  %v894_v44 = vadd.s32 1, %v4409_v33  ;;  %v856_v23 = vsel %vm6740_vm1, 0, %v854_v1 }
 0x32b   :  { %v835_v37 = vclz %v834_v42  ;;  %v280_v62 = vshrl.u32 %v4540_v59, %v279_v50  ;;  %vm296_vm12 = vcmp.lt.s32.totalorder %v277_v20, 1  ;;  %v295_v3 = vor.u32 %v294_v56, %v293_v55 }
 0x32c   :  { %v250_v53 = vadd.f32 1.0, %v249_v63  ;;  %vm298_vm6 = vcmp.lt.s32.totalorder %v277_v20, 3  ;;  %vm299_vm0 = vcmp.lt.s32.totalorder %v277_v20, 4  ;;  %v304_v24 = vsel %vm296_vm12, %v283_v19, %v286_v32 }
 0x32d   :  { %v4407_v46 = vadd.s32 4294967294, %v835_v37  ;;  %v301_v7 = vsel %vm299_vm0, %v289_v54, 2102212464  ;;  %v305_v47 = vsel %vm299_vm0, %v292_v22, 920167782  ;;  %v242_v49 = vmul.f32 %v241_v43, %v6725_v26 }
 0x32e   :  { %vm297_vm7 = vcmp.lt.s32.totalorder %v277_v20, 2  ;;  %v306_v58 = vsel %vm298_vm6, %v289_v54, %v305_v47  ;;  %v300_v15 = vsel %vm296_vm12, %v280_v62, %v283_v19  ;;  %v302_v31 = vsel %vm298_vm6, %v286_v32, %v301_v7 }
 0x32f   :  { %vm4408_vm5 = vcmp.lt.s32.totalorder %v4407_v46, 0  ;;  %v6774_v60 = vmul.f32 %v250_v53, %v6718_v48  ;;  %v307_v10 = vsel %vm297_vm7, %v304_v24, %v306_v58  ;;  %v308_v17 = vsel %vm296_vm12, %v286_v32, %v289_v54 }
 0x330   :  { %v838_v25 = vsel %vm4408_vm5, 0, %v4407_v46  ;;  %v309_v21 = vsel %vm299_vm0, %v295_v3, 1326507024  ;;  %v337_v41 = vand.u32 65535, %v307_v10  ;;  %v6780_v63 = vsel %vm297_vm7, %v300_v15, %v302_v31 }
 0x331   :  { %v839_v33 = vsub.s32 32, %v838_v25  ;;  %v843_v50 = vsub.s32 4294967266, %v838_v25  ;;  %v840_v29 = vshll.u32 %v831_v39, %v838_v25  ;;  %v310_v19 = vsel %vm298_vm6, %v292_v22, %v309_v21 }
 0x332   :  { %v338_v42 = vshrl.u32 %v307_v10, 16  ;;  %vm895_vm8 = vcmp.gt.s32.totalorder %v894_v44, 0  ;;  %v6783_v56 = vadd.s32 3, %v856_v23  ;;  %v311_v39 = vsel %vm297_vm7, %v308_v17, %v310_v19 }
 0x333   :  { %v841_v1 = vshrl.u32 %v823_v13, %v839_v33  ;;  %v844_v26 = vadd.s32 127, %v843_v50  ;;  %v315_v37 = vand.u32 65535, %v311_v39  ;;  %v316_v32 = vshrl.u32 %v311_v39, 16 }
 0x334   :  { %v340_v13 = vmul.u32 %v338_v42, %v313_v45  ;;  %v341_v54 = vmul.u32 %v337_v41, %v314_v16  ;;  %v6786_v43 = vadd.f32 1.0, %v242_v49  ;;  %v257_v46 = vxor.u32 2147483648, %v6774_v60 }
 0x335   :  { %v842_v55 = vor.u32 %v841_v1, %v840_v29  ;;  %v845_v48 = vshll.u32 %v844_v26, 23  ;;  %v357_v22 = vmul.u32 %v6746_v28, %v6780_v63  ;;  %v318_v53 = vmul.u32 %v316_v32, %v313_v45 }
 0x336   :  { %v319_v3 = vmul.u32 %v315_v37, %v314_v16  ;;  %v339_v7 = vmul.u32 %v337_v41, %v313_v45  ;;  %v896_v23 = vsel %vm895_vm8, %v894_v44, 0  ;;  %v342_v47 = vmul.u32 %v338_v42, %v314_v16 }
 0x337   :  { %v846_v62 = vor.u32 4788187, %v845_v48  ;;  %v849_v20 = vcvt.s32.f32 %v842_v55  ;;  %v343_v25 = vshll.u32 %v340_v13, 16  ;;  %v317_v58 = vmul.u32 %v315_v37, %v313_v45 }
 0x338   :  { %v320_v33 = vmul.u32 %v316_v32, %v314_v16  ;;  %v321_v50 = vshll.u32 %v318_v53, 16  ;;  %v345_v49 = vshll.u32 %v341_v54, 16  ;;  %v323_v31 = vshll.u32 %v319_v3, 16 }
 0x339   :  { %v847_v24 = vand.u32 2147483647, %v846_v62  ;;  %vm347_vm4 = vc.u32 %v339_v7, %v343_v25  ;;  %v349_v29 = vadd.s32 %v343_v25, %v339_v7  ;;  %v898_v1 = vand.u32 31, %v896_v23 }
 0x33a   :  { %vm325_vm10 = vc.u32 %v317_v58, %v321_v50  ;;  %v327_v10 = vadd.s32 %v321_v50, %v317_v58  ;;  %v348_v17 = vsel %vm347_vm4, 1, %v4539_v0  ;;  %v344_v45 = vshrl.u32 %v340_v13, 16 }
 0x33b   :  { %v850_v15 = vmul.f32 %v849_v20, %v847_v24  ;;  %v326_v44 = vsel %vm325_vm10, 1, %v4539_v0  ;;  %v350_v21 = vadd.s32 %v348_v17, %v342_v47  ;;  %vm351_vm13 = vc.u32 %v349_v29, %v345_v49 }
 0x33c   :  { %v328_v41 = vadd.s32 %v326_v44, %v320_v33  ;;  %vm329_vm14 = vc.u32 %v327_v10, %v323_v31  ;;  %v352_v16 = vsel %vm351_vm13, 1, %v4539_v0  ;;  %v6798_v48 = vsub.s32 32, %v898_v1 }
 0x33d   :  { %v851_v26 = vxor.u32 2147483648, %v850_v15  ;;  %v330_v42 = vsel %vm329_vm14, 1, %v4539_v0  ;;  %v354_v55 = vadd.s32 %v352_v16, %v350_v21  ;;  %v322_v37 = vshrl.u32 %v318_v53, 16 }
 0x33e   :  { %v332_v32 = vadd.s32 %v330_v42, %v328_v41  ;;  %v6805_v62 = vshrl.u32 %v896_v23, 5  ;;  %v324_v7 = vshrl.u32 %v319_v3, 16  ;;  %v346_v24 = vshrl.u32 %v341_v54, 16 }
 0x33f   :  { %v852_v19 = vsel %vm731_vm11, %v851_v26, %v850_v15  ;;  %v355_v20 = vadd.s32 %v354_v55, %v344_v45  ;;  %v6810_v25 = vadd.s32 %v349_v29, %v345_v49  ;;  %v901_v58 = vshll.u32 %v4540_v59, %v898_v1 }
 0x340   :  { %v6803_v39 = vsel %vm6740_vm1, %v6470_v30, %v852_v19  ;;  %v333_v47 = vadd.s32 %v332_v32, %v322_v37  ;;  %v904_v35 = vshll.u32 %v4541_v61, %v898_v1  ;;  %v902_v23 = vshrl.u32 %v4541_v61, %v6798_v48 }
 0x341   :  { %v857_v13 = vmul.f32 %v6803_v39, %v6803_v39  ;;  %v356_v50 = vadd.s32 %v355_v20, %v346_v24  ;;  %v905_v3 = vshrl.u32 %v4542_v2, %v6798_v48  ;;  %v908_v54 = vshrl.u32 %v4543_v5, %v6798_v48 }
 0x342   :  { %v6816_v15 = vadd.s32 %v333_v47, %v324_v7  ;;  %v910_v49 = vshll.u32 %v4543_v5, %v898_v1  ;;  %v911_v17 = vshrl.u32 %v4544_v8, %v6798_v48  ;;  %vm259_vm11 = vcmp.eq.s32.totalorder %v6734_v6, 2 }
 0x343   :  { %v858_v33 = vmul.f32 -0.001358992, %v857_v13  ;;  %v865_v53 = vmul.f32 -0.00019511016, %v857_v13  ;;  %v360_v10 = vadd.s32 1, %v356_v50  ;;  %v907_v26 = vshll.u32 %v4542_v2, %v898_v1 }
 0x344   :  { %vm359_vm1 = vc.u32 %v6816_v15, %v6810_v25  ;;  %v913_v44 = vshll.u32 %v4544_v8, %v898_v1  ;;  %v914_v21 = vshrl.u32 %v4545_v11, %v6798_v48  ;;  %vm255_vm3 = vcmp.lt.s32.totalorder %v6734_v6, 2 }
 0x345   :  { %v859_v31 = vadd.f32 0.041655596, %v858_v33  ;;  %v866_v29 = vadd.f32 0.008332121, %v865_v53  ;;  %v361_v16 = vsel %vm359_vm1, %v360_v10, %v356_v50  ;;  %v912_v19 = vor.u32 %v911_v17, %v910_v49 }
 0x346   :  { %v874_v42 = vand.u32 3, %v6783_v56  ;;  %v362_v55 = vadd.s32 %v361_v16, %v357_v22  ;;  %v6837_v37 = vor.u32 %v905_v3, %v904_v35  ;;  %v909_v32 = vor.u32 %v908_v54, %v907_v26 }
 0x347   :  { %v860_v41 = vmul.f32 %v859_v31, %v857_v13  ;;  %v867_v45 = vmul.f32 %v866_v29, %v857_v13  ;;  %v6839_v24 = vor.u32 %v902_v23, %v901_v58  ;;  %v915_v20 = vor.u32 %v914_v21, %v913_v44 }
 0x348   :  { %v258_v47 = vsel %vm256_vm15, %v6786_v43, %v257_v46  ;;  %v260_v56 = vxor.u32 2147483648, %v6786_v43  ;;  %v363_v33 = vadd.s32 536870912, %v362_v55  ;;  %vm919_vm12 = vcmp.lt.s32.totalorder %v6805_v62, 4 }
 0x349   :  { %v861_v7 = vadd.f32 -0.4999988, %v860_v41  ;;  %v868_v1 = vadd.f32 -0.16666654, %v867_v45  ;;  %vm916_vm6 = vcmp.lt.s32.totalorder %v6805_v62, 1  ;;  %vm252_vm0 = vweird.f32 %v6458_v9 }
 0x34a   :  { %v925_v22 = vsel %vm919_vm12, %v912_v19, 920167782  ;;  %vm872_vm5 = vweird.f32 %v6470_v30  ;;  %v6853_v58 = vshrl.u32 %v363_v33, 30  ;;  %vm917_vm7 = vcmp.lt.s32.totalorder %v6805_v62, 2 }
 0x34b   :  { %v862_v28 = vmul.f32 %v861_v7, %v857_v13  ;;  %v869_v63 = vmul.f32 %v868_v1, %v857_v13  ;;  %vm918_vm8 = vcmp.lt.s32.totalorder %v6805_v62, 3  ;;  %v928_v43 = vsel %vm916_vm6, %v6837_v37, %v909_v32 }
 0x34c   :  { %v924_v35 = vsel %vm916_vm6, %v6839_v24, %v6837_v37  ;;  %v929_v53 = vsel %vm919_vm12, %v915_v20, 1326507024  ;;  %v365_v50 = vshll.u32 %v6853_v58, 30  ;;  %v926_v23 = vsel %vm918_vm8, %v909_v32, %v925_v22 }
 0x34d   :  { %v863_v46 = vadd.f32 1.0, %v862_v28  ;;  %v870_v13 = vadd.f32 1.0, %v869_v63  ;;  %v930_v3 = vsel %vm918_vm8, %v912_v19, %v929_v53  ;;  %v6873_v54 = vshll.u32 %v892_v14, 8 }
 0x34e   :  { %v261_v49 = vsel %vm259_vm11, %v260_v56, %v6774_v60  ;;  %v931_v10 = vsel %vm917_vm7, %v928_v43, %v930_v3  ;;  %vm876_vm4 = vcmp.eq.s32.totalorder %v874_v42, 0  ;;  %vm879_vm10 = vcmp.eq.s32.totalorder %v874_v42, 2 }
 0x34f   :  { %v871_v31 = vmul.f32 %v870_v13, %v6803_v39  ;;  %v880_v29 = vxor.u32 2147483648, %v863_v46  ;;  %v262_v17 = vsel %vm255_vm3, %v258_v47, %v261_v49  ;;  %v366_v26 = vsub.s32 %v362_v55, %v365_v50 }
 0x350   :  { %v927_v27 = vsel %vm917_vm7, %v924_v35, %v926_v23  ;;  %v934_v14 = vshrl.u32 %v6873_v54, 16  ;;  %v935_v21 = vand.u32 65535, %v931_v10  ;;  %v933_v39 = vand.u32 65535, %v6873_v54 }
 0x351   :  { %v877_v44 = vxor.u32 2147483648, %v871_v31  ;;  %vm367_vm13 = vcmp.lt.s32.totalorder %v366_v26, 0  ;;  %v368_v60 = vsub.s32 0, %v366_v26  ;;  %v936_v41 = vshrl.u32 %v931_v10, 16 }
 0x352   :  { %vm875_vm14 = vcmp.lt.s32.totalorder %v874_v42, 2  ;;  %v881_v16 = vsel %vm879_vm10, %v880_v29, %v871_v31  ;;  %v939_v6 = vmul.u32 %v935_v21, %v934_v14  ;;  %v958_v55 = vshrl.u32 %v927_v27, 16 }
 0x353   :  { %v878_v45 = vsel %vm876_vm4, %v863_v46, %v877_v44  ;;  %v369_v7 = vsel %vm367_vm13, %v368_v60, %v366_v26  ;;  %v938_v1 = vmul.u32 %v936_v41, %v933_v39  ;;  %v263_v20 = vsel %vm252_vm0, nan, %v262_v17 }
 0x354   :  { %v882_v19 = vsel %vm875_vm14, %v878_v45, %v881_v16  ;;  %v370_v56 = vclz %v369_v7  ;;  %v957_v33 = vand.u32 65535, %v927_v27  ;;  %v900_v63 = vshrl.u32 %v4540_v59, %v6798_v48 }
 0x355   :  { %v883_v47 = vsel %vm872_vm5, nan, %v882_v19  ;;  %v358_v42 = vadd.s32 %v6810_v25, %v6816_v15  ;;  %v937_v43 = vmul.u32 %v935_v21, %v933_v39  ;;  %v941_v46 = vshll.u32 %v938_v1, 16 }
 0x356   :  { %v1969_v28 = vpack.c.bf16 %v883_v47, %v263_v20  ;;  %v4398_v22 = vadd.s32 4294967294, %v370_v56  ;;  %v921_v9 = vsel %vm919_vm12, %v909_v32, 2102212464  ;;  %v940_v13 = vmul.u32 %v936_v41, %v934_v14 }
 0x357   :  { %v943_v35 = vshll.u32 %v939_v6, 16  ;;  %v960_v30 = vmul.u32 %v958_v55, %v933_v39  ;;  %vm945_vm11 = vc.u32 %v937_v43, %v941_v46  ;;  %v947_v53 = vadd.s32 %v941_v46, %v937_v43 }
 0x358   :  { %4031 = vmatpush.bf16.msrb.mxu0 %v1969_v28  ;;  %vm4399_vm15 = vcmp.lt.s32.totalorder %v4398_v22, 0  ;;  %v959_v50 = vmul.u32 %v957_v33, %v933_v39  ;;  %v946_v48 = vsel %vm945_vm11, 1, %v4539_v0  ;;  %v961_v3 = vmul.u32 %v957_v33, %v934_v14 }
 0x359   :  { %v373_v23 = vsel %vm4399_vm15, 0, %v4398_v22  ;;  %v963_v49 = vshll.u32 %v960_v30, 16  ;;  %v942_v31 = vshrl.u32 %v938_v1, 16  ;;  %v948_v29 = vadd.s32 %v946_v48, %v940_v13 }
 0x35a   :  { %v374_v25 = vsub.s32 32, %v373_v23  ;;  %v378_v15 = vsub.s32 4294967266, %v373_v23  ;;  %v375_v10 = vshll.u32 %v366_v26, %v373_v23  ;;  %vm949_vm1 = vc.u32 %v947_v53, %v943_v35 }
 0x35b   :  { %v962_v17 = vmul.u32 %v958_v55, %v934_v14  ;;  %vm967_vm3 = vc.u32 %v959_v50, %v963_v49  ;;  %v950_v27 = vsel %vm949_vm1, 1, %v4539_v0  ;;  %v965_v39 = vshll.u32 %v961_v3, 16 }
 0x35c   :  { %v376_v32 = vshrl.u32 %v358_v42, %v374_v25  ;;  %v379_v44 = vadd.s32 127, %v378_v15  ;;  %v968_v21 = vsel %vm967_vm3, 1, %v4539_v0  ;;  %v952_v60 = vadd.s32 %v950_v27, %v948_v29 }
 0x35d   :  { %v969_v41 = vadd.s32 %v963_v49, %v959_v50  ;;  %v970_v45 = vadd.s32 %v968_v21, %v962_v17  ;;  %v72_v7 = vmul.f32 %v6231_v34, %v4959_v18  ;;  %v920_v26 = vsel %vm916_vm6, %v900_v63, %v6839_v24 }
 0x35e   :  { %v377_v16 = vor.u32 %v376_v32, %v375_v10  ;;  %v380_v19 = vshll.u32 %v379_v44, 23  ;;  %v922_v14 = vsel %vm918_vm8, %v6837_v37, %v921_v9  ;;  %v953_v1 = vadd.s32 %v952_v60, %v942_v31 }
 0x35f   :  { %vm971_vm12 = vc.u32 %v969_v41, %v965_v39  ;;  %v944_v20 = vshrl.u32 %v939_v6, 16  ;;  %v6910_v56 = vadd.f32 %v4993_v12, %v72_v7  ;;  %v388_v33 = vsub.s32 4, %v6853_v58 }
 0x360   :  { %v381_v55 = vor.u32 4788187, %v380_v19  ;;  %v972_v47 = vsel %vm971_vm12, 1, %v4539_v0  ;;  %v964_v28 = vshrl.u32 %v960_v30, 16  ;;  %v76_v24 = vmul.f32 %v6231_v34, %v5131_v36 }
 0x361   :  { %v974_v42 = vadd.s32 %v972_v47, %v970_v45  ;;  %v384_v22 = vcvt.s32.f32 %v377_v16  ;;  %v954_v43 = vadd.s32 %v953_v1, %v944_v20  ;;  %v422_v37 = vand.u32 2139095040, %v6910_v56 }
 0x362   :  { %v382_v63 = vand.u32 2147483647, %v381_v55  ;;  %vm266_vm6 = vcmp.lt.s32.totalorder %v6696_v38, 0  ;;  %v966_v6 = vshrl.u32 %v961_v3, 16  ;;  %v923_v13 = vsel %vm917_vm7, %v920_v26, %v922_v14 }
 0x363   :  { %v975_v46 = vadd.s32 %v974_v42, %v964_v28  ;;  %v973_v35 = vadd.s32 %v969_v41, %v965_v39  ;;  %v423_v53 = vshrl.u32 %v422_v37, 23  ;;  %v389_v30 = vsel %vm266_vm6, %v388_v33, %v6853_v58 }
 0x364   :  { %v385_v9 = vmul.f32 %v384_v22, %v382_v63  ;;  %v6923_v50 = vadd.f32 %v5151_v40, %v76_v24  ;;  %v419_v23 = vand.u32 2147483647, %v6910_v56  ;;  %vm265_vm5 = vcmp.le.f32.partialorder %v264_v52, 0.7853982 }
 0x365   :  { %v976_v34 = vadd.s32 %v975_v46, %v966_v6  ;;  %vm979_vm0 = vc.u32 %v954_v43, %v973_v35  ;;  %v4400_v3 = vadd.s32 4294967169, %v423_v53  ;;  %v391_v25 = vsel %vm265_vm5, 0, %v389_v30 }
 0x366   :  { %v386_v48 = vxor.u32 2147483648, %v385_v9  ;;  %v977_v15 = vmul.u32 %v6873_v54, %v923_v13  ;;  %v426_v10 = vand.u32 8388607, %v419_v23  ;;  %v1039_v17 = vand.u32 2147483647, %v6923_v50 }
 0x367   :  { %v980_v62 = vadd.s32 1, %v976_v34  ;;  %v429_v58 = vadd.s32 1, %v4400_v3  ;;  %v1042_v44 = vand.u32 2139095040, %v6923_v50  ;;  %v408_v27 = vadd.s32 3, %v391_v25 }
 0x368   :  { %v387_v49 = vsel %vm266_vm6, %v386_v48, %v385_v9  ;;  %v427_v41 = vor.u32 8388608, %v426_v10  ;;  %v6946_v26 = vand.u32 8388607, %v1039_v17  ;;  %vm886_vm8 = vcmp.lt.s32.totalorder %v6709_v51, 0 }
 0x369   :  { %v6932_v31 = vsel %vm265_vm5, %v6696_v38, %v387_v49  ;;  %v981_v29 = vsel %vm979_vm0, %v980_v62, %v976_v34  ;;  %vm430_vm7 = vcmp.gt.s32.totalorder %v429_v58, 0  ;;  %v1043_v7 = vshrl.u32 %v1042_v44, 23 }
 0x36a   :  { %v6939_v52 = vmul.f32 %v6932_v31, %v6932_v31  ;;  %v982_v32 = vadd.s32 %v981_v29, %v977_v15  ;;  %v431_v54 = vsel %vm430_vm7, %v429_v58, 0  ;;  %v6948_v14 = vand.u32 3, %v408_v27 }
 0x36b   :  { %v433_v45 = vand.u32 31, %v431_v54  ;;  %vm6954_vm4 = vcmp.le.f32.partialorder %v884_v57, 0.7853982  ;;  %v978_v33 = vadd.s32 %v973_v35, %v954_v43  ;;  %v6960_v22 = vshll.u32 %v427_v41, 8 }
 0x36c   :  { %v393_v21 = vmul.f32 -0.001358992, %v6939_v52  ;;  %v400_v60 = vmul.f32 -0.00019511016, %v6939_v52  ;;  %v983_v39 = vadd.s32 536870912, %v982_v32  ;;  %v4412_v46 = vadd.s32 4294967169, %v1043_v7 }
 0x36d   :  { %v434_v1 = vsub.s32 32, %v433_v45  ;;  %v436_v24 = vshll.u32 %v4540_v59, %v433_v45  ;;  %v1047_v9 = vor.u32 8388608, %v6946_v26  ;;  %v439_v13 = vshll.u32 %v4541_v61, %v433_v45 }
 0x36e   :  { %v401_v16 = vadd.f32 0.008332121, %v400_v60  ;;  %v984_v19 = vshrl.u32 %v983_v39, 30  ;;  %v394_v55 = vadd.f32 0.041655596, %v393_v21  ;;  %v442_v53 = vshll.u32 %v4542_v2, %v433_v45 }
 0x36f   :  { %v437_v63 = vshrl.u32 %v4541_v61, %v434_v1  ;;  %v440_v57 = vshrl.u32 %v4542_v2, %v434_v1  ;;  %v443_v43 = vshrl.u32 %v4543_v5, %v434_v1  ;;  %v432_v34 = vshrl.u32 %v431_v54, 5 }
 0x370   :  { %v402_v20 = vmul.f32 %v401_v16, %v6939_v52  ;;  %v985_v28 = vshll.u32 %v984_v19, 30  ;;  %v1008_v42 = vsub.s32 4, %v984_v19  ;;  %v395_v35 = vmul.f32 %v394_v55, %v6939_v52 }
 0x371   :  { %v438_v3 = vor.u32 %v437_v63, %v436_v24  ;;  %v445_v62 = vshll.u32 %v4543_v5, %v433_v45  ;;  %v446_v49 = vshrl.u32 %v4544_v8, %v434_v1  ;;  %v448_v58 = vshll.u32 %v4544_v8, %v433_v45 }
 0x372   :  { %v403_v37 = vadd.f32 -0.16666654, %v402_v20  ;;  %v986_v6 = vsub.s32 %v982_v32, %v985_v28  ;;  %v1009_v48 = vsel %vm886_vm8, %v1008_v42, %v984_v19  ;;  %v449_v29 = vshrl.u32 %v4545_v11, %v434_v1 }
 0x373   :  { %v441_v32 = vor.u32 %v440_v57, %v439_v13  ;;  %v444_v44 = vor.u32 %v443_v43, %v442_v53  ;;  %v447_v27 = vor.u32 %v446_v49, %v445_v62  ;;  %v396_v54 = vadd.f32 -0.4999988, %v395_v35 }
 0x374   :  { %vm987_vm10 = vcmp.lt.s32.totalorder %v986_v6, 0  ;;  %v988_v30 = vsub.s32 0, %v986_v6  ;;  %v404_v25 = vmul.f32 %v403_v37, %v6939_v52  ;;  %v468_v21 = vand.u32 65535, %v6960_v22 }
 0x375   :  { %v469_v60 = vshrl.u32 %v6960_v22, 16  ;;  %v1049_v39 = vadd.s32 1, %v4412_v46  ;;  %v1011_v16 = vsel %vm6954_vm4, 0, %v1009_v48  ;;  %v435_v19 = vshrl.u32 %v4540_v59, %v434_v1 }
 0x376   :  { %v989_v15 = vsel %vm987_vm10, %v988_v30, %v986_v6  ;;  %vm451_vm13 = vcmp.lt.s32.totalorder %v432_v34, 1  ;;  %v405_v45 = vadd.f32 1.0, %v404_v25  ;;  %v450_v7 = vor.u32 %v449_v29, %v448_v58 }
 0x377   :  { %v990_v10 = vclz %v989_v15  ;;  %vm453_vm14 = vcmp.lt.s32.totalorder %v432_v34, 3  ;;  %vm454_vm15 = vcmp.lt.s32.totalorder %v432_v34, 4  ;;  %v459_v20 = vsel %vm451_vm13, %v438_v3, %v441_v32 }
 0x378   :  { %v456_v55 = vsel %vm454_vm15, %v444_v44, 2102212464  ;;  %v460_v28 = vsel %vm454_vm15, %v447_v27, 920167782  ;;  %v397_v42 = vmul.f32 %v396_v54, %v6939_v52  ;;  %vm452_vm1 = vcmp.lt.s32.totalorder %v432_v34, 2 }
 0x379   :  { %v4410_v41 = vadd.s32 4294967294, %v990_v10  ;;  %v461_v63 = vsel %vm453_vm14, %v444_v44, %v460_v28  ;;  %v455_v46 = vsel %vm451_vm13, %v435_v19, %v438_v3  ;;  %v457_v13 = vsel %vm453_vm14, %v441_v32, %v456_v55 }
 0x37a   :  { %v6988_v57 = vmul.f32 %v405_v45, %v6932_v31  ;;  %v462_v43 = vsel %vm452_vm1, %v459_v20, %v461_v63  ;;  %v463_v35 = vsel %vm451_vm13, %v441_v32, %v444_v44  ;;  %v464_v48 = vsel %vm454_vm15, %v450_v7, 1326507024 }
 0x37b   :  { %vm4411_vm11 = vcmp.lt.s32.totalorder %v4410_v41, 0  ;;  %v492_v62 = vand.u32 65535, %v462_v43  ;;  %v6994_v49 = vsel %vm452_vm1, %v455_v46, %v457_v13  ;;  %v465_v3 = vsel %vm453_vm14, %v447_v27, %v464_v48 }
 0x37c   :  { %v993_v24 = vsel %vm4411_vm11, 0, %v4410_v41  ;;  %v493_v25 = vshrl.u32 %v462_v43, 16  ;;  %vm1050_vm3 = vcmp.gt.s32.totalorder %v1049_v39, 0  ;;  %v6997_v58 = vadd.s32 3, %v1011_v16 }
 0x37d   :  { %v994_v37 = vsub.s32 32, %v993_v24  ;;  %v998_v1 = vsub.s32 4294967266, %v993_v24  ;;  %v995_v53 = vshll.u32 %v986_v6, %v993_v24  ;;  %v466_v6 = vsel %vm452_vm1, %v463_v35, %v465_v3 }
 0x37e   :  { %v470_v29 = vand.u32 65535, %v466_v6  ;;  %v471_v10 = vshrl.u32 %v466_v6, 16  ;;  %v496_v32 = vmul.u32 %v492_v62, %v469_v60  ;;  %v7000_v44 = vadd.f32 1.0, %v397_v42 }
 0x37f   :  { %v996_v30 = vshrl.u32 %v978_v33, %v994_v37  ;;  %v999_v52 = vadd.s32 127, %v998_v1  ;;  %v495_v33 = vmul.u32 %v493_v25, %v468_v21  ;;  %v412_v54 = vxor.u32 2147483648, %v6988_v57 }
 0x380   :  { %v512_v27 = vmul.u32 %v6960_v22, %v6994_v49  ;;  %v473_v19 = vmul.u32 %v471_v10, %v468_v21  ;;  %v474_v45 = vmul.u32 %v470_v29, %v469_v60  ;;  %v494_v7 = vmul.u32 %v492_v62, %v468_v21 }
 0x381   :  { %v997_v15 = vor.u32 %v996_v30, %v995_v53  ;;  %v1000_v31 = vshll.u32 %v999_v52, 23  ;;  %v1051_v16 = vsel %vm1050_vm3, %v1049_v39, 0  ;;  %v497_v20 = vmul.u32 %v493_v25, %v469_v60 }
 0x382   :  { %v498_v28 = vshll.u32 %v495_v33, 16  ;;  %v472_v24 = vmul.u32 %v470_v29, %v468_v21  ;;  %v475_v63 = vmul.u32 %v471_v10, %v469_v60  ;;  %v476_v37 = vshll.u32 %v473_v19, 16 }
 0x383   :  { %v1001_v41 = vor.u32 4788187, %v1000_v31  ;;  %v1004_v34 = vcvt.s32.f32 %v997_v15  ;;  %v500_v42 = vshll.u32 %v496_v32, 16  ;;  %v478_v46 = vshll.u32 %v474_v45, 16 }
 0x384   :  { %vm502_vm12 = vc.u32 %v494_v7, %v498_v28  ;;  %v504_v13 = vadd.s32 %v498_v28, %v494_v7  ;;  %vm480_vm6 = vc.u32 %v472_v24, %v476_v37  ;;  %v482_v53 = vadd.s32 %v476_v37, %v472_v24 }
 0x385   :  { %v1002_v55 = vand.u32 2147483647, %v1001_v41  ;;  %v503_v43 = vsel %vm502_vm12, 1, %v4539_v0  ;;  %v1053_v35 = vand.u32 31, %v1051_v16  ;;  %v481_v39 = vsel %vm480_vm6, 1, %v4539_v0 }
 0x386   :  { %v505_v52 = vadd.s32 %v503_v43, %v497_v20  ;;  %vm506_vm0 = vc.u32 %v504_v13, %v500_v42  ;;  %v483_v48 = vadd.s32 %v481_v39, %v475_v63  ;;  %vm484_vm5 = vc.u32 %v482_v53, %v478_v46 }
 0x387   :  { %v1005_v1 = vmul.f32 %v1004_v34, %v1002_v55  ;;  %v499_v21 = vshrl.u32 %v495_v33, 16  ;;  %v507_v60 = vsel %vm506_vm0, 1, %v4539_v0  ;;  %v485_v3 = vsel %vm484_vm5, 1, %v4539_v0 }
 0x388   :  { %v509_v25 = vadd.s32 %v507_v60, %v505_v52  ;;  %v7012_v15 = vsub.s32 32, %v1053_v35  ;;  %v477_v6 = vshrl.u32 %v473_v19, 16  ;;  %v487_v29 = vadd.s32 %v485_v3, %v483_v48 }
 0x389   :  { %v1006_v30 = vxor.u32 2147483648, %v1005_v1  ;;  %v7019_v10 = vshrl.u32 %v1051_v16, 5  ;;  %vm411_vm7 = vcmp.eq.s32.totalorder %v6948_v14, 0  ;;  %v479_v41 = vshrl.u32 %v474_v45, 16 }
 0x38a   :  { %v501_v7 = vshrl.u32 %v496_v32, 16  ;;  %v510_v55 = vadd.s32 %v509_v25, %v499_v21  ;;  %v488_v34 = vadd.s32 %v487_v29, %v477_v6  ;;  %v7024_v20 = vadd.s32 %v504_v13, %v500_v42 }
 0x38b   :  { %v1007_v62 = vsel %vm886_vm8, %v1006_v30, %v1005_v1  ;;  %v1056_v28 = vshll.u32 %v4540_v59, %v1053_v35  ;;  %v1059_v47 = vshll.u32 %v4541_v61, %v1053_v35  ;;  %v1057_v16 = vshrl.u32 %v4541_v61, %v7012_v15 }
 0x38c   :  { %v7017_v31 = vsel %vm6954_vm4, %v6709_v51, %v1007_v62  ;;  %v511_v63 = vadd.s32 %v510_v55, %v501_v7  ;;  %v7030_v37 = vadd.s32 %v488_v34, %v479_v41  ;;  %v1060_v45 = vshrl.u32 %v4542_v2, %v7012_v15 }
 0x38d   :  { %v1012_v33 = vmul.f32 %v7017_v31, %v7017_v31  ;;  %v1063_v32 = vshrl.u32 %v4543_v5, %v7012_v15  ;;  %v1065_v42 = vshll.u32 %v4543_v5, %v1053_v35  ;;  %v1066_v53 = vshrl.u32 %v4544_v8, %v7012_v15 }
 0x38e   :  { %v515_v13 = vadd.s32 1, %v511_v63  ;;  %vm414_vm8 = vcmp.eq.s32.totalorder %v6948_v14, 2  ;;  %vm514_vm4 = vc.u32 %v7030_v37, %v7024_v20  ;;  %v1062_v43 = vshll.u32 %v4542_v2, %v1053_v35 }
 0x38f   :  { %v1013_v24 = vmul.f32 -0.001358992, %v1012_v33  ;;  %v1020_v19 = vmul.f32 -0.00019511016, %v1012_v33  ;;  %v1068_v30 = vshll.u32 %v4544_v8, %v1053_v35  ;;  %v1069_v39 = vshrl.u32 %v4545_v11, %v7012_v15 }
 0x390   :  { %vm410_vm10 = vcmp.lt.s32.totalorder %v6948_v14, 2  ;;  %v516_v21 = vsel %vm514_vm4, %v515_v13, %v511_v63  ;;  %v1067_v60 = vor.u32 %v1066_v53, %v1065_v42  ;;  %v1029_v62 = vand.u32 3, %v6997_v58 }
 0x391   :  { %v1014_v1 = vadd.f32 0.041655596, %v1013_v24  ;;  %v1021_v46 = vadd.f32 0.008332121, %v1020_v19  ;;  %v517_v3 = vadd.s32 %v516_v21, %v512_v27  ;;  %v7051_v25 = vor.u32 %v1060_v45, %v1059_v47 }
 0x392   :  { %v1064_v6 = vor.u32 %v1063_v32, %v1062_v43  ;;  %v7053_v41 = vor.u32 %v1057_v16, %v1056_v28  ;;  %v1070_v7 = vor.u32 %v1069_v39, %v1068_v30  ;;  %v413_v55 = vsel %vm411_vm7, %v7000_v44, %v412_v54 }
 0x393   :  { %v1015_v52 = vmul.f32 %v1014_v1, %v1012_v33  ;;  %v1022_v48 = vmul.f32 %v1021_v46, %v1012_v33  ;;  %v415_v58 = vxor.u32 2147483648, %v7000_v44  ;;  %v518_v34 = vadd.s32 536870912, %v517_v3 }
 0x394   :  { %vm1074_vm13 = vcmp.lt.s32.totalorder %v7019_v10, 4  ;;  %vm1071_vm14 = vcmp.lt.s32.totalorder %v7019_v10, 1  ;;  %vm407_vm15 = vweird.f32 %v6696_v38  ;;  %vm1027_vm11 = vweird.f32 %v6709_v51 }
 0x395   :  { %v1016_v29 = vadd.f32 -0.4999988, %v1015_v52  ;;  %v1023_v35 = vadd.f32 -0.16666654, %v1022_v48  ;;  %v1080_v27 = vsel %vm1074_vm13, %v1067_v60, 920167782  ;;  %v1083_v44 = vsel %vm1071_vm14, %v7051_v25, %v1064_v6 }
 0x396   :  { %v7067_v28 = vshrl.u32 %v518_v34, 30  ;;  %vm1072_vm1 = vcmp.lt.s32.totalorder %v7019_v10, 2  ;;  %vm1073_vm3 = vcmp.lt.s32.totalorder %v7019_v10, 3  ;;  %v1079_v47 = vsel %vm1071_vm14, %v7053_v41, %v7051_v25 }
 0x397   :  { %v1017_v22 = vmul.f32 %v1016_v29, %v1012_v33  ;;  %v1024_v49 = vmul.f32 %v1023_v35, %v1012_v33  ;;  %v1084_v24 = vsel %vm1074_vm13, %v1070_v7, 1326507024  ;;  %v1081_v63 = vsel %vm1073_vm3, %v1064_v6, %v1080_v27 }
 0x398   :  { %v520_v19 = vshll.u32 %v7067_v28, 30  ;;  %v1085_v16 = vsel %vm1073_vm3, %v1067_v60, %v1084_v24  ;;  %v7087_v45 = vshll.u32 %v1047_v9, 8  ;;  %v416_v32 = vsel %vm414_vm8, %v415_v58, %v6988_v57 }
 0x399   :  { %v1018_v54 = vadd.f32 1.0, %v1017_v22  ;;  %v1025_v33 = vadd.f32 1.0, %v1024_v49  ;;  %v1086_v46 = vsel %vm1072_vm1, %v1083_v44, %v1085_v16  ;;  %v417_v13 = vsel %vm410_vm10, %v413_v55, %v416_v32 }
 0x39a   :  { %vm1031_vm12 = vcmp.eq.s32.totalorder %v1029_v62, 0  ;;  %vm1034_vm6 = vcmp.eq.s32.totalorder %v1029_v62, 2  ;;  %v521_v53 = vsub.s32 %v517_v3, %v520_v19  ;;  %v1082_v26 = vsel %vm1072_vm1, %v1079_v47, %v1081_v63 }
 0x39b   :  { %v1026_v42 = vmul.f32 %v1025_v33, %v7017_v31  ;;  %v1035_v1 = vxor.u32 2147483648, %v1018_v54  ;;  %v1089_v9 = vshrl.u32 %v7087_v45, 16  ;;  %v1090_v30 = vand.u32 65535, %v1086_v46 }
 0x39c   :  { %vm522_vm0 = vcmp.lt.s32.totalorder %v521_v53, 0  ;;  %v523_v57 = vsub.s32 0, %v521_v53  ;;  %v1088_v31 = vand.u32 65535, %v7087_v45  ;;  %v1091_v39 = vshrl.u32 %v1086_v46, 16 }
 0x39d   :  { %v1032_v43 = vxor.u32 2147483648, %v1026_v42  ;;  %vm1030_vm5 = vcmp.lt.s32.totalorder %v1029_v62, 2  ;;  %v1036_v48 = vsel %vm1034_vm6, %v1035_v1, %v1026_v42  ;;  %v1094_v14 = vmul.u32 %v1090_v30, %v1089_v9 }
 0x39e   :  { %v524_v60 = vsel %vm522_vm0, %v523_v57, %v521_v53  ;;  %v1093_v29 = vmul.u32 %v1091_v39, %v1088_v31  ;;  %v1113_v3 = vshrl.u32 %v1082_v26, 16  ;;  %v418_v35 = vsel %vm407_vm15, nan, %v417_v13 }
 0x39f   :  { %v1033_v52 = vsel %vm1031_vm12, %v1018_v54, %v1032_v43  ;;  %v525_v55 = vclz %v524_v60  ;;  %v1112_v58 = vand.u32 65535, %v1082_v26  ;;  %v1055_v22 = vshrl.u32 %v4540_v59, %v7012_v15 }
 0x3a0   :  { %v1037_v21 = vsel %vm1030_vm5, %v1033_v52, %v1036_v48  ;;  %v513_v62 = vadd.s32 %v7024_v20, %v7030_v37  ;;  %v1092_v27 = vmul.u32 %v1090_v30, %v1088_v31  ;;  %v1096_v44 = vshll.u32 %v1093_v29, 16 }
 0x3a1   :  { %v1038_v7 = vsel %vm1027_vm11, nan, %v1037_v21  ;;  %v4401_v49 = vadd.s32 4294967294, %v525_v55  ;;  %v1076_v38 = vsel %vm1074_vm13, %v1064_v6, 2102212464  ;;  %v1095_v54 = vmul.u32 %v1091_v39, %v1089_v9 }
 0x3a2   :  { %v1970_v34 = vpack.c.bf16 %v1038_v7, %v418_v35  ;;  %v1098_v33 = vshll.u32 %v1094_v14, 16  ;;  %v1115_v51 = vmul.u32 %v1113_v3, %v1088_v31  ;;  %vm1100_vm8 = vc.u32 %v1092_v27, %v1096_v44 }
 0x3a3   :  { %vm4402_vm7 = vcmp.lt.s32.totalorder %v4401_v49, 0  ;;  %v1102_v47 = vadd.s32 %v1096_v44, %v1092_v27  ;;  %v1114_v24 = vmul.u32 %v1112_v58, %v1088_v31  ;;  %v1101_v15 = vsel %vm1100_vm8, 1, %v4539_v0 }
 0x3a4   :  { %4050 = vmatpush.bf16.msrb.mxu1 %v1970_v34  ;;  %v528_v19 = vsel %vm4402_vm7, 0, %v4401_v49  ;;  %v1116_v63 = vmul.u32 %v1112_v58, %v1089_v9  ;;  %v1118_v16 = vshll.u32 %v1115_v51, 16  ;;  %v1097_v32 = vshrl.u32 %v1093_v29, 16 }
 0x3a5   :  { %v529_v20 = vsub.s32 32, %v528_v19  ;;  %v533_v37 = vsub.s32 4294967266, %v528_v19  ;;  %v1103_v42 = vadd.s32 %v1101_v15, %v1095_v54  ;;  %v530_v1 = vshll.u32 %v521_v53, %v528_v19 }
 0x3a6   :  { %vm1104_vm4 = vc.u32 %v1102_v47, %v1098_v33  ;;  %v1117_v46 = vmul.u32 %v1113_v3, %v1089_v9  ;;  %vm1122_vm10 = vc.u32 %v1114_v24, %v1118_v16  ;;  %v1120_v57 = vshll.u32 %v1116_v63, 16 }
 0x3a7   :  { %v531_v6 = vshrl.u32 %v513_v62, %v529_v20  ;;  %v534_v13 = vadd.s32 127, %v533_v37  ;;  %v1105_v43 = vsel %vm1104_vm4, 1, %v4539_v0  ;;  %v1123_v26 = vsel %vm1122_vm10, 1, %v4539_v0 }
 0x3a8   :  { %v1107_v30 = vadd.s32 %v1105_v43, %v1103_v42  ;;  %v1124_v31 = vadd.s32 %v1118_v16, %v1114_v24  ;;  %v1125_v39 = vadd.s32 %v1123_v26, %v1117_v46  ;;  %v73_v21 = vmul.f32 %v6241_v4, %v4959_v18 }
 0x3a9   :  { %v532_v52 = vor.u32 %v531_v6, %v530_v1  ;;  %v535_v48 = vshll.u32 %v534_v13, 23  ;;  %v1075_v53 = vsel %vm1071_vm14, %v1055_v22, %v7053_v41  ;;  %v1077_v9 = vsel %vm1073_vm3, %v7051_v25, %v1076_v38 }
 0x3aa   :  { %v1108_v60 = vadd.s32 %v1107_v30, %v1097_v32  ;;  %vm1126_vm13 = vc.u32 %v1124_v31, %v1120_v57  ;;  %v1099_v3 = vshrl.u32 %v1094_v14, 16  ;;  %v7124_v7 = vadd.f32 %v4993_v12, %v73_v21 }
 0x3ab   :  { %v536_v29 = vor.u32 4788187, %v535_v48  ;;  %v1127_v35 = vsel %vm1126_vm13, 1, %v4539_v0  ;;  %v543_v55 = vsub.s32 4, %v7067_v28  ;;  %v1119_v18 = vshrl.u32 %v1115_v51, 16 }
 0x3ac   :  { %v1129_v58 = vadd.s32 %v1127_v35, %v1125_v39  ;;  %v77_v41 = vmul.f32 %v6241_v4, %v5131_v36  ;;  %v539_v22 = vcvt.s32.f32 %v532_v52  ;;  %v1109_v62 = vadd.s32 %v1108_v60, %v1099_v3 }
 0x3ad   :  { %v537_v34 = vand.u32 2147483647, %v536_v29  ;;  %v577_v25 = vand.u32 2139095040, %v7124_v7  ;;  %vm421_vm14 = vcmp.lt.s32.totalorder %v6910_v56, 0  ;;  %v1121_v14 = vshrl.u32 %v1116_v63, 16 }
 0x3ae   :  { %v1130_v49 = vadd.s32 %v1129_v58, %v1119_v18  ;;  %v1078_v12 = vsel %vm1072_vm1, %v1075_v53, %v1077_v9  ;;  %v1128_v44 = vadd.s32 %v1124_v31, %v1120_v57  ;;  %v544_v54 = vsel %vm421_vm14, %v543_v55, %v7067_v28 }
 0x3af   :  { %v540_v27 = vmul.f32 %v539_v22, %v537_v34  ;;  %v578_v38 = vshrl.u32 %v577_v25, 23  ;;  %v7137_v4 = vadd.f32 %v5151_v40, %v77_v41  ;;  %v574_v33 = vand.u32 2147483647, %v7124_v7 }
 0x3b0   :  { %v1131_v36 = vadd.s32 %v1130_v49, %v1121_v14  ;;  %vm1134_vm15 = vc.u32 %v1109_v62, %v1128_v44  ;;  %vm420_vm11 = vcmp.le.f32.partialorder %v419_v23, 0.7853982  ;;  %v1132_v15 = vmul.u32 %v7087_v45, %v1078_v12 }
 0x3b1   :  { %v541_v51 = vxor.u32 2147483648, %v540_v27  ;;  %v4403_v47 = vadd.s32 4294967169, %v578_v38  ;;  %v546_v19 = vsel %vm420_vm11, 0, %v544_v54  ;;  %v581_v16 = vand.u32 8388607, %v574_v33 }
 0x3b2   :  { %v1135_v10 = vadd.s32 1, %v1131_v36  ;;  %v1194_v20 = vand.u32 2147483647, %v7137_v4  ;;  %v1197_v32 = vand.u32 2139095040, %v7137_v4  ;;  %v563_v42 = vadd.s32 3, %v546_v19 }
 0x3b3   :  { %v542_v24 = vsel %vm421_vm14, %v541_v51, %v540_v27  ;;  %v584_v28 = vadd.s32 1, %v4403_v47  ;;  %v582_v13 = vor.u32 8388608, %v581_v16  ;;  %vm1041_vm3 = vcmp.lt.s32.totalorder %v6923_v50, 0 }
 0x3b4   :  { %v7146_v63 = vsel %vm420_vm11, %v6910_v56, %v542_v24  ;;  %v1136_v40 = vsel %vm1134_vm15, %v1135_v10, %v1131_v36  ;;  %v1198_v57 = vshrl.u32 %v1197_v32, 23  ;;  %v7160_v31 = vand.u32 8388607, %v1194_v20 }
 0x3b5   :  { %v7153_v23 = vmul.f32 %v7146_v63, %v7146_v63  ;;  %v1137_v37 = vadd.s32 %v1136_v40, %v1132_v15  ;;  %vm585_vm1 = vcmp.gt.s32.totalorder %v584_v28, 0  ;;  %v7162_v39 = vand.u32 3, %v563_v42 }
 0x3b6   :  { %v586_v45 = vsel %vm585_vm1, %v584_v28, 0  ;;  %vm7168_vm12 = vcmp.le.f32.partialorder %v1039_v17, 0.7853982  ;;  %v1133_v9 = vadd.s32 %v1128_v44, %v1109_v62  ;;  %v7174_v55 = vshll.u32 %v582_v13, 8 }
 0x3b7   :  { %v548_v1 = vmul.f32 -0.001358992, %v7153_v23  ;;  %v555_v46 = vmul.f32 -0.00019511016, %v7153_v23  ;;  %v1138_v6 = vadd.s32 536870912, %v1137_v37  ;;  %v588_v43 = vand.u32 31, %v586_v45 }
 0x3b8   :  { %v4415_v41 = vadd.s32 4294967169, %v1198_v57  ;;  %v1202_v34 = vor.u32 8388608, %v7160_v31  ;;  %v587_v27 = vshrl.u32 %v586_v45, 5  ;;  %v623_v16 = vand.u32 65535, %v7174_v55 }
 0x3b9   :  { %v556_v26 = vadd.f32 0.008332121, %v555_v46  ;;  %v1139_v30 = vshrl.u32 %v1138_v6, 30  ;;  %v589_v52 = vsub.s32 32, %v588_v43  ;;  %v549_v48 = vadd.f32 0.041655596, %v548_v1 }
 0x3ba   :  { %v591_v3 = vshll.u32 %v4540_v59, %v588_v43  ;;  %v594_v22 = vshll.u32 %v4541_v61, %v588_v43  ;;  %v597_v25 = vshll.u32 %v4542_v2, %v588_v43  ;;  %v600_v38 = vshll.u32 %v4543_v5, %v588_v43 }
 0x3bb   :  { %v557_v21 = vmul.f32 %v556_v26, %v7153_v23  ;;  %v1140_v60 = vshll.u32 %v1139_v30, 30  ;;  %v1163_v29 = vsub.s32 4, %v1139_v30  ;;  %v592_v35 = vshrl.u32 %v4541_v61, %v589_v52 }
 0x3bc   :  { %v595_v17 = vshrl.u32 %v4542_v2, %v589_v52  ;;  %v598_v62 = vshrl.u32 %v4543_v5, %v589_v52  ;;  %v550_v14 = vmul.f32 %v549_v48, %v7153_v23  ;;  %v601_v54 = vshrl.u32 %v4544_v8, %v589_v52 }
 0x3bd   :  { %v558_v18 = vadd.f32 -0.16666654, %v557_v21  ;;  %v1141_v58 = vsub.s32 %v1137_v37, %v1140_v60  ;;  %v1164_v12 = vsel %vm1041_vm3, %v1163_v29, %v1139_v30  ;;  %v593_v44 = vor.u32 %v592_v35, %v591_v3 }
 0x3be   :  { %v603_v47 = vshll.u32 %v4544_v8, %v588_v43  ;;  %v604_v10 = vshrl.u32 %v4545_v11, %v589_v52  ;;  %v596_v19 = vor.u32 %v595_v17, %v594_v22  ;;  %v599_v15 = vor.u32 %v598_v62, %v597_v25 }
 0x3bf   :  { %vm1142_vm6 = vcmp.lt.s32.totalorder %v1141_v58, 0  ;;  %v1143_v49 = vsub.s32 0, %v1141_v58  ;;  %v559_v36 = vmul.f32 %v558_v18, %v7153_v23  ;;  %v602_v28 = vor.u32 %v601_v54, %v600_v38 }
 0x3c0   :  { %v551_v40 = vadd.f32 -0.4999988, %v550_v14  ;;  %v624_v37 = vshrl.u32 %v7174_v55, 16  ;;  %v1204_v32 = vadd.s32 1, %v4415_v41  ;;  %v1166_v45 = vsel %vm7168_vm12, 0, %v1164_v12 }
 0x3c1   :  { %v1144_v51 = vsel %vm1142_vm6, %v1143_v49, %v1141_v58  ;;  %v590_v1 = vshrl.u32 %v4540_v59, %v589_v52  ;;  %vm606_vm0 = vcmp.lt.s32.totalorder %v587_v27, 1  ;;  %v560_v46 = vadd.f32 1.0, %v559_v36 }
 0x3c2   :  { %v1145_v24 = vclz %v1144_v51  ;;  %v605_v6 = vor.u32 %v604_v10, %v603_v47  ;;  %vm608_vm5 = vcmp.lt.s32.totalorder %v587_v27, 3  ;;  %vm609_vm7 = vcmp.lt.s32.totalorder %v587_v27, 4 }
 0x3c3   :  { %v611_v13 = vsel %vm609_vm7, %v599_v15, 2102212464  ;;  %v614_v43 = vsel %vm606_vm0, %v593_v44, %v596_v19  ;;  %v615_v26 = vsel %vm609_vm7, %v602_v28, 920167782  ;;  %v552_v30 = vmul.f32 %v551_v40, %v7153_v23 }
 0x3c4   :  { %v4413_v42 = vadd.s32 4294967294, %v1145_v24  ;;  %vm607_vm4 = vcmp.lt.s32.totalorder %v587_v27, 2  ;;  %v616_v48 = vsel %vm608_vm5, %v599_v15, %v615_v26  ;;  %v610_v60 = vsel %vm606_vm0, %v590_v1, %v593_v44 }
 0x3c5   :  { %v612_v29 = vsel %vm608_vm5, %v596_v19, %v611_v13  ;;  %v7202_v3 = vmul.f32 %v560_v46, %v7146_v63  ;;  %v617_v18 = vsel %vm607_vm4, %v614_v43, %v616_v48  ;;  %v618_v41 = vsel %vm606_vm0, %v596_v19, %v599_v15 }
 0x3c6   :  { %vm4414_vm8 = vcmp.lt.s32.totalorder %v4413_v42, 0  ;;  %v619_v17 = vsel %vm609_vm7, %v605_v6, 1326507024  ;;  %v647_v25 = vand.u32 65535, %v617_v18  ;;  %v7208_v62 = vsel %vm607_vm4, %v610_v60, %v612_v29 }
 0x3c7   :  { %v1148_v57 = vsel %vm4414_vm8, 0, %v4413_v42  ;;  %v620_v14 = vsel %vm608_vm5, %v602_v28, %v619_v17  ;;  %v648_v49 = vshrl.u32 %v617_v18, 16  ;;  %vm1205_vm10 = vcmp.gt.s32.totalorder %v1204_v32, 0 }
 0x3c8   :  { %v1149_v21 = vsub.s32 32, %v1148_v57  ;;  %v1153_v52 = vsub.s32 4294967266, %v1148_v57  ;;  %v1150_v35 = vshll.u32 %v1141_v58, %v1148_v57  ;;  %v7211_v44 = vadd.s32 3, %v1166_v45 }
 0x3c9   :  { %v621_v58 = vsel %vm607_vm4, %v618_v41, %v620_v14  ;;  %v651_v36 = vmul.u32 %v647_v25, %v624_v37  ;;  %v7214_v51 = vadd.f32 1.0, %v552_v30  ;;  %v567_v47 = vxor.u32 2147483648, %v7202_v3 }
 0x3ca   :  { %v1151_v22 = vshrl.u32 %v1133_v9, %v1149_v21  ;;  %v1154_v23 = vadd.s32 127, %v1153_v52  ;;  %v625_v38 = vand.u32 65535, %v621_v58  ;;  %v626_v54 = vshrl.u32 %v621_v58, 16 }
 0x3cb   :  { %v650_v9 = vmul.u32 %v648_v49, %v623_v16  ;;  %v667_v24 = vmul.u32 %v7174_v55, %v7208_v62  ;;  %v649_v28 = vmul.u32 %v647_v25, %v623_v16  ;;  %v1206_v40 = vsel %vm1205_vm10, %v1204_v32, 0 }
 0x3cc   :  { %v1152_v12 = vor.u32 %v1151_v22, %v1150_v35  ;;  %v1155_v63 = vshll.u32 %v1154_v23, 23  ;;  %v628_v19 = vmul.u32 %v626_v54, %v623_v16  ;;  %v629_v15 = vmul.u32 %v625_v38, %v624_v37 }
 0x3cd   :  { %v652_v45 = vmul.u32 %v648_v49, %v624_v37  ;;  %v653_v1 = vshll.u32 %v650_v9, 16  ;;  %v627_v46 = vmul.u32 %v625_v38, %v623_v16  ;;  %v630_v6 = vmul.u32 %v626_v54, %v624_v37 }
 0x3ce   :  { %v1156_v10 = vor.u32 4788187, %v1155_v63  ;;  %v1159_v27 = vcvt.s32.f32 %v1152_v12  ;;  %v631_v13 = vshll.u32 %v628_v19, 16  ;;  %v655_v43 = vshll.u32 %v651_v36, 16 }
 0x3cf   :  { %v633_v30 = vshll.u32 %v629_v15, 16  ;;  %vm657_vm13 = vc.u32 %v649_v28, %v653_v1  ;;  %v659_v57 = vadd.s32 %v653_v1, %v649_v28  ;;  %v1208_v52 = vand.u32 31, %v1206_v40 }
 0x3d0   :  { %v1157_v42 = vand.u32 2147483647, %v1156_v10  ;;  %vm635_vm14 = vc.u32 %v627_v46, %v631_v13  ;;  %v637_v48 = vadd.s32 %v631_v13, %v627_v46  ;;  %v658_v21 = vsel %vm657_vm13, 1, %v4539_v0 }
 0x3d1   :  { %v636_v32 = vsel %vm635_vm14, 1, %v4539_v0  ;;  %v660_v29 = vadd.s32 %v658_v21, %v652_v45  ;;  %vm661_vm15 = vc.u32 %v659_v57, %v655_v43  ;;  %v654_v16 = vshrl.u32 %v650_v9, 16 }
 0x3d2   :  { %v1160_v26 = vmul.f32 %v1159_v27, %v1157_v42  ;;  %v638_v35 = vadd.s32 %v636_v32, %v630_v6  ;;  %vm639_vm11 = vc.u32 %v637_v48, %v633_v30  ;;  %v662_v37 = vsel %vm661_vm15, 1, %v4539_v0 }
 0x3d3   :  { %v640_v41 = vsel %vm639_vm11, 1, %v4539_v0  ;;  %v664_v22 = vadd.s32 %v662_v37, %v660_v29  ;;  %v7226_v23 = vsub.s32 32, %v1208_v52  ;;  %v632_v25 = vshrl.u32 %v628_v19, 16 }
 0x3d4   :  { %v1161_v60 = vxor.u32 2147483648, %v1160_v26  ;;  %v642_v14 = vadd.s32 %v640_v41, %v638_v35  ;;  %v7233_v49 = vshrl.u32 %v1206_v40, 5  ;;  %vm566_vm1 = vcmp.eq.s32.totalorder %v7162_v39, 0 }
 0x3d5   :  { %v634_v63 = vshrl.u32 %v629_v15, 16  ;;  %v656_v58 = vshrl.u32 %v651_v36, 16  ;;  %v665_v38 = vadd.s32 %v664_v22, %v654_v16  ;;  %v7238_v9 = vadd.s32 %v659_v57, %v655_v43 }
 0x3d6   :  { %v1162_v18 = vsel %vm1041_vm3, %v1161_v60, %v1160_v26  ;;  %v643_v54 = vadd.s32 %v642_v14, %v632_v25  ;;  %v1211_v10 = vshll.u32 %v4540_v59, %v1208_v52  ;;  %v1214_v53 = vshll.u32 %v4541_v61, %v1208_v52 }
 0x3d7   :  { %v7231_v17 = vsel %vm7168_vm12, %v6923_v50, %v1162_v18  ;;  %v666_v42 = vadd.s32 %v665_v38, %v656_v58  ;;  %v1212_v40 = vshrl.u32 %v4541_v61, %v7226_v23  ;;  %v1215_v15 = vshrl.u32 %v4542_v2, %v7226_v23 }
 0x3d8   :  { %v1167_v12 = vmul.f32 %v7231_v17, %v7231_v17  ;;  %v7244_v27 = vadd.s32 %v643_v54, %v634_v63  ;;  %v1218_v36 = vshrl.u32 %v4543_v5, %v7226_v23  ;;  %v1220_v45 = vshll.u32 %v4543_v5, %v1208_v52 }
 0x3d9   :  { %v670_v6 = vadd.s32 1, %v666_v42  ;;  %v1221_v13 = vshrl.u32 %v4544_v8, %v7226_v23  ;;  %vm569_vm3 = vcmp.eq.s32.totalorder %v7162_v39, 2  ;;  %v1217_v61 = vshll.u32 %v4542_v2, %v1208_v52 }
 0x3da   :  { %v1168_v28 = vmul.f32 -0.001358992, %v1167_v12  ;;  %v1175_v19 = vmul.f32 -0.00019511016, %v1167_v12  ;;  %vm669_vm12 = vc.u32 %v7244_v27, %v7238_v9  ;;  %v1223_v43 = vshll.u32 %v4544_v8, %v1208_v52 }
 0x3db   :  { %v1224_v26 = vshrl.u32 %v4545_v11, %v7226_v23  ;;  %vm565_vm6 = vcmp.lt.s32.totalorder %v7162_v39, 2  ;;  %v671_v57 = vsel %vm669_vm12, %v670_v6, %v666_v42  ;;  %v1222_v48 = vor.u32 %v1221_v13, %v1220_v45 }
 0x3dc   :  { %v1169_v1 = vadd.f32 0.041655596, %v1168_v28  ;;  %v1176_v46 = vadd.f32 0.008332121, %v1175_v19  ;;  %v1184_v21 = vand.u32 3, %v7211_v44  ;;  %v672_v60 = vadd.s32 %v671_v57, %v667_v24 }
 0x3dd   :  { %v7265_v32 = vor.u32 %v1215_v15, %v1214_v53  ;;  %v7267_v2 = vor.u32 %v1218_v36, %v1217_v61  ;;  %v7269_v29 = vor.u32 %v1212_v40, %v1211_v10  ;;  %v1225_v11 = vor.u32 %v1224_v26, %v1223_v43 }
 0x3de   :  { %v1170_v5 = vmul.f32 %v1169_v1, %v1167_v12  ;;  %v1177_v30 = vmul.f32 %v1176_v46, %v1167_v12  ;;  %v568_v35 = vsel %vm566_vm1, %v7214_v51, %v567_v47  ;;  %v570_v44 = vxor.u32 2147483648, %v7214_v51 }
 0x3df   :  { %v673_v16 = vadd.s32 536870912, %v672_v60  ;;  %vm1229_vm0 = vcmp.lt.s32.totalorder %v7233_v49, 4  ;;  %vm1226_vm5 = vcmp.lt.s32.totalorder %v7233_v49, 1  ;;  %vm562_vm7 = vweird.f32 %v6910_v56 }
 0x3e0   :  { %v1171_v8 = vadd.f32 -0.4999988, %v1170_v5  ;;  %v1178_v52 = vadd.f32 -0.16666654, %v1177_v30  ;;  %v1235_v24 = vsel %vm1229_vm0, %v1222_v48, 920167782  ;;  %vm1182_vm8 = vweird.f32 %v6923_v50 }
 0x3e1   :  { %v7283_v37 = vshrl.u32 %v673_v16, 30  ;;  %vm1227_vm4 = vcmp.lt.s32.totalorder %v7233_v49, 2  ;;  %vm1228_vm10 = vcmp.lt.s32.totalorder %v7233_v49, 3  ;;  %v1238_v51 = vsel %vm1226_vm5, %v7265_v32, %v7267_v2 }
 0x3e2   :  { %v1172_v55 = vmul.f32 %v1171_v8, %v1167_v12  ;;  %v1179_v62 = vmul.f32 %v1178_v52, %v1167_v12  ;;  %v1234_v41 = vsel %vm1226_vm5, %v7269_v29, %v7265_v32  ;;  %v1239_v22 = vsel %vm1229_vm0, %v1225_v11, 1326507024 }
 0x3e3   :  { %v675_v25 = vshll.u32 %v7283_v37, 30  ;;  %v1236_v14 = vsel %vm1228_vm10, %v7267_v2, %v1235_v24  ;;  %v1240_v12 = vsel %vm1228_vm10, %v1222_v48, %v1239_v22  ;;  %v7305_v63 = vshll.u32 %v1202_v34, 8 }
 0x3e4   :  { %v1173_v47 = vadd.f32 1.0, %v1172_v55  ;;  %v1180_v18 = vadd.f32 1.0, %v1179_v62  ;;  %v571_v58 = vsel %vm569_vm3, %v570_v44, %v7202_v3  ;;  %v1241_v10 = vsel %vm1227_vm4, %v1238_v51, %v1240_v12 }
 0x3e5   :  { %v572_v53 = vsel %vm565_vm6, %v568_v35, %v571_v58  ;;  %vm1186_vm13 = vcmp.eq.s32.totalorder %v1184_v21, 0  ;;  %vm1189_vm14 = vcmp.eq.s32.totalorder %v1184_v21, 2  ;;  %v7315_v28 = vsub.s32 %v672_v60, %v675_v25 }
 0x3e6   :  { %v1181_v38 = vmul.f32 %v1180_v18, %v7231_v17  ;;  %v1190_v54 = vxor.u32 2147483648, %v1173_v47  ;;  %v1237_v34 = vsel %vm1227_vm4, %v1234_v41, %v1236_v14  ;;  %v1244_v19 = vshrl.u32 %v7305_v63, 16 }
 0x3e7   :  { %v1245_v3 = vand.u32 65535, %v1241_v10  ;;  %vm677_vm15 = vcmp.lt.s32.totalorder %v7315_v28, 0  ;;  %v678_v17 = vsub.s32 0, %v7315_v28  ;;  %v1243_v42 = vand.u32 65535, %v7305_v63 }
 0x3e8   :  { %v1187_v31 = vxor.u32 2147483648, %v1181_v38  ;;  %v1246_v40 = vshrl.u32 %v1241_v10, 16  ;;  %vm1185_vm11 = vcmp.lt.s32.totalorder %v1184_v21, 2  ;;  %v1191_v15 = vsel %vm1189_vm14, %v1190_v54, %v1181_v38 }
 0x3e9   :  { %v1249_v36 = vmul.u32 %v1245_v3, %v1244_v19  ;;  %v679_v1 = vsel %vm677_vm15, %v678_v17, %v7315_v28  ;;  %v1268_v6 = vshrl.u32 %v1237_v34, 16  ;;  %v573_v13 = vsel %vm562_vm7, nan, %v572_v53 }
 0x3ea   :  { %v1188_v39 = vsel %vm1186_vm13, %v1173_v47, %v1187_v31  ;;  %v1248_v46 = vmul.u32 %v1246_v40, %v1243_v42  ;;  %v680_v43 = vclz %v679_v1  ;;  %v1267_v26 = vand.u32 65535, %v1237_v34 }
 0x3eb   :  { %v1192_v45 = vsel %vm1185_vm11, %v1188_v39, %v1191_v15  ;;  %v1247_v57 = vmul.u32 %v1245_v3, %v1243_v42  ;;  %v1250_v21 = vmul.u32 %v1246_v40, %v1244_v19  ;;  %v1253_v60 = vshll.u32 %v1249_v36, 16 }
 0x3ec   :  { %v1193_v61 = vsel %vm1182_vm8, nan, %v1192_v45  ;;  %v4404_v30 = vadd.s32 4294967294, %v680_v43  ;;  %v1251_v48 = vshll.u32 %v1248_v46, 16  ;;  %v1270_v8 = vmul.u32 %v1268_v6, %v1243_v42 }
 0x3ed   :  { %v1971_v5 = vpack.c.bf16 %v1193_v61, %v573_v13  ;;  %v1269_v11 = vmul.u32 %v1267_v26, %v1243_v42  ;;  %v1271_v44 = vmul.u32 %v1267_v26, %v1244_v19  ;;  %v668_v16 = vadd.s32 %v7238_v9, %v7244_v27 }
 0x3ee   :  { %vm4405_vm1 = vcmp.lt.s32.totalorder %v4404_v30, 0  ;;  %vm1255_vm3 = vc.u32 %v1247_v57, %v1251_v48  ;;  %v1257_v52 = vadd.s32 %v1251_v48, %v1247_v57  ;;  %v1273_v50 = vshll.u32 %v1270_v8, 16 }
 0x3ef   :  { %4069 = vmatpush.bf16.msrb.mxu2 %v1971_v5  ;;  %v683_v35 = vsel %vm4405_vm1, 0, %v4404_v30  ;;  %v1256_v56 = vsel %vm1255_vm3, 1, %v4539_v0  ;;  %v1272_v51 = vmul.u32 %v1268_v6, %v1244_v19  ;;  %v1252_v18 = vshrl.u32 %v1248_v46, 16 }
 0x3f0   :  { %v688_v55 = vsub.s32 4294967266, %v683_v35  ;;  %v1258_v62 = vadd.s32 %v1256_v56, %v1250_v21  ;;  %v684_v24 = vsub.s32 32, %v683_v35  ;;  %vm1259_vm12 = vc.u32 %v1257_v52, %v1253_v60 }
 0x3f1   :  { %vm1277_vm6 = vc.u32 %v1269_v11, %v1273_v50  ;;  %v1260_v41 = vsel %vm1259_vm12, 1, %v4539_v0  ;;  %v1275_v14 = vshll.u32 %v1271_v44, 16  ;;  %v1279_v12 = vadd.s32 %v1273_v50, %v1269_v11 }
 0x3f2   :  { %v689_v47 = vadd.s32 127, %v688_v55  ;;  %v1278_v22 = vsel %vm1277_vm6, 1, %v4539_v0  ;;  %v1262_v25 = vadd.s32 %v1260_v41, %v1258_v62  ;;  %v686_v54 = vshrl.u32 %v668_v16, %v684_v24  ;;  %v4525_v41 = vld [vmem:[%s7454_s3 + $0x18] sm:$0xff] }
 0x3f3   :  { %v1280_v58 = vadd.s32 %v1278_v22, %v1272_v51  ;;  %v1231_v9 = vsel %vm1229_vm0, %v7267_v2, 2102212464  ;;  %vm1281_vm7 = vc.u32 %v1279_v12, %v1275_v14  ;;  %v1210_v10 = vshrl.u32 %v4540_v59, %v7226_v23  ;;  %4479 = vmatmul.msk.bf16.gmra.mxu0 %vm3900_vm2, %v4525_v41  ;;  %4481 = vmatmul.msk.bf16.gmra.mxu1 %vm3900_vm2, %v4525_v41 }
 0x3f4   :  { %v690_v38 = vshll.u32 %v689_v47, 23  ;;  %v1263_v27 = vadd.s32 %v1262_v25, %v1252_v18  ;;  %v1254_v53 = vshrl.u32 %v1249_v36, 16  ;;  %v1282_v31 = vsel %vm1281_vm7, 1, %v4539_v0  ;;  %4483 = vmatmul.msk.bf16.gmra.mxu2 %vm3900_vm2, %v4525_v41  ;;  %4485 = vmatmul.msk.bf16.gmra.mxu3 %vm3900_vm2, %v4525_v41 }
 0x3f5   :  { %v685_v34 = vshll.u32 %v7315_v28, %v683_v35  ;;  %v1274_v3 = vshrl.u32 %v1270_v8, 16  ;;  %v1284_v17 = vadd.s32 %v1282_v31, %v1280_v58  ;;  %v1230_v42 = vsel %vm1226_vm5, %v1210_v10, %v7269_v29 }
 0x3f6   :  { %v691_v19 = vor.u32 4788187, %v690_v38  ;;  %v1232_v2 = vsel %vm1228_vm10, %v7265_v32, %v1231_v9  ;;  %v1264_v40 = vadd.s32 %v1263_v27, %v1254_v53  ;;  %v1276_v15 = vshrl.u32 %v1271_v44, 16 }
 0x3f7   :  { %v687_v39 = vor.u32 %v686_v54, %v685_v34  ;;  %v1285_v59 = vadd.s32 %v1284_v17, %v1274_v3  ;;  %v1283_v23 = vadd.s32 %v1279_v12, %v1275_v14  ;;  %v1233_v0 = vsel %vm1227_vm4, %v1230_v42, %v1232_v2 }
 0x3f8   :  { %v692_v36 = vand.u32 2147483647, %v691_v19  ;;  %v1287_v46 = vmul.u32 %v7305_v63, %v1233_v0  ;;  %vm576_vm5 = vcmp.lt.s32.totalorder %v7124_v7, 0  ;;  %vm7354_vm8 = vcmp.le.f32.partialorder %v574_v33, 0.7853982 }
 0x3f9   :  { %v1286_v28 = vadd.s32 %v1285_v59, %v1276_v15  ;;  %vm1289_vm0 = vc.u32 %v1264_v40, %v1283_v23  ;;  %v694_v45 = vcvt.s32.f32 %v687_v39  ;;  %v1288_v35 = vadd.s32 %v1283_v23, %v1264_v40 }
 0x3fa   :  { %v698_v38 = vsub.s32 4, %v7283_v37  ;;  %vm1196_vm13 = vcmp.lt.s32.totalorder %v7137_v4, 0  ;;  %vm7372_vm14 = vcmp.le.f32.partialorder %v1194_v20, 0.7853982  ;;  %vm717_vm7 = vweird.f32 %v7124_v7 }
 0x3fb   :  { %v1290_v1 = vadd.s32 1, %v1286_v28  ;;  %v695_v29 = vmul.f32 %v694_v45, %v692_v36 }
 0x3fc   :  { %v699_v31 = vsel %vm576_vm5, %v698_v38, %v7283_v37  ;;  %v4522_v37 = vld [vmem:[%s7454_s3] sm:$0xff] }
 0x3fd   :  { %v1291_v6 = vsel %vm1289_vm0, %v1290_v1, %v1286_v28  ;;  %v696_v32 = vxor.u32 2147483648, %v695_v29  ;;  %v701_v42 = vsel %vm7354_vm8, 0, %v699_v31  ;;  %vm1337_vm0 = vweird.f32 %v7137_v4 }
 0x3fe   :  { %v1292_v13 = vadd.s32 %v1291_v6, %v1287_v46  ;;  %v718_v36 = vadd.s32 3, %v701_v42 }
 0x3ff   :  { %v697_v5 = vsel %vm576_vm5, %v696_v32, %v695_v29  ;;  %vm4379_vm5 = vcmask 1040384  }
 0x400   :  { %v1293_v61 = vadd.s32 536870912, %v1292_v13  ;;  %v700_v63 = vsel %vm7354_vm8, %v7124_v7, %v697_v5  ;;  %v3929_v7 = vpop.f32.mrf.mxu0  ;;  %vm4381_vm8 = vcmask 1042434  }
 0x401   :  { %v702_v21 = vmul.f32 %v700_v63, %v700_v63 }
 0x402   :  { %v1294_v43 = vshrl.u32 %v1293_v61, 30 }
 0x403   :  { %v710_v52 = vmul.f32 -0.00019511016, %v702_v21  ;;  %v703_v62 = vmul.f32 -0.001358992, %v702_v21  ;;  %4494 = vmatmul.msk.bf16.vlgmr.msrb.gmra.mxu0 %vm3900_vm2, %v4522_v37  ;;  %4496 = vmatmul.msk.bf16.vlgmr.msrb.gmra.mxu1 %vm3900_vm2, %v4522_v37 }
 0x404   :  { %v1295_v26 = vshll.u32 %v1294_v43, 30  ;;  %v1318_v34 = vsub.s32 4, %v1294_v43  ;;  %4498 = vmatmul.msk.bf16.vlgmr.msrb.gmra.mxu2 %vm3900_vm2, %v4522_v37 }
 0x405   :  { %v711_v33 = vadd.f32 0.008332121, %v710_v52  ;;  %v704_v22 = vadd.f32 0.041655596, %v703_v62 }
 0x406   :  { %v1296_v49 = vsub.s32 %v1292_v13, %v1295_v26  ;;  %v1319_v39 = vsel %vm1196_vm13, %v1318_v34, %v1294_v43  ;;  %v719_v13 = vand.u32 3, %v718_v36  ;;  %v7410_v34 = vpop.permute.xlu0 %4116 }
 0x407   :  { %v712_v47 = vmul.f32 %v711_v33, %v702_v21  ;;  %v705_v54 = vmul.f32 %v704_v22, %v702_v21  ;;  %v1321_v28 = vsel %vm7372_vm14, 0, %v1319_v39 }
 0x408   :  { %vm1297_vm4 = vcmp.lt.s32.totalorder %v1296_v49, 0  ;;  %v1298_v57 = vsub.s32 0, %v1296_v49  ;;  %v1338_v61 = vadd.s32 3, %v1321_v28  ;;  %vm721_vm15 = vcmp.eq.s32.totalorder %v719_v13, 0  ;;  %v3931_v62 = vpop.f32.mrf.mxu0 }
 0x409   :  { %v713_v12 = vadd.f32 -0.16666654, %v712_v47  ;;  %v706_v3 = vadd.f32 -0.4999988, %v705_v54  ;;  %vm724_vm11 = vcmp.eq.s32.totalorder %v719_v13, 2  ;;  %vm720_vm1 = vcmp.lt.s32.totalorder %v719_v13, 2  ;;  %v7402_v47 = vpop.f32.mrf.mxu3 }
 0x40a   :  { %v1299_v48 = vsel %vm1297_vm4, %v1298_v57, %v1296_v49 }
 0x40b   :  { %v1300_v60 = vclz %v1299_v48  ;;  %v714_v27 = vmul.f32 %v713_v12, %v702_v21  ;;  %v707_v15 = vmul.f32 %v706_v3, %v702_v21 }
 0x40d   :  { %v4416_v8 = vadd.s32 4294967294, %v1300_v60  ;;  %v715_v2 = vadd.f32 1.0, %v714_v27  ;;  %v708_v46 = vadd.f32 1.0, %v707_v15 }
 0x40f   :  { %vm4417_vm10 = vcmp.lt.s32.totalorder %v4416_v8, 0  ;;  %v716_v0 = vmul.f32 %v715_v2, %v700_v63  ;;  %v725_v5 = vxor.u32 2147483648, %v708_v46  ;;  %v1339_v63 = vand.u32 3, %v1338_v61 }
 0x410   :  { %v1303_v11 = vsel %vm4417_vm10, 0, %v4416_v8 }
 0x411   :  { %v1304_v56 = vsub.s32 32, %v1303_v11  ;;  %v1308_v44 = vsub.s32 4294967266, %v1303_v11  ;;  %v1305_v50 = vshll.u32 %v1296_v49, %v1303_v11  ;;  %v722_v32 = vxor.u32 2147483648, %v716_v0  ;;  %v7404_v12 = vpop.f32.mrf.mxu3 }
 0x412   :  { %v726_v60 = vsel %vm724_vm11, %v725_v5, %v716_v0  ;;  %vm1341_vm3 = vcmp.eq.s32.totalorder %v1339_v63, 0  ;;  %vm1344_vm12 = vcmp.eq.s32.totalorder %v1339_v63, 2  ;;  %vm1340_vm6 = vcmp.lt.s32.totalorder %v1339_v63, 2 }
 0x413   :  { %v1306_v16 = vshrl.u32 %v1288_v35, %v1304_v56  ;;  %v1309_v55 = vadd.s32 127, %v1308_v44  ;;  %v723_v57 = vsel %vm721_vm15, %v708_v46, %v722_v32  ;;  %v4122_v46 = vpop.permute.xlu1 %4121 }
 0x414   :  { %v727_v52 = vsel %vm720_vm1, %v723_v57, %v726_v60 }
 0x415   :  { %v1307_v24 = vor.u32 %v1306_v16, %v1305_v50  ;;  %v1310_v51 = vshll.u32 %v1309_v55, 23  ;;  %v728_v44 = vsel %vm717_vm7, nan, %v727_v52  ;;  %v4523_v16 = vld [vmem:[%s7454_s3 + $0x8] sm:$0xff]  ;;  %v3967_v55 = vpop.f32.mrf.mxu2 }
 0x416   :  { %4495 = vmatmul.msk.bf16.gmra.mxu0 %vm3900_vm2, %v4523_v16  ;;  %4497 = vmatmul.msk.bf16.gmra.mxu1 %vm3900_vm2, %v4523_v16 }
 0x417   :  { %v1311_v18 = vor.u32 4788187, %v1310_v51  ;;  %v1314_v14 = vcvt.s32.f32 %v1307_v24  ;;  %4499 = vmatmul.msk.bf16.gmra.mxu2 %vm3900_vm2, %v4523_v16 }
 0x419   :  { %v1312_v25 = vand.u32 2147483647, %v1311_v18 }
 0x41b   :  { %v1315_v58 = vmul.f32 %v1314_v14, %v1312_v25 }
 0x41d   :  { %v1316_v9 = vxor.u32 2147483648, %v1315_v58  ;;  %v3969_v51 = vpop.f32.mrf.mxu2 }
 0x41f   :  { %v1317_v53 = vsel %vm1196_vm13, %v1316_v9, %v1315_v58 }
 0x420   :  { %v1320_v19 = vsel %vm7372_vm14, %v7137_v4, %v1317_v53  ;;  %v3948_v4 = vpop.f32.mrf.mxu1 }
 0x421   :  { %v1322_v17 = vmul.f32 %v1320_v19, %v1320_v19 }
 0x423   :  { %v1323_v20 = vmul.f32 -0.001358992, %v1322_v17  ;;  %v1330_v40 = vmul.f32 -0.00019511016, %v1322_v17 }
 0x425   :  { %v1324_v59 = vadd.f32 0.041655596, %v1323_v20  ;;  %v1331_v23 = vadd.f32 0.008332121, %v1330_v40 }
 0x427   :  { %v1325_v45 = vmul.f32 %v1324_v59, %v1322_v17  ;;  %v1332_v1 = vmul.f32 %v1331_v23, %v1322_v17 }
 0x428   :  { %v3950_v24 = vpop.f32.mrf.mxu1 }
 0x429   :  { %v1326_v29 = vadd.f32 -0.4999988, %v1325_v45  ;;  %v1333_v6 = vadd.f32 -0.16666654, %v1332_v1 }
 0x42b   :  { %v1327_v43 = vmul.f32 %v1326_v29, %v1322_v17  ;;  %v1334_v26 = vmul.f32 %v1333_v6, %v1322_v17  ;;  %v4112_v29 = vpop.permute.xlu0 %4111  ;;  %v4107_v6 = vpop.permute.xlu2 %4106 }
 0x42d   :  { %v1328_v49 = vadd.f32 1.0, %v1327_v43  ;;  %v1335_v30 = vadd.f32 1.0, %v1334_v26 }
 0x42f   :  { %v1336_v48 = vmul.f32 %v1335_v30, %v1320_v19  ;;  %v1345_v21 = vxor.u32 2147483648, %v1328_v49 }
 0x431   :  { %v1342_v8 = vxor.u32 2147483648, %v1336_v48  ;;  %v1346_v35 = vsel %vm1344_vm12, %v1345_v21, %v1336_v48 }
 0x433   :  { %v1343_v11 = vsel %vm1341_vm3, %v1328_v49, %v1342_v8 }
 0x434   :  { %v1347_v56 = vsel %vm1340_vm6, %v1343_v11, %v1346_v35 }
 0x435   :  { %v1348_v33 = vsel %vm1337_vm0, nan, %v1347_v56 }
 0x436   :  { %v1972_v50 = vpack.c.bf16 %v1348_v33, %v728_v44 }
 0x438   :  { %4088 = vmatpush.bf16.msrb.mxu3 %v1972_v50 }
 0x43b   :  { %4500 = vmatmul.msk.bf16.vlgmr.msrb.gmra.mxu3 %vm3900_vm2, %v4522_v37 }
 0x44b   :  { %4501 = vmatmul.msk.bf16.gmra.mxu3 %vm3900_vm2, %v4523_v16  ;;  %vm4202_vm2 = vcmask 261120  }
 0x470   :  { %v3934_v18 = vpop.f32.mrf.mxu0  ;;  %v3953_v41 = vpop.f32.mrf.mxu1 }
 0x477   :  { %v3972_v22 = vpop.f32.mrf.mxu2  ;;  %v7406_v9 = vpop.f32.mrf.mxu3 }
 0x478   :  { %v3936_v25 = vpop.f32.mrf.mxu0  ;;  %v3955_v14 = vpop.f32.mrf.mxu1 }
 0x47f   :  { %v3974_v58 = vpop.f32.mrf.mxu2  ;;  %v7408_v31 = vpop.f32.mrf.mxu3 }
 0x480   :  { %v4033_v38 = vpop.f32.mrf.mxu0  ;;  %v4052_v54 = vpop.f32.mrf.mxu1 }
 0x481   :  { %v4034_v59 = vadd.f32 %v4033_v38, %v3929_v7  ;;  %v4053_v23 = vadd.f32 %v4052_v54, %v3948_v4 }
 0x483   :  { %v4124_v26 = vadd.f32 %v4107_v6, %v4034_v59  ;;  %v4125_v5 = vadd.f32 %v4107_v6, %v4053_v23 }
 0x485   :  { %v4140_v16 = vmax.f32 %v4124_v26, 0.0  ;;  %v4141_v7 = vmax.f32 %v4125_v5, 0.0  ;;  %v4175_v5 = vpop.permute.xlu0 %4174 }
 0x487   :  { %v4071_v27 = vpop.f32.mrf.mxu2 }
 0x488   :  { %v4035_v10 = vpop.f32.mrf.mxu0  ;;  %v4054_v53 = vpop.f32.mrf.mxu1  ;;  %v4072_v44 = vadd.f32 %v4071_v27, %v3967_v55 }
 0x489   :  { %v4036_v40 = vadd.f32 %v4035_v10, %v3931_v62  ;;  %v4055_v39 = vadd.f32 %v4054_v53, %v3950_v24 }
 0x48b   :  { %v4128_v13 = vadd.f32 %v4112_v29, %v4036_v40  ;;  %v4129_v61 = vadd.f32 %v4112_v29, %v4055_v39 }
 0x48d   :  { %v4144_v60 = vmax.f32 %v4128_v13, 0.0  ;;  %v4145_v8 = vmax.f32 %v4129_v61, 0.0 }
 0x48f   :  { %v4073_v19 = vpop.f32.mrf.mxu2  ;;  %v4156_v24 = vpack.c.bf16 %v4144_v60, %v4140_v16 }
 0x490   :  { %v4074_v21 = vadd.f32 %v4073_v19, %v3969_v51 }
 0x492   :  { %v4130_v4 = vadd.f32 %v4112_v29, %v4074_v21 }
 0x493   :  { %v4038_v3 = vpop.f32.mrf.mxu0  ;;  %v4057_v17 = vpop.f32.mrf.mxu1 }
 0x494   :  { %v4039_v42 = vadd.f32 %v4038_v3, %v3934_v18  ;;  %v4058_v2 = vadd.f32 %v4057_v17, %v3953_v41  ;;  %v4157_v18 = vpack.c.bf16 %v4145_v8, %v4141_v7  ;;  %v4126_v41 = vadd.f32 %v4107_v6, %v4072_v44 }
 0x495   :  { %v4146_v55 = vmax.f32 %v4130_v4, 0.0 }
 0x496   :  { %v4132_v0 = vadd.f32 %v7410_v34, %v4039_v42  ;;  %v4133_v28 = vadd.f32 %v7410_v34, %v4058_v2  ;;  %v4142_v38 = vmax.f32 %v4126_v41, 0.0 }
 0x498   :  { %v4148_v30 = vmax.f32 %v4132_v0, 0.0  ;;  %v4149_v63 = vmax.f32 %v4133_v28, 0.0  ;;  %v4158_v54 = vpack.c.bf16 %v4146_v55, %v4142_v38  ;;  %v4185_v0 = vpop.permute.xlu1 %4184 }
 0x49a   :  { %v4076_v15 = vpop.f32.mrf.mxu2 }
 0x49b   :  { %v4040_v36 = vpop.f32.mrf.mxu0  ;;  %v4059_v37 = vpop.f32.mrf.mxu1  ;;  %v4077_v49 = vadd.f32 %v4076_v15, %v3972_v22 }
 0x49c   :  { %v4041_v45 = vadd.f32 %v4040_v36, %v3936_v25  ;;  %v4060_v1 = vadd.f32 %v4059_v37, %v3955_v14  ;;  %v4526_v25 = vld [vmem:[%s7455_s5] sm:$0xff] }
 0x49d   :  { %v4134_v33 = vadd.f32 %v7410_v34, %v4077_v49 }
 0x49e   :  { %v4136_v32 = vadd.f32 %v4122_v46, %v4041_v45  ;;  %v4137_v43 = vadd.f32 %v4122_v46, %v4060_v1 }
 0x49f   :  { %v4150_v51 = vmax.f32 %v4134_v33, 0.0 }
 0x4a0   :  { %v4152_v57 = vmax.f32 %v4136_v32, 0.0  ;;  %v4153_v48 = vmax.f32 %v4137_v43, 0.0 }
 0x4a2   :  { %v4160_v11 = vpack.c.bf16 %v4152_v57, %v4148_v30  ;;  %v4161_v35 = vpack.c.bf16 %v4153_v48, %v4149_v63  ;;  %v4078_v56 = vpop.f32.mrf.mxu2 }
 0x4a3   :  { %v4079_v50 = vadd.f32 %v4078_v56, %v3974_v58 }
 0x4a4   :  { %4215 = vmatpush.bf16.msra.mxu0 %v4160_v11  ;;  %4234 = vmatpush.bf16.msra.mxu1 %v4161_v35 }
 0x4a5   :  { %v4138_v62 = vadd.f32 %v4122_v46, %v4079_v50 }
 0x4a7   :  { %v4154_v22 = vmax.f32 %v4138_v62, 0.0  ;;  %v4309_v62 = vld [vmem:[%s7456_s7] sm:$0x1] }
 0x4a8   :  { %4216 = vmatpush.bf16.msra.mxu0 %v4156_v24  ;;  %4235 = vmatpush.bf16.msra.mxu1 %v4157_v18 }
 0x4a9   :  { %v4162_v14 = vpack.c.bf16 %v4154_v22, %v4150_v51 }
 0x4ab   :  { %4253 = vmatpush.bf16.msra.mxu2 %v4162_v14  ;;  %4510 = vmatmul.msk.bf16.vlgmr.msra.gmra.mxu0 %vm4202_vm2, %v4526_v25 }
 0x4ac   :  { %4512 = vmatmul.msk.bf16.vlgmr.msra.gmra.mxu1 %vm4202_vm2, %v4526_v25 }
 0x4af   :  { %4254 = vmatpush.bf16.msra.mxu2 %v4158_v54 }
 0x4b2   :  { %4514 = vmatmul.msk.bf16.vlgmr.msra.gmra.mxu2 %vm4202_vm2, %v4526_v25 }
 0x4be   :  { %v7412_v20 = vpop.f32.mrf.mxu3 }
 0x4bf   :  { %v4091_v19 = vadd.f32 %v7412_v20, %v7402_v47 }
 0x4c1   :  { %v4127_v40 = vadd.f32 %v4107_v6, %v4091_v19  ;;  %v4180_v6 = vpop.permute.xlu1 %4179 }
 0x4c3   :  { %v4143_v23 = vmax.f32 %v4127_v40, 0.0 }
 0x4c6   :  { %v4092_v52 = vpop.f32.mrf.mxu3 }
 0x4c7   :  { %v4093_v10 = vadd.f32 %v4092_v52, %v7404_v12 }
 0x4c9   :  { %v4131_v42 = vadd.f32 %v4112_v29, %v4093_v10 }
 0x4cb   :  { %v4147_v12 = vmax.f32 %v4131_v42, 0.0 }
 0x4cd   :  { %v4159_v47 = vpack.c.bf16 %v4147_v12, %v4143_v23 }
 0x4ce   :  { %v4095_v58 = vpop.f32.mrf.mxu3 }
 0x4cf   :  { %v4096_v27 = vadd.f32 %v4095_v58, %v7406_v9  ;;  %v4527_v9 = vld [vmem:[%s7455_s5 + $0x8] sm:$0xff] }
 0x4d0   :  { %4511 = vmatmul.msk.bf16.gmra.mxu0 %vm4202_vm2, %v4527_v9  ;;  %4513 = vmatmul.msk.bf16.gmra.mxu1 %vm4202_vm2, %v4527_v9 }
 0x4d1   :  { %v4135_v3 = vadd.f32 %v7410_v34, %v4096_v27  ;;  %4515 = vmatmul.msk.bf16.gmra.mxu2 %vm4202_vm2, %v4527_v9 }
 0x4d3   :  { %v4151_v39 = vmax.f32 %v4135_v3, 0.0 }
 0x4d6   :  { %v4097_v53 = vpop.f32.mrf.mxu3 }
 0x4d7   :  { %v4098_v17 = vadd.f32 %v4097_v53, %v7408_v31 }
 0x4d9   :  { %v4139_v2 = vadd.f32 %v4122_v46, %v4098_v17  ;;  %v4190_v46 = vpop.permute.xlu2 %4189 }
 0x4db   :  { %v4155_v15 = vmax.f32 %v4139_v2, 0.0 }
 0x4dd   :  { %v4163_v59 = vpack.c.bf16 %v4155_v15, %v4151_v39 }
 0x4df   :  { %4272 = vmatpush.bf16.msra.mxu3 %v4163_v59 }
 0x4e3   :  { %4273 = vmatpush.bf16.msra.mxu3 %v4159_v47 }
 0x4e6   :  { %4516 = vmatmul.msk.bf16.vlgmr.msra.gmra.mxu3 %vm4202_vm2, %v4526_v25 }
 0x4f6   :  { %4517 = vmatmul.msk.bf16.gmra.mxu3 %vm4202_vm2, %v4527_v9 }
 0x528   :  { %v4218_v31 = vpop.f32.mrf.mxu0 }
 0x529   :  { %v4237_v34 = vpop.f32.mrf.mxu1  ;;  %v4219_v63 = vadd.f32 %v4218_v31, %v4175_v5 }
 0x52a   :  { %v4238_v21 = vadd.f32 %v4237_v34, %v4175_v5 }
 0x52b   :  { %v4285_v50 = vmax.f32 %v4219_v63, 0.0 }
 0x52c   :  { %v4286_v16 = vmax.f32 %v4238_v21, 0.0 }
 0x530   :  { %v4220_v20 = vpop.f32.mrf.mxu0 }
 0x531   :  { %v4239_v36 = vpop.f32.mrf.mxu1  ;;  %v4221_v32 = vadd.f32 %v4220_v20, %v4180_v6  ;;  %v4314_v20 = vpop.permute.xlu2 %4313 }
 0x532   :  { %v4240_v49 = vadd.f32 %v4239_v36, %v4180_v6 }
 0x533   :  { %v4289_v52 = vmax.f32 %v4221_v32, 0.0 }
 0x534   :  { %v4290_v44 = vmax.f32 %v4240_v49, 0.0 }
 0x535   :  { %v4256_v37 = vpop.f32.mrf.mxu2  ;;  %v4301_v7 = vpack.c.bf16 %v4289_v52, %v4285_v50 }
 0x536   :  { %v4302_v4 = vpack.c.bf16 %v4290_v44, %v4286_v16  ;;  %v4257_v25 = vadd.f32 %v4256_v37, %v4175_v5  ;;  %v4316_v37 = vperm.slane %v4314_v20, 0 }
 0x538   :  { %v4287_v54 = vmax.f32 %v4257_v25, 0.0 }
 0x53d   :  { %v4258_v1 = vpop.f32.mrf.mxu2 }
 0x53e   :  { %v4259_v51 = vadd.f32 %v4258_v1, %v4180_v6  ;;  %v4385_v1 = vlaneseq }
 0x540   :  { %v4291_v58 = vmax.f32 %v4259_v51, 0.0  ;;  %vm4387_vm4 = vcmp.lt.s32.totalorder %v4385_v1, 512 }
 0x542   :  { %v4303_v10 = vpack.c.bf16 %v4291_v58, %v4287_v54 }
 0x54d   :  { %v4223_v28 = vpop.f32.mrf.mxu0  ;;  %v4242_v45 = vpop.f32.mrf.mxu1 }
 0x54e   :  { %v4224_v29 = vadd.f32 %v4223_v28, %v4185_v0  ;;  %v4243_v13 = vadd.f32 %v4242_v45, %v4185_v0 }
 0x550   :  { %v4293_v57 = vmax.f32 %v4224_v29, 0.0  ;;  %v4294_v60 = vmax.f32 %v4243_v13, 0.0 }
 0x554   :  { %v4261_v56 = vpop.f32.mrf.mxu2 }
 0x555   :  { %v4225_v61 = vpop.f32.mrf.mxu0  ;;  %v4244_v26 = vpop.f32.mrf.mxu1  ;;  %v4262_v24 = vadd.f32 %v4261_v56, %v4185_v0 }
 0x556   :  { %v4226_v43 = vadd.f32 %v4225_v61, %v4190_v46  ;;  %v4245_v30 = vadd.f32 %v4244_v26, %v4190_v46 }
 0x557   :  { %v4295_v55 = vmax.f32 %v4262_v24, 0.0 }
 0x558   :  { %v4297_v48 = vmax.f32 %v4226_v43, 0.0  ;;  %v4298_v8 = vmax.f32 %v4245_v30, 0.0 }
 0x55a   :  { %v4305_v35 = vpack.c.bf16 %v4297_v48, %v4293_v57  ;;  %v4306_v33 = vpack.c.bf16 %v4298_v8, %v4294_v60 }
 0x55c   :  { %4326 = vmatpush.bf16.msrb.mxu0 %v4305_v35  ;;  %4339 = vmatpush.bf16.msrb.mxu1 %v4306_v33  ;;  %v4263_v41 = vpop.f32.mrf.mxu2 }
 0x55d   :  { %v4264_v22 = vadd.f32 %v4263_v41, %v4190_v46 }
 0x55f   :  { %v4299_v14 = vmax.f32 %v4264_v22, 0.0 }
 0x560   :  { %4327 = vmatpush.bf16.msrb.mxu0 %v4301_v7  ;;  %4340 = vmatpush.bf16.msrb.mxu1 %v4302_v4 }
 0x561   :  { %v4307_v38 = vpack.c.bf16 %v4299_v14, %v4295_v55 }
 0x563   :  { %4518 = vmatmul.msk.bf16.vlgmr.msrb.gmra.mxu0 %vm4202_vm2, %v4309_v62  ;;  %4519 = vmatmul.msk.bf16.vlgmr.msrb.gmra.mxu1 %vm4202_vm2, %v4309_v62 }
 0x564   :  { %4352 = vmatpush.bf16.msrb.mxu2 %v4307_v38 }
 0x568   :  { %4353 = vmatpush.bf16.msrb.mxu2 %v4303_v10 }
 0x569   :  { %v4275_v11 = vpop.f32.mrf.mxu3 }
 0x56a   :  { %v4276_v42 = vadd.f32 %v4275_v11, %v4175_v5 }
 0x56b   :  { %4520 = vmatmul.msk.bf16.vlgmr.msrb.gmra.mxu2 %vm4202_vm2, %v4309_v62 }
 0x56c   :  { %v4288_v9 = vmax.f32 %v4276_v42, 0.0 }
 0x571   :  { %v4277_v18 = vpop.f32.mrf.mxu3 }
 0x572   :  { %v4278_v3 = vadd.f32 %v4277_v18, %v4180_v6 }
 0x574   :  { %v4292_v39 = vmax.f32 %v4278_v3, 0.0 }
 0x576   :  { %v4304_v12 = vpack.c.bf16 %v4292_v39, %v4288_v9 }
 0x579   :  { %v4280_v27 = vpop.f32.mrf.mxu3 }
 0x57a   :  { %v4281_v53 = vadd.f32 %v4280_v27, %v4185_v0 }
 0x57c   :  { %v4296_v2 = vmax.f32 %v4281_v53, 0.0 }
 0x581   :  { %v4282_v19 = vpop.f32.mrf.mxu3 }
 0x582   :  { %v4283_v17 = vadd.f32 %v4282_v19, %v4190_v46 }
 0x584   :  { %v4300_v40 = vmax.f32 %v4283_v17, 0.0 }
 0x586   :  { %v4308_v15 = vpack.c.bf16 %v4300_v40, %v4296_v2 }
 0x588   :  { %4365 = vmatpush.bf16.msrb.mxu3 %v4308_v15 }
 0x58c   :  { %4366 = vmatpush.bf16.msrb.mxu3 %v4304_v12 }
 0x58f   :  { %4521 = vmatmul.msk.bf16.vlgmr.msrb.gmra.mxu3 %vm4202_vm2, %v4309_v62 }
 0x5e0   :  { %v4329_v59 = vpop.f32.mrf.mxu0  ;;  %v4342_v23 = vpop.f32.mrf.mxu1 }
 0x5e1   :  { %v4343_v0 = vadd.f32 %v4342_v23, %v4316_v37  ;;  %v4330_v13 = vadd.f32 %v4329_v59, %v4316_v37 }
 0x5e3   :  { %v4376_v46 = vrot.slane %v4343_v0, 7 }
 0x5e5   :  { %v4380_v32 = vsel %vm4379_vm5, %v4330_v13, %v4376_v46 }
 0x5e8   :  { %v4331_v47 = vpop.f32.mrf.mxu0  ;;  %v4344_v31 = vpop.f32.mrf.mxu1 }
 0x5ee   :  { %v4355_v34 = vpop.f32.mrf.mxu2 }
 0x5ef   :  { %v4356_v28 = vadd.f32 %v4355_v34, %v4316_v37 }
 0x5f1   :  { %v4377_v29 = vrot.slane %v4356_v28, 6 }
 0x5f6   :  { %v4357_v36 = vpop.f32.mrf.mxu2 }
 0x612   :  { %v4368_v45 = vpop.f32.mrf.mxu3 }
 0x613   :  { %v4369_v6 = vadd.f32 %v4368_v45, %v4316_v37 }
 0x615   :  { %v4378_v61 = vrot.slane %v4369_v6, 5 }
 0x617   :  { %v4382_v43 = vsel %vm4381_vm8, %v4377_v29, %v4378_v61 }
 0x618   :  { %v4383_v26 = vsel %vm3907_vm9, %v4380_v32, %v4382_v43 }
 0x619   :  { %4389 = vst.msk [vmem:[%s7457_s9] sm:$0xf] %vm4387_vm4, %v4383_v26 }
 0x61a   :  { %v4370_v5 = vpop.f32.mrf.mxu3 }

</bundles_post_ra>
